<compile_context>
chip_gen: v6e
topology: v6e:2x2x1
jax: 0.10.0
libtpu: 0.0.40
codegen_flags: <defaults>
</compile_context>

<pallas_src>
import jax
import jax.numpy as jnp
from jax import lax
from jax.experimental import pallas as pl
from jax.experimental.pallas import tpu as pltpu

D = 512          # feature dim fixed by the module
EPS = 1e-5       # nn.LayerNorm default
SLOPE = 0.01     # nn.LeakyReLU default negative_slope


def _modulation_kernel(
    x_ref, id_ref,                 # (TB, num, D), (TB, D)
    nw_ref, nb_ref,                # LayerNorm([num,512]) affine: (num, D)
    w1_ref, b1_ref,                # fused first Linear of both branches: (D, 2D), (1, 2D)
    wa2_ref, ba2_ref,              # f_add second Linear: (D, D), (1, D)
    wm2_ref, bm2_ref,              # f_mul second Linear: (D, D), (1, D)
    lnaw_ref, lnab_ref,            # f_add LayerNorm([1,512]) affine: (1, D)
    lnmw_ref, lnmb_ref,            # f_mul LayerNorm([1,512]) affine: (1, D)
    out_ref,                       # (TB, num, D)
):
    num = nw_ref.shape[0]

    # --- joint LayerNorm over (num, 512) per batch row (single pass) --------
    x = x_ref[...]                                        # (TB, num, D)
    inv_n = 1.0 / (num * D)
    s1 = jnp.sum(jnp.sum(x, axis=-1, keepdims=True), axis=-2, keepdims=True)
    s2 = jnp.sum(jnp.sum(x * x, axis=-1, keepdims=True), axis=-2, keepdims=True)
    mean = s1 * inv_n                                     # (TB, 1, 1)
    var = s2 * inv_n - mean * mean
    x_norm = (x - mean) * lax.rsqrt(var + EPS) * nw_ref[...] + nb_ref[...]

    # --- batched identity MLP; both branches share one fused first matmul ---
    ident = id_ref[...].astype(w1_ref.dtype)              # (TB, D)
    h1 = jnp.dot(ident, w1_ref[...],
                 preferred_element_type=jnp.float32) + b1_ref[...]    # (TB, 2D)
    h_add = jnp.dot(h1[:, :D].astype(wa2_ref.dtype), wa2_ref[...],
                    preferred_element_type=jnp.float32) + ba2_ref[...]
    h_mul = jnp.dot(h1[:, D:].astype(wm2_ref.dtype), wm2_ref[...],
                    preferred_element_type=jnp.float32) + bm2_ref[...]

    def _ln_leaky(h, w, b):
        # LayerNorm([1,512]) == normalize over the 512 features, then LeakyReLU.
        m = jnp.mean(h, axis=-1, keepdims=True)
        v = jnp.mean(h * h, axis=-1, keepdims=True) - m * m
        hn = (h - m) * lax.rsqrt(v + EPS) * w + b
        return jnp.where(hn >= 0, hn, SLOPE * hn)

    mod = (_ln_leaky(h_add, lnaw_ref[...], lnab_ref[...])
           + _ln_leaky(h_mul, lnmw_ref[...], lnmb_ref[...]))          # (TB, D)

    # Broadcast the per-batch modulation over the num tokens and store.
    out_ref[...] = (x_norm + mod[:, None, :]).astype(out_ref.dtype)


def _pack_params(p, weight_dtype=jnp.float32):
    """Fuse the two branches' first Linear and (optionally) cast the big
    512x512 weights.  Use weight_dtype=jnp.bfloat16 on v6e/v7x to halve the
    dominant weight HBM traffic (matmuls still accumulate in f32)."""
    wd = weight_dtype
    return {
        "nw": p["nw"], "nb": p["nb"],
        "w1": jnp.concatenate([p["wa1"], p["wm1"]], axis=1).astype(wd),  # (D, 2D)
        "b1": jnp.concatenate([p["ba1"], p["bm1"]], axis=1),             # (1, 2D)
        "wa2": p["wa2"].astype(wd), "ba2": p["ba2"],
        "wm2": p["wm2"].astype(wd), "bm2": p["bm2"],
        "lnaw": p["lnaw"], "lnab": p["lnab"],
        "lnmw": p["lnmw"], "lnmb": p["lnmb"],
    }


def modulation_part_forward(x, identity, kparams, *, batch_tile=None):
    """x: (B, num, 512), identity: (B, 1, 512) -> (B, num, 512).

    Default: the whole batch is one grid step (everything fits VMEM; weights
    DMA'd once).  On v7x, pass batch_tile (== B or a multiple of 8) such that
    B // batch_tile == 2 to spread the "parallel" grid axis over both cores.
    """
    B, num, d = x.shape
    assert d == D and identity.shape == (B, 1, D)

    TB = B if batch_tile is None else batch_tile
    assert B % TB == 0
    if TB != B:
        assert TB % 8 == 0, "batch_tile < B must be a multiple of 8 (sublane tile)"
    G = B // TB

    ident2 = identity.reshape(B, D)   # wrapper-side reshape, free

    const = lambda shape: pl.BlockSpec(shape, lambda g: (0,) * len(shape))

    grid_spec = pltpu.PrefetchScalarGridSpec(
        num_scalar_prefetch=0,
        grid=(G,),
        in_specs=[
            pl.BlockSpec((TB, num, D), lambda g: (g, 0, 0)),   # x
            pl.BlockSpec((TB, D), lambda g: (g, 0)),           # identity (flattened)
            const((num, D)), const((num, D)),                  # norm weight / bias
            const((D, 2 * D)), const((1, 2 * D)),              # fused Linear 1 (add|mul)
            const((D, D)), const((1, D)),                      # f_add Linear 2
            const((D, D)), const((1, D)),                      # f_mul Linear 2
            const((1, D)), const((1, D)),                      # f_add LN affine
            const((1, D)), const((1, D)),                      # f_mul LN affine
        ],
        # Lanes are fully dense (D=512 = 4 lane tiles).  For num >= 8 the store
        # tile is also sublane-dense; at num=4 the masked sublanes are noise for
        # a 16 KiB single-step output, and keeping the natural 3-D layout avoids
        # in-kernel relayout reshapes.
        out_specs=pl.BlockSpec((TB, num, D), lambda g: (g, 0, 0)),
    )

    return pl.pallas_call(
        _modulation_kernel,
        out_shape=jax.ShapeDtypeStruct((B, num, D), jnp.float32),
        grid_spec=grid_spec,
        compiler_params=pltpu.CompilerParams(
            dimension_semantics=("parallel",),        # megacore split when G > 1
            vmem_limit_bytes=32 * 1024 * 1024,        # explicit; safe on v5e/v6e/v7x
        ),
    )(
        x, ident2,
        kparams["nw"], kparams["nb"],
        kparams["w1"], kparams["b1"],
        kparams["wa2"], kparams["ba2"],
        kparams["wm2"], kparams["bm2"],
        kparams["lnaw"], kparams["lnab"],
        kparams["lnmw"], kparams["lnmb"],
    )


def _reference(x, identity, p):
    """Plain-JAX reference mirroring the PyTorch forward."""
    mean = x.mean(axis=(-2, -1), keepdims=True)
    var = ((x - mean) ** 2).mean(axis=(-2, -1), keepdims=True)
    x_norm = (x - mean) / jnp.sqrt(var + EPS) * p["nw"] + p["nb"]

    def branch(w1, b1, w2, b2, lnw, lnb):
        h = identity @ w1 + b1
        h = h @ w2 + b2
        m = h.mean(axis=(-2, -1), keepdims=True)
        v = ((h - m) ** 2).mean(axis=(-2, -1), keepdims=True)
        h = (h - m) / jnp.sqrt(v + EPS) * lnw + lnb
        return jnp.where(h >= 0, h, SLOPE * h)

    add_b = branch(p["wa1"], p["ba1"], p["wa2"], p["ba2"], p["lnaw"], p["lnab"])
    mul_b = branch(p["wm1"], p["bm1"], p["wm2"], p["bm2"], p["lnmw"], p["lnmb"])
    return x_norm + add_b + mul_b


def _init_params(key, num):
    ks = jax.random.split(key, 16)
    n = lambda k, s, scale=0.02: scale * jax.random.normal(k, s, jnp.float32)
    return {
        # LayerNorm([num, 512]) affine (non-trivial deterministic values)
        "nw": 1.0 + n(ks[0], (num, D)), "nb": n(ks[1], (num, D)),
        # f_add: Linear, Linear, LayerNorm([1,512])  (linear weights as (in,out))
        "wa1": n(ks[2], (D, D)), "ba1": n(ks[3], (1, D)),
        "wa2": n(ks[4], (D, D)), "ba2": n(ks[5], (1, D)),
        "lnaw": 1.0 + n(ks[6], (1, D)), "lnab": n(ks[7], (1, D)),
        # f_mul
        "wm1": n(ks[8], (D, D)), "bm1": n(ks[9], (1, D)),
        "wm2": n(ks[10], (D, D)), "bm2": n(ks[11], (1, D)),
        "lnmw": 1.0 + n(ks[12], (1, D)), "lnmb": n(ks[13], (1, D)),
    }


if __name__ == "__main__":
    key = jax.random.PRNGKey(0)
    k_x, k_id, k_p = jax.random.split(key, 3)

    B, NUM = 2, 4
    x = jax.random.normal(k_x, (B, NUM, D), jnp.float32)
    identity = jax.random.normal(k_id, (B, 1, D), jnp.float32)
    params = _init_params(k_p, NUM)

    # f32 weights here to hold the 1e-3 tolerance; pass jnp.bfloat16 on v6e/v7x.
    kparams = _pack_params(params, weight_dtype=jnp.float32)

    out = modulation_part_forward(x, identity, kparams)
    out = jax.block_until_ready(out)

    ref = _reference(x, identity, params)
    assert out.shape == (B, NUM, D)
    assert jnp.allclose(out, ref, atol=1e-3, rtol=1e-3), "mismatch vs reference"

    print("KERNEL_OK")
</pallas_src>

<mosaic_0001>
module attributes {stable_mosaic.version = 11 : i64} {
  func.func @_modulation_kernel(%arg0: i32, %arg1: memref<2x4x512xf32, #tpu.memory_space<vmem>>, %arg2: memref<2x512xf32, #tpu.memory_space<vmem>>, %arg3: memref<4x512xf32, #tpu.memory_space<vmem>>, %arg4: memref<4x512xf32, #tpu.memory_space<vmem>>, %arg5: memref<512x1024xf32, #tpu.memory_space<vmem>>, %arg6: memref<1x1024xf32, #tpu.memory_space<vmem>>, %arg7: memref<512x512xf32, #tpu.memory_space<vmem>>, %arg8: memref<1x512xf32, #tpu.memory_space<vmem>>, %arg9: memref<512x512xf32, #tpu.memory_space<vmem>>, %arg10: memref<1x512xf32, #tpu.memory_space<vmem>>, %arg11: memref<1x512xf32, #tpu.memory_space<vmem>>, %arg12: memref<1x512xf32, #tpu.memory_space<vmem>>, %arg13: memref<1x512xf32, #tpu.memory_space<vmem>>, %arg14: memref<1x512xf32, #tpu.memory_space<vmem>>, %arg15: memref<2x4x512xf32, #tpu.memory_space<vmem>>) attributes {dimension_semantics = [#tpu.dimension_semantics<parallel>], iteration_bounds = array<i64: 1>, scalar_prefetch = 0 : i64, scratch_operands = 0 : i64, tpu.core_type = #tpu.core_type<tc>, window_params = [{transform_indices = @transform_0, window_bounds = array<i64: 2, 4, 512>}, {transform_indices = @transform_1, window_bounds = array<i64: 2, 512>}, {pipeline_mode = #tpu.pipeline_mode<synchronous>, transform_indices = @transform_2, window_bounds = array<i64: 4, 512>}, {pipeline_mode = #tpu.pipeline_mode<synchronous>, transform_indices = @transform_3, window_bounds = array<i64: 4, 512>}, {pipeline_mode = #tpu.pipeline_mode<synchronous>, transform_indices = @transform_4, window_bounds = array<i64: 512, 1024>}, {pipeline_mode = #tpu.pipeline_mode<synchronous>, transform_indices = @transform_5, window_bounds = array<i64: 1, 1024>}, {pipeline_mode = #tpu.pipeline_mode<synchronous>, transform_indices = @transform_6, window_bounds = array<i64: 512, 512>}, {pipeline_mode = #tpu.pipeline_mode<synchronous>, transform_indices = @transform_7, window_bounds = array<i64: 1, 512>}, {pipeline_mode = #tpu.pipeline_mode<synchronous>, transform_indices = @transform_8, window_bounds = array<i64: 512, 512>}, {pipeline_mode = #tpu.pipeline_mode<synchronous>, transform_indices = @transform_9, window_bounds = array<i64: 1, 512>}, {pipeline_mode = #tpu.pipeline_mode<synchronous>, transform_indices = @transform_10, window_bounds = array<i64: 1, 512>}, {pipeline_mode = #tpu.pipeline_mode<synchronous>, transform_indices = @transform_11, window_bounds = array<i64: 1, 512>}, {pipeline_mode = #tpu.pipeline_mode<synchronous>, transform_indices = @transform_12, window_bounds = array<i64: 1, 512>}, {pipeline_mode = #tpu.pipeline_mode<synchronous>, transform_indices = @transform_13, window_bounds = array<i64: 1, 512>}, {transform_indices = @transform_14, window_bounds = array<i64: 2, 4, 512>}]} {
    %c0 = arith.constant 0 : index
    %c0_0 = arith.constant 0 : index
    %c0_1 = arith.constant 0 : index
    %0 = vector.load %arg1[%c0, %c0_0, %c0_1] : memref<2x4x512xf32, #tpu.memory_space<vmem>>, vector<2x4x512xf32>
    %cst = arith.constant dense<0.000000e+00> : vector<2x4xf32>
    %1 = vector.multi_reduction <add>, %0, %cst [2] : vector<2x4x512xf32> to vector<2x4xf32>
    %2 = vector.shape_cast %1 : vector<2x4xf32> to vector<2x4x1xf32>
    %cst_2 = arith.constant dense<0.000000e+00> : vector<2x1xf32>
    %3 = vector.multi_reduction <add>, %2, %cst_2 [1] : vector<2x4x1xf32> to vector<2x1xf32>
    %4 = vector.shape_cast %3 : vector<2x1xf32> to vector<2x1x1xf32>
    %5 = arith.mulf %0, %0 : vector<2x4x512xf32>
    %cst_3 = arith.constant dense<0.000000e+00> : vector<2x4xf32>
    %6 = vector.multi_reduction <add>, %5, %cst_3 [2] : vector<2x4x512xf32> to vector<2x4xf32>
    %7 = vector.shape_cast %6 : vector<2x4xf32> to vector<2x4x1xf32>
    %cst_4 = arith.constant dense<0.000000e+00> : vector<2x1xf32>
    %8 = vector.multi_reduction <add>, %7, %cst_4 [1] : vector<2x4x1xf32> to vector<2x1xf32>
    %9 = vector.shape_cast %8 : vector<2x1xf32> to vector<2x1x1xf32>
    %cst_5 = arith.constant 4.8828125E-4 : f32
    %10 = vector.broadcast %cst_5 : f32 to vector<2x1x1xf32>
    %11 = arith.mulf %4, %10 : vector<2x1x1xf32>
    %cst_6 = arith.constant 4.8828125E-4 : f32
    %12 = vector.broadcast %cst_6 : f32 to vector<2x1x1xf32>
    %13 = arith.mulf %9, %12 : vector<2x1x1xf32>
    %14 = arith.mulf %11, %11 : vector<2x1x1xf32>
    %15 = arith.subf %13, %14 : vector<2x1x1xf32>
    %16 = vector.broadcast %11 : vector<2x1x1xf32> to vector<2x4x512xf32>
    %17 = arith.subf %0, %16 : vector<2x4x512xf32>
    %cst_7 = arith.constant 9.99999974E-6 : f32
    %18 = vector.broadcast %cst_7 : f32 to vector<2x1x1xf32>
    %19 = arith.addf %15, %18 : vector<2x1x1xf32>
    %20 = math.rsqrt %19 : vector<2x1x1xf32>
    %21 = vector.broadcast %20 : vector<2x1x1xf32> to vector<2x4x512xf32>
    %22 = arith.mulf %17, %21 : vector<2x4x512xf32>
    %c0_8 = arith.constant 0 : index
    %c0_9 = arith.constant 0 : index
    %23 = vector.load %arg3[%c0_8, %c0_9] : memref<4x512xf32, #tpu.memory_space<vmem>>, vector<4x512xf32>
    %24 = vector.shape_cast %23 : vector<4x512xf32> to vector<1x4x512xf32>
    %25 = vector.broadcast %24 : vector<1x4x512xf32> to vector<2x4x512xf32>
    %26 = arith.mulf %22, %25 : vector<2x4x512xf32>
    %c0_10 = arith.constant 0 : index
    %c0_11 = arith.constant 0 : index
    %27 = vector.load %arg4[%c0_10, %c0_11] : memref<4x512xf32, #tpu.memory_space<vmem>>, vector<4x512xf32>
    %28 = vector.shape_cast %27 : vector<4x512xf32> to vector<1x4x512xf32>
    %29 = vector.broadcast %28 : vector<1x4x512xf32> to vector<2x4x512xf32>
    %30 = arith.addf %26, %29 : vector<2x4x512xf32>
    %c0_12 = arith.constant 0 : index
    %c0_13 = arith.constant 0 : index
    %31 = vector.load %arg2[%c0_12, %c0_13] : memref<2x512xf32, #tpu.memory_space<vmem>>, vector<2x512xf32>
    %c0_14 = arith.constant 0 : index
    %c0_15 = arith.constant 0 : index
    %32 = vector.load %arg5[%c0_14, %c0_15] : memref<512x1024xf32, #tpu.memory_space<vmem>>, vector<512x1024xf32>
    %cst_16 = arith.constant dense<0.000000e+00> : vector<2x1024xf32>
    %33 = tpu.matmul %31, %32, %cst_16 {dimension_numbers = #tpu.dot_dimension_numbers<[1], [0], [0], [1], [0, 0, 1, 1], [], []>} : vector<2x512xf32>, vector<512x1024xf32>, vector<2x1024xf32> -> vector<2x1024xf32>
    %c0_17 = arith.constant 0 : index
    %c0_18 = arith.constant 0 : index
    %34 = vector.load %arg6[%c0_17, %c0_18] : memref<1x1024xf32, #tpu.memory_space<vmem>>, vector<1x1024xf32>
    %35 = vector.broadcast %34 : vector<1x1024xf32> to vector<2x1024xf32>
    %36 = arith.addf %33, %35 : vector<2x1024xf32>
    %37 = vector.extract_strided_slice %36 {offsets = [0, 0], sizes = [2, 512], strides = [1, 1]} : vector<2x1024xf32> to vector<2x512xf32>
    %c0_19 = arith.constant 0 : index
    %c0_20 = arith.constant 0 : index
    %38 = vector.load %arg7[%c0_19, %c0_20] : memref<512x512xf32, #tpu.memory_space<vmem>>, vector<512x512xf32>
    %cst_21 = arith.constant dense<0.000000e+00> : vector<2x512xf32>
    %39 = tpu.matmul %37, %38, %cst_21 {dimension_numbers = #tpu.dot_dimension_numbers<[1], [0], [0], [1], [0, 0, 1, 1], [], []>} : vector<2x512xf32>, vector<512x512xf32>, vector<2x512xf32> -> vector<2x512xf32>
    %c0_22 = arith.constant 0 : index
    %c0_23 = arith.constant 0 : index
    %40 = vector.load %arg8[%c0_22, %c0_23] : memref<1x512xf32, #tpu.memory_space<vmem>>, vector<1x512xf32>
    %41 = vector.broadcast %40 : vector<1x512xf32> to vector<2x512xf32>
    %42 = arith.addf %39, %41 : vector<2x512xf32>
    %43 = vector.extract_strided_slice %36 {offsets = [0, 512], sizes = [2, 512], strides = [1, 1]} : vector<2x1024xf32> to vector<2x512xf32>
    %c0_24 = arith.constant 0 : index
    %c0_25 = arith.constant 0 : index
    %44 = vector.load %arg9[%c0_24, %c0_25] : memref<512x512xf32, #tpu.memory_space<vmem>>, vector<512x512xf32>
    %cst_26 = arith.constant dense<0.000000e+00> : vector<2x512xf32>
    %45 = tpu.matmul %43, %44, %cst_26 {dimension_numbers = #tpu.dot_dimension_numbers<[1], [0], [0], [1], [0, 0, 1, 1], [], []>} : vector<2x512xf32>, vector<512x512xf32>, vector<2x512xf32> -> vector<2x512xf32>
    %c0_27 = arith.constant 0 : index
    %c0_28 = arith.constant 0 : index
    %46 = vector.load %arg10[%c0_27, %c0_28] : memref<1x512xf32, #tpu.memory_space<vmem>>, vector<1x512xf32>
    %47 = vector.broadcast %46 : vector<1x512xf32> to vector<2x512xf32>
    %48 = arith.addf %45, %47 : vector<2x512xf32>
    %c0_29 = arith.constant 0 : index
    %c0_30 = arith.constant 0 : index
    %49 = vector.load %arg11[%c0_29, %c0_30] : memref<1x512xf32, #tpu.memory_space<vmem>>, vector<1x512xf32>
    %c0_31 = arith.constant 0 : index
    %c0_32 = arith.constant 0 : index
    %50 = vector.load %arg12[%c0_31, %c0_32] : memref<1x512xf32, #tpu.memory_space<vmem>>, vector<1x512xf32>
    %cst_33 = arith.constant dense<0.000000e+00> : vector<2xf32>
    %51 = vector.multi_reduction <add>, %42, %cst_33 [1] : vector<2x512xf32> to vector<2xf32>
    %52 = vector.shape_cast %51 : vector<2xf32> to vector<2x1xf32>
    %cst_34 = arith.constant 5.120000e+02 : f32
    %53 = vector.broadcast %cst_34 : f32 to vector<2x1xf32>
    %54 = arith.divf %52, %53 : vector<2x1xf32>
    %55 = arith.mulf %42, %42 : vector<2x512xf32>
    %cst_35 = arith.constant dense<0.000000e+00> : vector<2xf32>
    %56 = vector.multi_reduction <add>, %55, %cst_35 [1] : vector<2x512xf32> to vector<2xf32>
    %57 = vector.shape_cast %56 : vector<2xf32> to vector<2x1xf32>
    %cst_36 = arith.constant 5.120000e+02 : f32
    %58 = vector.broadcast %cst_36 : f32 to vector<2x1xf32>
    %59 = arith.divf %57, %58 : vector<2x1xf32>
    %60 = arith.mulf %54, %54 : vector<2x1xf32>
    %61 = arith.subf %59, %60 : vector<2x1xf32>
    %62 = vector.broadcast %54 : vector<2x1xf32> to vector<2x512xf32>
    %63 = arith.subf %42, %62 : vector<2x512xf32>
    %cst_37 = arith.constant 9.99999974E-6 : f32
    %64 = vector.broadcast %cst_37 : f32 to vector<2x1xf32>
    %65 = arith.addf %61, %64 : vector<2x1xf32>
    %66 = math.rsqrt %65 : vector<2x1xf32>
    %67 = vector.broadcast %66 : vector<2x1xf32> to vector<2x512xf32>
    %68 = arith.mulf %63, %67 : vector<2x512xf32>
    %69 = vector.broadcast %49 : vector<1x512xf32> to vector<2x512xf32>
    %70 = arith.mulf %68, %69 : vector<2x512xf32>
    %71 = vector.broadcast %50 : vector<1x512xf32> to vector<2x512xf32>
    %72 = arith.addf %70, %71 : vector<2x512xf32>
    %cst_38 = arith.constant 0.000000e+00 : f32
    %73 = vector.broadcast %cst_38 : f32 to vector<2x512xf32>
    %74 = arith.cmpf oge, %72, %73 : vector<2x512xf32>
    %cst_39 = arith.constant 0.00999999977 : f32
    %75 = vector.broadcast %cst_39 : f32 to vector<2x512xf32>
    %76 = arith.mulf %75, %72 : vector<2x512xf32>
    %77 = arith.select %74, %72, %76 : vector<2x512xi1>, vector<2x512xf32>
    %c0_40 = arith.constant 0 : index
    %c0_41 = arith.constant 0 : index
    %78 = vector.load %arg13[%c0_40, %c0_41] : memref<1x512xf32, #tpu.memory_space<vmem>>, vector<1x512xf32>
    %c0_42 = arith.constant 0 : index
    %c0_43 = arith.constant 0 : index
    %79 = vector.load %arg14[%c0_42, %c0_43] : memref<1x512xf32, #tpu.memory_space<vmem>>, vector<1x512xf32>
    %cst_44 = arith.constant dense<0.000000e+00> : vector<2xf32>
    %80 = vector.multi_reduction <add>, %48, %cst_44 [1] : vector<2x512xf32> to vector<2xf32>
    %81 = vector.shape_cast %80 : vector<2xf32> to vector<2x1xf32>
    %cst_45 = arith.constant 5.120000e+02 : f32
    %82 = vector.broadcast %cst_45 : f32 to vector<2x1xf32>
    %83 = arith.divf %81, %82 : vector<2x1xf32>
    %84 = arith.mulf %48, %48 : vector<2x512xf32>
    %cst_46 = arith.constant dense<0.000000e+00> : vector<2xf32>
    %85 = vector.multi_reduction <add>, %84, %cst_46 [1] : vector<2x512xf32> to vector<2xf32>
    %86 = vector.shape_cast %85 : vector<2xf32> to vector<2x1xf32>
    %cst_47 = arith.constant 5.120000e+02 : f32
    %87 = vector.broadcast %cst_47 : f32 to vector<2x1xf32>
    %88 = arith.divf %86, %87 : vector<2x1xf32>
    %89 = arith.mulf %83, %83 : vector<2x1xf32>
    %90 = arith.subf %88, %89 : vector<2x1xf32>
    %91 = vector.broadcast %83 : vector<2x1xf32> to vector<2x512xf32>
    %92 = arith.subf %48, %91 : vector<2x512xf32>
    %cst_48 = arith.constant 9.99999974E-6 : f32
    %93 = vector.broadcast %cst_48 : f32 to vector<2x1xf32>
    %94 = arith.addf %90, %93 : vector<2x1xf32>
    %95 = math.rsqrt %94 : vector<2x1xf32>
    %96 = vector.broadcast %95 : vector<2x1xf32> to vector<2x512xf32>
    %97 = arith.mulf %92, %96 : vector<2x512xf32>
    %98 = vector.broadcast %78 : vector<1x512xf32> to vector<2x512xf32>
    %99 = arith.mulf %97, %98 : vector<2x512xf32>
    %100 = vector.broadcast %79 : vector<1x512xf32> to vector<2x512xf32>
    %101 = arith.addf %99, %100 : vector<2x512xf32>
    %cst_49 = arith.constant 0.000000e+00 : f32
    %102 = vector.broadcast %cst_49 : f32 to vector<2x512xf32>
    %103 = arith.cmpf oge, %101, %102 : vector<2x512xf32>
    %cst_50 = arith.constant 0.00999999977 : f32
    %104 = vector.broadcast %cst_50 : f32 to vector<2x512xf32>
    %105 = arith.mulf %104, %101 : vector<2x512xf32>
    %106 = arith.select %103, %101, %105 : vector<2x512xi1>, vector<2x512xf32>
    %107 = arith.addf %77, %106 : vector<2x512xf32>
    %108 = vector.shape_cast %107 : vector<2x512xf32> to vector<2x1x512xf32>
    %109 = vector.broadcast %108 : vector<2x1x512xf32> to vector<2x4x512xf32>
    %110 = arith.addf %30, %109 : vector<2x4x512xf32>
    %c0_51 = arith.constant 0 : index
    %c0_52 = arith.constant 0 : index
    %c0_53 = arith.constant 0 : index
    %111 = vector.load %arg15[%c0_51, %c0_52, %c0_53] : memref<2x4x512xf32, #tpu.memory_space<vmem>>, vector<2x4x512xf32>
    tpu.vector_store %arg15[%c0_51, %c0_52, %c0_53], %110 {strides = array<i32>} : memref<2x4x512xf32, #tpu.memory_space<vmem>>, vector<2x4x512xf32>,
    return
  }
  func.func @transform_0(%arg0: i32) -> (i32, i32, i32) {
    %c0_i32 = arith.constant 0 : i32
    %c0_i32_0 = arith.constant 0 : i32
    %c0_i32_1 = arith.constant 0 : i32
    return %arg0, %c0_i32, %c0_i32_0 : i32, i32, i32
  }
  func.func @transform_1(%arg0: i32) -> (i32, i32) {
    %c0_i32 = arith.constant 0 : i32
    %c0_i32_0 = arith.constant 0 : i32
    return %arg0, %c0_i32 : i32, i32
  }
  func.func @transform_2(%arg0: i32) -> (i32, i32) {
    %c0_i32 = arith.constant 0 : i32
    %c0_i32_0 = arith.constant 0 : i32
    %c0_i32_1 = arith.constant 0 : i32
    return %c0_i32, %c0_i32_0 : i32, i32
  }
  func.func @transform_3(%arg0: i32) -> (i32, i32) {
    %c0_i32 = arith.constant 0 : i32
    %c0_i32_0 = arith.constant 0 : i32
    %c0_i32_1 = arith.constant 0 : i32
    return %c0_i32, %c0_i32_0 : i32, i32
  }
  func.func @transform_4(%arg0: i32) -> (i32, i32) {
    %c0_i32 = arith.constant 0 : i32
    %c0_i32_0 = arith.constant 0 : i32
    %c0_i32_1 = arith.constant 0 : i32
    return %c0_i32, %c0_i32_0 : i32, i32
  }
  func.func @transform_5(%arg0: i32) -> (i32, i32) {
    %c0_i32 = arith.constant 0 : i32
    %c0_i32_0 = arith.constant 0 : i32
    %c0_i32_1 = arith.constant 0 : i32
    return %c0_i32, %c0_i32_0 : i32, i32
  }
  func.func @transform_6(%arg0: i32) -> (i32, i32) {
    %c0_i32 = arith.constant 0 : i32
    %c0_i32_0 = arith.constant 0 : i32
    %c0_i32_1 = arith.constant 0 : i32
    return %c0_i32, %c0_i32_0 : i32, i32
  }
  func.func @transform_7(%arg0: i32) -> (i32, i32) {
    %c0_i32 = arith.constant 0 : i32
    %c0_i32_0 = arith.constant 0 : i32
    %c0_i32_1 = arith.constant 0 : i32
    return %c0_i32, %c0_i32_0 : i32, i32
  }
  func.func @transform_8(%arg0: i32) -> (i32, i32) {
    %c0_i32 = arith.constant 0 : i32
    %c0_i32_0 = arith.constant 0 : i32
    %c0_i32_1 = arith.constant 0 : i32
    return %c0_i32, %c0_i32_0 : i32, i32
  }
  func.func @transform_9(%arg0: i32) -> (i32, i32) {
    %c0_i32 = arith.constant 0 : i32
    %c0_i32_0 = arith.constant 0 : i32
    %c0_i32_1 = arith.constant 0 : i32
    return %c0_i32, %c0_i32_0 : i32, i32
  }
  func.func @transform_10(%arg0: i32) -> (i32, i32) {
    %c0_i32 = arith.constant 0 : i32
    %c0_i32_0 = arith.constant 0 : i32
    %c0_i32_1 = arith.constant 0 : i32
    return %c0_i32, %c0_i32_0 : i32, i32
  }
  func.func @transform_11(%arg0: i32) -> (i32, i32) {
    %c0_i32 = arith.constant 0 : i32
    %c0_i32_0 = arith.constant 0 : i32
    %c0_i32_1 = arith.constant 0 : i32
    return %c0_i32, %c0_i32_0 : i32, i32
  }
  func.func @transform_12(%arg0: i32) -> (i32, i32) {
    %c0_i32 = arith.constant 0 : i32
    %c0_i32_0 = arith.constant 0 : i32
    %c0_i32_1 = arith.constant 0 : i32
    return %c0_i32, %c0_i32_0 : i32, i32
  }
  func.func @transform_13(%arg0: i32) -> (i32, i32) {
    %c0_i32 = arith.constant 0 : i32
    %c0_i32_0 = arith.constant 0 : i32
    %c0_i32_1 = arith.constant 0 : i32
    return %c0_i32, %c0_i32_0 : i32, i32
  }
  func.func @transform_14(%arg0: i32) -> (i32, i32, i32) {
    %c0_i32 = arith.constant 0 : i32
    %c0_i32_0 = arith.constant 0 : i32
    %c0_i32_1 = arith.constant 0 : i32
    return %arg0, %c0_i32, %c0_i32_0 : i32, i32, i32
  }
}

</mosaic_0001>

<bundles_post_ra>
// kernel: tpu_custom_call.1
= control target key start
LH: loop header
LB: loop body
LE: loop exit
PB: predicated region body
PF: predicated region fallthrough
CT: control target
= control target key end

     0   :  { %19 = vsyncpa [#allocation3], 0  ;;  %s3718_s0 = inlined_call_operand.hbm [shape: f32[2,4,512], index: 0, kind: input, shape index: {}]   ;;  %s3719_s1 = inlined_call_operand.hbm [shape: f32[2,512], index: 1, kind: input, shape index: {}]   ;;  %s3720_s2 = inlined_call_operand.hbm [shape: f32[4,512], index: 2, kind: input, shape index: {}]   ;;  %s3721_s3 = inlined_call_operand.hbm [shape: f32[4,512], index: 3, kind: input, shape index: {}]   ;;  %s3722_s4 = inlined_call_operand.hbm [shape: f32[512,1024], index: 4, kind: input, shape index: {}]   ;;  %s3723_s5 = inlined_call_operand.hbm [shape: f32[1,1024], index: 5, kind: input, shape index: {}]   ;;  %s3724_s6 = inlined_call_operand.hbm [shape: f32[512,512], index: 6, kind: input, shape index: {}]   ;;  %s3725_s7 = inlined_call_operand.hbm [shape: f32[1,512], index: 7, kind: input, shape index: {}]   ;;  %s3726_s8 = inlined_call_operand.hbm [shape: f32[512,512], index: 8, kind: input, shape index: {}]   ;;  %s3727_s9 = inlined_call_operand.hbm [shape: f32[1,512], index: 9, kind: input, shape index: {}]   ;;  %s3728_s10 = inlined_call_operand.hbm [shape: f32[1,512], index: 10, kind: input, shape index: {}]   ;;  %s3729_s11 = inlined_call_operand.hbm [shape: f32[1,512], index: 11, kind: input, shape index: {}]   ;;  %s3730_s12 = inlined_call_operand.hbm [shape: f32[1,512], index: 12, kind: input, shape index: {}]   ;;  %s3731_s13 = inlined_call_operand.hbm [shape: f32[1,512], index: 13, kind: input, shape index: {}]   ;;  %s3732_s14 = inlined_call_operand.hbm [shape: f32[2,4,512], index: 14, kind: output, shape index: {}]  }
   0x1   :  { %20 = vsyncpa [#allocation6], 0 }
   0x2   :  { %21 = vsyncpa [#allocation9], 0 }
   0x3   :  { %22 = vsyncpa [#allocation12], 0 }
   0x4   :  { %23 = vsyncpa [#allocation15], 0 }
   0x5   :  { %24 = vsyncpa [#allocation18], 0 }
   0x6   :  { %25 = vsyncpa [#allocation21], 0 }
   0x7   :  { %26 = vsyncpa [#allocation24], 0 }
   0x8   :  { %27 = vsyncpa [#allocation4], 0  ;;  %s3285_s29 = smov [#allocation5]   ;;  %s3286_s15 = smov [#allocation8]  }
   0x9   :  { %s46_s30 = sshll.u32 %s3285_s29, 4  ;;  %s66_s16 = sshll.u32 %s3286_s15, 4  ;;  %s47_s30 = int_to_ptr.vmem [resolvable:$true] %s46_s30  ;;  %s67_s16 = int_to_ptr.vmem [resolvable:$true] %s66_s16 }
   0xa   :  { %s2975_s17 = scalar_lea.vmem %s47_s30, 128  ;;  %p2980_p1 = scmp.lt.s32.totalorder %s47_s30, %s47_s30 }
   0xb   :  { %p2976_p0 = scmp.ne.s32.totalorder %s47_s30, %s2975_s17  ;;  %p2981_p2 = scmp.lt.s32.totalorder %s2975_s17, %s2975_s17 }
   0xd   :  { %p2982_p3 = por %p2981_p2, %p2980_p1 }
   0xf   :  { %p2983_p4 = pnand %p2982_p3, %p2976_p0 }
  0x11   :  { %2986 = shalt.err (!%p2983_p4)
}
  0x12   :  { %49 = dma.hbm_to_vmem [thread:$0]  %s3719_s1, 128, %s47_s30, [#allocation6]  }
  0x13   :  { %s2995_s20 = scalar_lea.vmem %s67_s16, 256  ;;  %p3000_p6 = scmp.lt.s32.totalorder %s67_s16, %s67_s16 }
  0x14   :  { %p2996_p5 = scmp.ne.s32.totalorder %s67_s16, %s2995_s20  ;;  %p3001_p7 = scmp.lt.s32.totalorder %s2995_s20, %s2995_s20 }
  0x16   :  { %p3002_p8 = por %p3001_p7, %p3000_p6 }
  0x18   :  { %p3003_p9 = pnand %p3002_p8, %p2996_p5 }
  0x1a   :  { %3006 = shalt.err (!%p3003_p9)
}
  0x1b   :  { %69 = dma.hbm_to_vmem [thread:$0]  %s3721_s3, 256, %s67_s16, [#allocation9]  }
  0x1c   :  { %s3287_s23 = smov [#allocation11]   ;;  %s3288_s25 = smov [#allocation14]  }
  0x1d   :  { %s88_s24 = sshll.u32 %s3287_s23, 4  ;;  %s110_s26 = sshll.u32 %s3288_s25, 4  ;;  %s89_s24 = int_to_ptr.vmem [resolvable:$true] %s88_s24  ;;  %s111_s26 = int_to_ptr.vmem [resolvable:$true] %s110_s26 }
  0x1e   :  { %s3015_s27 = scalar_lea.vmem %s89_s24, 128  ;;  %p3020_p11 = scmp.lt.s32.totalorder %s89_s24, %s89_s24 }
  0x1f   :  { %p3016_p10 = scmp.ne.s32.totalorder %s89_s24, %s3015_s27  ;;  %p3021_p12 = scmp.lt.s32.totalorder %s3015_s27, %s3015_s27 }
  0x21   :  { %p3022_p13 = por %p3021_p12, %p3020_p11 }
  0x23   :  { %p3023_p0 = pnand %p3022_p13, %p3016_p10 }
  0x25   :  { %3026 = shalt.err (!%p3023_p0)
}
  0x26   :  { %91 = dma.hbm_to_vmem [thread:$0]  %s3723_s5, 128, %s89_s24, [#allocation12]  }
  0x27   :  { %s3035_s29 = scalar_lea.vmem %s111_s26, 64  ;;  %p3040_p2 = scmp.lt.s32.totalorder %s111_s26, %s111_s26 }
  0x28   :  { %p3036_p1 = scmp.ne.s32.totalorder %s111_s26, %s3035_s29  ;;  %p3041_p3 = scmp.lt.s32.totalorder %s3035_s29, %s3035_s29 }
  0x2a   :  { %p3042_p4 = por %p3041_p3, %p3040_p2 }
  0x2c   :  { %p3043_p5 = pnand %p3042_p4, %p3036_p1 }
  0x2e   :  { %3046 = shalt.err (!%p3043_p5)
}
  0x2f   :  { %113 = dma.hbm_to_vmem [thread:$0]  %s3725_s7, 64, %s111_s26, [#allocation15]  }
  0x30   :  { %s3289_s15 = smov [#allocation17]   ;;  %s3290_s17 = smov [#allocation20]  }
  0x31   :  { %s132_s16 = sshll.u32 %s3289_s15, 4  ;;  %s152_s18 = sshll.u32 %s3290_s17, 4  ;;  %s133_s16 = int_to_ptr.vmem [resolvable:$true] %s132_s16  ;;  %s153_s18 = int_to_ptr.vmem [resolvable:$true] %s152_s18 }
  0x32   :  { %s3055_s19 = scalar_lea.vmem %s133_s16, 64  ;;  %p3060_p7 = scmp.lt.s32.totalorder %s133_s16, %s133_s16 }
  0x33   :  { %p3056_p6 = scmp.ne.s32.totalorder %s133_s16, %s3055_s19  ;;  %p3061_p8 = scmp.lt.s32.totalorder %s3055_s19, %s3055_s19 }
  0x35   :  { %p3062_p9 = por %p3061_p8, %p3060_p7 }
  0x37   :  { %p3063_p10 = pnand %p3062_p9, %p3056_p6 }
  0x39   :  { %3066 = shalt.err (!%p3063_p10)
}
  0x3a   :  { %135 = dma.hbm_to_vmem [thread:$0]  %s3727_s9, 64, %s133_s16, [#allocation18]  }
  0x3b   :  { %s3075_s21 = scalar_lea.vmem %s153_s18, 64  ;;  %p3080_p12 = scmp.lt.s32.totalorder %s153_s18, %s153_s18 }
  0x3c   :  { %p3076_p11 = scmp.ne.s32.totalorder %s153_s18, %s3075_s21  ;;  %p3081_p13 = scmp.lt.s32.totalorder %s3075_s21, %s3075_s21 }
  0x3e   :  { %p3082_p0 = por %p3081_p13, %p3080_p12 }
  0x40   :  { %p3083_p1 = pnand %p3082_p0, %p3076_p11 }
  0x42   :  { %3086 = shalt.err (!%p3083_p1)
}
  0x43   :  { %155 = dma.hbm_to_vmem [thread:$0]  %s3729_s11, 64, %s153_s18, [#allocation21]  }
  0x44   :  { %s3291_s23 = smov [#allocation2]  }
  0x45   :  { %s33_s24 = sshll.u32 %s3291_s23, 4  ;;  %s34_s24 = int_to_ptr.vmem [resolvable:$true] %s33_s24 }
  0x46   :  { %s3095_s25 = scalar_lea.vmem %s34_s24, 512  ;;  %p3100_p3 = scmp.lt.s32.totalorder %s34_s24, %s34_s24 }
  0x47   :  { %p3096_p2 = scmp.ne.s32.totalorder %s34_s24, %s3095_s25  ;;  %p3101_p4 = scmp.lt.s32.totalorder %s3095_s25, %s3095_s25 }
  0x49   :  { %p3102_p5 = por %p3101_p4, %p3100_p3 }
  0x4b   :  { %p3103_p6 = pnand %p3102_p5, %p3096_p2 }
  0x4d   :  { %3106 = shalt.err (!%p3103_p6)
}
  0x4e   :  { %s3292_s9 = smov 256   ;;  %s3293_s26 = smov 16  }
  0x4f   :  { %39 = dma.hbm_to_vmem [thread:$0]  %s3718_s0, 512, %s34_s24, [#allocation3], %s3292_s9, %s3292_s9, %s3293_s26  }
  0x50   :  { %s3294_s11 = smov [#allocation7]   ;;  %s3295_s29 = smov [#allocation10]  }
  0x51   :  { %s56_s28 = sshll.u32 %s3294_s11, 4  ;;  %s75_s3 = sshll.u32 %s3295_s29, 4  ;;  %s57_s28 = int_to_ptr.vmem [resolvable:$true] %s56_s28  ;;  %s76_s3 = int_to_ptr.vmem [resolvable:$true] %s75_s3 }
  0x52   :  { %s3115_s30 = scalar_lea.vmem %s57_s28, 256  ;;  %p3120_p8 = scmp.lt.s32.totalorder %s57_s28, %s57_s28 }
  0x53   :  { %p3116_p7 = scmp.ne.s32.totalorder %s57_s28, %s3115_s30  ;;  %p3121_p9 = scmp.lt.s32.totalorder %s3115_s30, %s3115_s30 }
  0x55   :  { %p3122_p10 = por %p3121_p9, %p3120_p8 }
  0x57   :  { %p3123_p11 = pnand %p3122_p10, %p3116_p7 }
  0x59   :  { %3126 = shalt.err (!%p3123_p11)
}
  0x5a   :  { %59 = dma.hbm_to_vmem [thread:$0]  %s3720_s2, 256, %s57_s28, [#allocation6]  }
  0x5b   :  { %s3135_s17 = scalar_lea.vmem %s76_s3, 65536  ;;  %p3140_p13 = scmp.lt.s32.totalorder %s76_s3, %s76_s3 }
  0x5c   :  { %p3136_p12 = scmp.ne.s32.totalorder %s76_s3, %s3135_s17  ;;  %p3141_p0 = scmp.lt.s32.totalorder %s3135_s17, %s3135_s17 }
  0x5e   :  { %p3142_p1 = por %p3141_p0, %p3140_p13 }
  0x60   :  { %p3143_p2 = pnand %p3142_p1, %p3136_p12 }
  0x62   :  { %3146 = shalt.err (!%p3143_p2)
}
  0x63   :  { %s3296_s0 = smov 1024   ;;  %s3297_s18 = smov 64  }
  0x64   :  { %81 = dma.hbm_to_vmem [thread:$0]  %s3722_s4, 65536, %s76_s3, [#allocation9], %s3296_s0, %s3296_s0, %s3297_s18  }
  0x65   :  { %s3298_s20 = smov [#allocation13]  }
  0x66   :  { %s97_s21 = sshll.u32 %s3298_s20, 4  ;;  %s98_s21 = int_to_ptr.vmem [resolvable:$true] %s97_s21 }
  0x67   :  { %s3155_s7 = scalar_lea.vmem %s98_s21, 32768  ;;  %p3160_p4 = scmp.lt.s32.totalorder %s98_s21, %s98_s21 }
  0x68   :  { %p3156_p3 = scmp.ne.s32.totalorder %s98_s21, %s3155_s7  ;;  %p3161_p5 = scmp.lt.s32.totalorder %s3155_s7, %s3155_s7 }
  0x6a   :  { %p3162_p6 = por %p3161_p5, %p3160_p4 }
  0x6c   :  { %p3163_p7 = pnand %p3162_p6, %p3156_p3 }
  0x6e   :  { %3166 = shalt.err (!%p3163_p7)
}
  0x6f   :  { %s3299_s2 = smov 512   ;;  %s3300_s22 = smov 32  }
  0x70   :  { %103 = dma.hbm_to_vmem [thread:$0]  %s3724_s6, 32768, %s98_s21, [#allocation12], %s3299_s2, %s3299_s2, %s3300_s22  }
  0x71   :  { %s3301_s25 = smov [#allocation16]   ;;  %s3302_s1 = smov [#allocation19]  }
  0x72   :  { %s119_s27 = sshll.u32 %s3301_s25, 4  ;;  %s142_s4 = sshll.u32 %s3302_s1, 4  ;;  %s120_s27 = int_to_ptr.vmem [resolvable:$true] %s119_s27  ;;  %s143_s4 = int_to_ptr.vmem [resolvable:$true] %s142_s4 }
  0x73   :  { %s3175_s11 = scalar_lea.vmem %s120_s27, 32768  ;;  %p3180_p9 = scmp.lt.s32.totalorder %s120_s27, %s120_s27 }
  0x74   :  { %p3176_p8 = scmp.ne.s32.totalorder %s120_s27, %s3175_s11  ;;  %p3181_p10 = scmp.lt.s32.totalorder %s3175_s11, %s3175_s11 }
  0x76   :  { %p3182_p11 = por %p3181_p10, %p3180_p9 }
  0x78   :  { %p3183_p12 = pnand %p3182_p11, %p3176_p8 }
  0x7a   :  { %3186 = shalt.err (!%p3183_p12)
}
  0x7b   :  { %125 = dma.hbm_to_vmem [thread:$0]  %s3726_s8, 32768, %s120_s27, [#allocation15], %s3299_s2, %s3299_s2, %s3300_s22  }
  0x7c   :  { %s3195_s3 = scalar_lea.vmem %s143_s4, 64  ;;  %p3200_p0 = scmp.lt.s32.totalorder %s143_s4, %s143_s4 }
  0x7d   :  { %p3196_p13 = scmp.ne.s32.totalorder %s143_s4, %s3195_s3  ;;  %p3201_p1 = scmp.lt.s32.totalorder %s3195_s3, %s3195_s3 }
  0x7f   :  { %p3202_p2 = por %p3201_p1, %p3200_p0 }
  0x81   :  { %p3203_p3 = pnand %p3202_p2, %p3196_p13 }
  0x83   :  { %3206 = shalt.err (!%p3203_p3)
}
  0x84   :  { %145 = dma.hbm_to_vmem [thread:$0]  %s3728_s10, 64, %s143_s4, [#allocation18]  }
  0x85   :  { %s3303_s15 = smov [#allocation22]   ;;  %s3304_s17 = smov [#allocation23]  }
  0x86   :  { %s162_s16 = sshll.u32 %s3303_s15, 4  ;;  %s172_s0 = sshll.u32 %s3304_s17, 4  ;;  %s163_s16 = int_to_ptr.vmem [resolvable:$true] %s162_s16  ;;  %s173_s0 = int_to_ptr.vmem [resolvable:$true] %s172_s0 }
  0x87   :  { %s3215_s18 = scalar_lea.vmem %s163_s16, 64  ;;  %p3220_p5 = scmp.lt.s32.totalorder %s163_s16, %s163_s16 }
  0x88   :  { %p3216_p4 = scmp.ne.s32.totalorder %s163_s16, %s3215_s18  ;;  %p3221_p6 = scmp.lt.s32.totalorder %s3215_s18, %s3215_s18 }
  0x8a   :  { %p3222_p7 = por %p3221_p6, %p3220_p5 }
  0x8c   :  { %p3223_p8 = pnand %p3222_p7, %p3216_p4 }
  0x8e   :  { %3226 = shalt.err (!%p3223_p8)
}
  0x8f   :  { %165 = dma.hbm_to_vmem [thread:$0]  %s3730_s12, 64, %s163_s16, [#allocation21]  }
  0x90   :  { %s3235_s5 = scalar_lea.vmem %s173_s0, 64  ;;  %p3240_p10 = scmp.lt.s32.totalorder %s173_s0, %s173_s0 }
  0x91   :  { %p3236_p9 = scmp.ne.s32.totalorder %s173_s0, %s3235_s5  ;;  %p3241_p11 = scmp.lt.s32.totalorder %s3235_s5, %s3235_s5 }
  0x93   :  { %p3242_p12 = por %p3241_p11, %p3240_p10 }
  0x95   :  { %p3243_p13 = pnand %p3242_p12, %p3236_p9 }
  0x97   :  { %3246 = shalt.err (!%p3243_p13)
}
  0x98   :  { %175 = dma.hbm_to_vmem [thread:$0]  %s3731_s13, 64, %s173_s0, [#allocation24]  }
  0x99   :  { %3267 = dma.done.wait [#allocation3], 512  }
  0x9a   :  { %3268 = vsyncadd [#allocation3], 4294966784 }
  0x9b   :  { %3269 = dma.done.wait [#allocation6], 384  }
  0x9c   :  { %3270 = vsyncadd [#allocation6], 4294966912 }
  0x9d   :  { %3271 = dma.done.wait [#allocation9], 65792  }
  0x9e   :  { %3272 = vsyncadd [#allocation9], 4294901504 }
  0x9f   :  { %3273 = dma.done.wait [#allocation12], 32896  }
  0xa0   :  { %3274 = vsyncadd [#allocation12], 4294934400 }
  0xa1   :  { %3275 = dma.done.wait [#allocation15], 32832  }
  0xa2   :  { %3276 = vsyncadd [#allocation15], 4294934464 }
  0xa3   :  { %3277 = dma.done.wait [#allocation18], 128  }
  0xa4   :  { %3278 = vsyncadd [#allocation18], 4294967168 }
  0xa5   :  { %3279 = dma.done.wait [#allocation21], 128  }
  0xa6   :  { %3280 = vsyncadd [#allocation21], 4294967168 }
  0xa7   :  { %3281 = dma.done.wait [#allocation24], 64  }
  0xa8   :  { %3282 = vsyncadd [#allocation24], 4294967232  ;;  %v469_v0 = vld [vmem:[#allocation10 + $0x3c8] sm:$0xff]  ;;  %v468_v2 = vld [vmem:[#allocation10 + $0x3c0] sm:$0xff]  ;;  %vm2618_vm0 = vcmask 1041408   ;;  %vm234_vm1 = vcmask 1043456  }
  0xa9   :  { %v725_v1 = vld [vmem:[#allocation10 + $0xbc8] sm:$0xff]  ;;  %924 = vmatprep.subr.mxu0 %v469_v0  ;;  %v724_v3 = vld [vmem:[#allocation10 + $0xbc0] sm:$0xff]  ;;  %s3307_s12 = smov [#allocation25]  }
  0xaa   :  { %995 = vmatprep.subr.mxu1 %v725_v1  ;;  %v461_v4 = vld [vmem:[#allocation10 + $0x388] sm:$0xff]  ;;  %925 = vmatpush1.msra.mxu0 %v468_v2  ;;  %v460_v6 = vld [vmem:[#allocation10 + $0x380] sm:$0xff]  ;;  %s2911_s13 = sshll.u32 %s3307_s12, 4  ;;  %s2912_s13 = int_to_ptr.vmem [resolvable:$true] %s2911_s13 }
  0xab   :  { %v717_v5 = vld [vmem:[#allocation10 + $0xb88] sm:$0xff]  ;;  %996 = vmatpush1.msra.mxu1 %v724_v3  ;;  %v716_v7 = vld [vmem:[#allocation10 + $0xb80] sm:$0xff]  ;;  %926 = vmatprep.subr.mxu0 %v461_v4  ;;  %s3247_s21 = scalar_lea.vmem %s2912_s13, 512  ;;  %p3252_p1 = scmp.lt.s32.totalorder %s2912_s13, %s2912_s13 }
  0xac   :  { %v453_v8 = vld [vmem:[#allocation10 + $0x348] sm:$0xff]  ;;  %997 = vmatprep.subr.mxu1 %v717_v5  ;;  %v452_v10 = vld [vmem:[#allocation10 + $0x340] sm:$0xff]  ;;  %927 = vmatpush1.msra.mxu0 %v460_v6  ;;  %p3248_p0 = scmp.ne.s32.totalorder %s2912_s13, %s3247_s21  ;;  %p3253_p2 = scmp.lt.s32.totalorder %s3247_s21, %s3247_s21 }
  0xad   :  { %v709_v9 = vld [vmem:[#allocation10 + $0xb48] sm:$0xff]  ;;  %v708_v11 = vld [vmem:[#allocation10 + $0xb40] sm:$0xff]  ;;  %998 = vmatpush1.msra.mxu1 %v716_v7  ;;  %928 = vmatprep.subr.mxu0 %v453_v8 }
  0xae   :  { %v445_v12 = vld [vmem:[#allocation10 + $0x308] sm:$0xff]  ;;  %999 = vmatprep.subr.mxu1 %v709_v9  ;;  %v444_v14 = vld [vmem:[#allocation10 + $0x300] sm:$0xff]  ;;  %929 = vmatpush1.msra.mxu0 %v452_v10  ;;  %p3254_p3 = por %p3253_p2, %p3252_p1 }
  0xaf   :  { %v701_v13 = vld [vmem:[#allocation10 + $0xb08] sm:$0xff]  ;;  %v700_v15 = vld [vmem:[#allocation10 + $0xb00] sm:$0xff]  ;;  %1000 = vmatpush1.msra.mxu1 %v708_v11  ;;  %930 = vmatprep.subr.mxu0 %v445_v12 }
  0xb0   :  { %v437_v16 = vld [vmem:[#allocation10 + $0x2c8] sm:$0xff]  ;;  %1001 = vmatprep.subr.mxu1 %v701_v13  ;;  %v436_v18 = vld [vmem:[#allocation10 + $0x2c0] sm:$0xff]  ;;  %931 = vmatpush1.msra.mxu0 %v444_v14  ;;  %p3255_p4 = pnand %p3254_p3, %p3248_p0 }
  0xb1   :  { %v693_v17 = vld [vmem:[#allocation10 + $0xac8] sm:$0xff]  ;;  %v692_v19 = vld [vmem:[#allocation10 + $0xac0] sm:$0xff]  ;;  %1002 = vmatpush1.msra.mxu1 %v700_v15  ;;  %932 = vmatprep.subr.mxu0 %v437_v16 }
  0xb2   :  { %v429_v20 = vld [vmem:[#allocation10 + $0x288] sm:$0xff]  ;;  %1003 = vmatprep.subr.mxu1 %v693_v17  ;;  %v428_v22 = vld [vmem:[#allocation10 + $0x280] sm:$0xff]  ;;  %933 = vmatpush1.msra.mxu0 %v436_v18 }
  0xb3   :  { %v685_v21 = vld [vmem:[#allocation10 + $0xa88] sm:$0xff]  ;;  %v684_v23 = vld [vmem:[#allocation10 + $0xa80] sm:$0xff]  ;;  %1004 = vmatpush1.msra.mxu1 %v692_v19  ;;  %934 = vmatprep.subr.mxu0 %v429_v20 }
  0xb4   :  { %v421_v24 = vld [vmem:[#allocation10 + $0x248] sm:$0xff]  ;;  %1005 = vmatprep.subr.mxu1 %v685_v21  ;;  %v420_v26 = vld [vmem:[#allocation10 + $0x240] sm:$0xff]  ;;  %935 = vmatpush1.msra.mxu0 %v428_v22 }
  0xb5   :  { %v677_v25 = vld [vmem:[#allocation10 + $0xa48] sm:$0xff]  ;;  %v676_v27 = vld [vmem:[#allocation10 + $0xa40] sm:$0xff]  ;;  %1006 = vmatpush1.msra.mxu1 %v684_v23  ;;  %936 = vmatprep.subr.mxu0 %v421_v24 }
  0xb6   :  { %v413_v28 = vld [vmem:[#allocation10 + $0x208] sm:$0xff]  ;;  %1007 = vmatprep.subr.mxu1 %v677_v25  ;;  %v412_v30 = vld [vmem:[#allocation10 + $0x200] sm:$0xff]  ;;  %937 = vmatpush1.msra.mxu0 %v420_v26 }
  0xb7   :  { %v669_v29 = vld [vmem:[#allocation10 + $0xa08] sm:$0xff]  ;;  %v668_v31 = vld [vmem:[#allocation10 + $0xa00] sm:$0xff]  ;;  %1008 = vmatpush1.msra.mxu1 %v676_v27  ;;  %938 = vmatprep.subr.mxu0 %v413_v28 }
  0xb8   :  { %v405_v32 = vld [vmem:[#allocation10 + $0x1c8] sm:$0xff]  ;;  %1009 = vmatprep.subr.mxu1 %v669_v29  ;;  %v404_v34 = vld [vmem:[#allocation10 + $0x1c0] sm:$0xff]  ;;  %939 = vmatpush1.msra.mxu0 %v412_v30  ;;  %v862_v30 = vlaneseq }
  0xb9   :  { %v661_v33 = vld [vmem:[#allocation10 + $0x9c8] sm:$0xff]  ;;  %v660_v35 = vld [vmem:[#allocation10 + $0x9c0] sm:$0xff]  ;;  %1010 = vmatpush1.msra.mxu1 %v668_v31  ;;  %940 = vmatprep.subr.mxu0 %v405_v32  ;;  %v3305_v31 = vmov 1983009808  }
  0xba   :  { %v397_v36 = vld [vmem:[#allocation10 + $0x188] sm:$0xff]  ;;  %1011 = vmatprep.subr.mxu1 %v661_v33  ;;  %v396_v38 = vld [vmem:[#allocation10 + $0x180] sm:$0xff]  ;;  %941 = vmatpush1.msra.mxu0 %v404_v34  ;;  %v905_v32 = vunpack.c.l.s4 %v3305_v31  ;;  %v694_v31 = vld [vmem:[#allocation10 + $0xad0] sm:$0xff] }
  0xbb   :  { %v653_v37 = vld [vmem:[#allocation10 + $0x988] sm:$0xff]  ;;  %v652_v39 = vld [vmem:[#allocation10 + $0x980] sm:$0xff]  ;;  %1012 = vmatpush1.msra.mxu1 %v660_v35  ;;  %942 = vmatprep.subr.mxu0 %v397_v36 }
  0xbc   :  { %v389_v40 = vld [vmem:[#allocation10 + $0x148] sm:$0xff]  ;;  %1013 = vmatprep.subr.mxu1 %v653_v37  ;;  %v388_v42 = vld [vmem:[#allocation10 + $0x140] sm:$0xff]  ;;  %943 = vmatpush1.msra.mxu0 %v396_v38 }
  0xbd   :  { %v645_v41 = vld [vmem:[#allocation10 + $0x948] sm:$0xff]  ;;  %v644_v43 = vld [vmem:[#allocation10 + $0x940] sm:$0xff]  ;;  %1014 = vmatpush1.msra.mxu1 %v652_v39  ;;  %944 = vmatprep.subr.mxu0 %v389_v40 }
  0xbe   :  { %v381_v44 = vld [vmem:[#allocation10 + $0x108] sm:$0xff]  ;;  %1015 = vmatprep.subr.mxu1 %v645_v41  ;;  %v380_v46 = vld [vmem:[#allocation10 + $0x100] sm:$0xff]  ;;  %945 = vmatpush1.msra.mxu0 %v388_v42  ;;  %v3428_v41 = vshrl.u32 %v862_v30, 7  ;;  %v906_v42 = vunpack.c.0.s8 %v905_v32  ;;  %v438_v30 = vld [vmem:[#allocation10 + $0x2d0] sm:$0xff] }
  0xbf   :  { %v637_v45 = vld [vmem:[#allocation10 + $0x908] sm:$0xff]  ;;  %v636_v47 = vld [vmem:[#allocation10 + $0x900] sm:$0xff]  ;;  %1016 = vmatpush1.msra.mxu1 %v644_v43  ;;  %946 = vmatprep.subr.mxu0 %v381_v44  ;;  %v431_v32 = vld [vmem:[#allocation10 + $0x298] sm:$0xff] }
  0xc0   :  { %v373_v48 = vld [vmem:[#allocation10 + $0xc8] sm:$0xff]  ;;  %1017 = vmatprep.subr.mxu1 %v637_v45  ;;  %v372_v50 = vld [vmem:[#allocation10 + $0xc0] sm:$0xff]  ;;  %947 = vmatpush1.msra.mxu0 %v380_v46 }
  0xc1   :  { %v629_v49 = vld [vmem:[#allocation10 + $0x8c8] sm:$0xff]  ;;  %v628_v51 = vld [vmem:[#allocation10 + $0x8c0] sm:$0xff]  ;;  %1018 = vmatpush1.msra.mxu1 %v636_v47  ;;  %948 = vmatprep.subr.mxu0 %v373_v48 }
  0xc2   :  { %v365_v52 = vld [vmem:[#allocation10 + $0x88] sm:$0xff]  ;;  %1019 = vmatprep.subr.mxu1 %v629_v49  ;;  %v364_v54 = vld [vmem:[#allocation10 + $0x80] sm:$0xff]  ;;  %949 = vmatpush1.msra.mxu0 %v372_v50  ;;  %v347_v49 = vld [vmem:[#allocation5] sm:$0xff] }
  0xc3   :  { %v621_v53 = vld [vmem:[#allocation10 + $0x888] sm:$0xff]  ;;  %v620_v55 = vld [vmem:[#allocation10 + $0x880] sm:$0xff]  ;;  %1020 = vmatpush1.msra.mxu1 %v628_v51  ;;  %950 = vmatprep.subr.mxu0 %v365_v52  ;;  %v909_v52 = vsub.s32 %v906_v42, %v3428_v41  ;;  %v671_v42 = vld [vmem:[#allocation10 + $0xa18] sm:$0xff] }
  0xc4   :  { %v357_v56 = vld [vmem:[#allocation10 + $0x48] sm:$0xff]  ;;  %1021 = vmatprep.subr.mxu1 %v621_v53  ;;  %v356_v58 = vld [vmem:[#allocation10 + $0x40] sm:$0xff]  ;;  %951 = vmatpush1.msra.mxu0 %v364_v54 }
  0xc5   :  { %v613_v57 = vld [vmem:[#allocation10 + $0x848] sm:$0xff]  ;;  %v612_v59 = vld [vmem:[#allocation10 + $0x840] sm:$0xff]  ;;  %1022 = vmatpush1.msra.mxu1 %v620_v55  ;;  %952 = vmatprep.subr.mxu0 %v357_v56 }
  0xc6   :  { %v349_v60 = vld [vmem:[#allocation10 + $0x8] sm:$0xff]  ;;  %1023 = vmatprep.subr.mxu1 %v613_v57  ;;  %v348_v62 = vld [vmem:[#allocation10] sm:$0xff]  ;;  %953 = vmatpush1.msra.mxu0 %v356_v58  ;;  %v903_v57 = vcombine.high %v347_v49, %v347_v49 }
  0xc7   :  { %v605_v61 = vld [vmem:[#allocation10 + $0x808] sm:$0xff]  ;;  %v604_v63 = vld [vmem:[#allocation10 + $0x800] sm:$0xff]  ;;  %1024 = vmatpush1.msra.mxu1 %v612_v59  ;;  %954 = vmatprep.subr.mxu0 %v349_v60 }
  0xc8   :  { %v597_v0 = vld [vmem:[#allocation10 + $0x7c8] sm:$0xff]  ;;  %1025 = vmatprep.subr.mxu1 %v605_v61  ;;  %v596_v2 = vld [vmem:[#allocation10 + $0x7c0] sm:$0xff]  ;;  %955 = vmatpush1.msra.mxu0 %v348_v62  ;;  %v3431_v62 = vrot.slane %v347_v49, %v909_v52  ;;  %v399_v49 = vld [vmem:[#allocation10 + $0x198] sm:$0xff] }
  0xc9   :  { %v853_v1 = vld [vmem:[#allocation10 + $0xfc8] sm:$0xff]  ;;  %v852_v3 = vld [vmem:[#allocation10 + $0xfc0] sm:$0xff]  ;;  %1026 = vmatpush1.msra.mxu1 %v604_v63  ;;  %956 = vmatprep.subr.mxu0 %v597_v0 }
  0xca   :  { %v589_v4 = vld [vmem:[#allocation10 + $0x788] sm:$0xff]  ;;  %1027 = vmatprep.subr.mxu1 %v853_v1  ;;  %v588_v6 = vld [vmem:[#allocation10 + $0x780] sm:$0xff]  ;;  %957 = vmatpush2.msra.mxu0 %v596_v2 }
  0xcb   :  { %v845_v5 = vld [vmem:[#allocation10 + $0xf88] sm:$0xff]  ;;  %v844_v7 = vld [vmem:[#allocation10 + $0xf80] sm:$0xff]  ;;  %1028 = vmatpush2.msra.mxu1 %v852_v3  ;;  %958 = vmatprep.subr.mxu0 %v589_v4  ;;  %v3433_v3 = vrot.slane %v903_v57, %v909_v52  ;;  %v654_v52 = vld [vmem:[#allocation10 + $0x990] sm:$0xff] }
  0xcc   :  { %v581_v8 = vld [vmem:[#allocation10 + $0x748] sm:$0xff]  ;;  %1029 = vmatprep.subr.mxu1 %v845_v5  ;;  %v580_v10 = vld [vmem:[#allocation10 + $0x740] sm:$0xff]  ;;  %959 = vmatpush2.msra.mxu0 %v588_v6  ;;  %v383_v57 = vld [vmem:[#allocation10 + $0x118] sm:$0xff] }
  0xcd   :  { %v837_v9 = vld [vmem:[#allocation10 + $0xf48] sm:$0xff]  ;;  %v836_v11 = vld [vmem:[#allocation10 + $0xf40] sm:$0xff]  ;;  %1030 = vmatpush2.msra.mxu1 %v844_v7  ;;  %960 = vmatprep.subr.mxu0 %v581_v8  ;;  %v3437_v8 = vcombine.high %v3431_v62, %v3431_v62 }
  0xce   :  { %v573_v12 = vld [vmem:[#allocation10 + $0x708] sm:$0xff]  ;;  %1031 = vmatprep.subr.mxu1 %v837_v9  ;;  %v572_v14 = vld [vmem:[#allocation10 + $0x700] sm:$0xff]  ;;  %961 = vmatpush2.msra.mxu0 %v580_v10 }
  0xcf   :  { %v829_v13 = vld [vmem:[#allocation10 + $0xf08] sm:$0xff]  ;;  %v828_v15 = vld [vmem:[#allocation10 + $0xf00] sm:$0xff]  ;;  %1032 = vmatpush2.msra.mxu1 %v836_v11  ;;  %962 = vmatprep.subr.mxu0 %v573_v12  ;;  %v3441_v11 = vcombine.high %v3433_v3, %v3433_v3  ;;  %v471_v12 = vld [vmem:[#allocation10 + $0x3d8] sm:$0xff] }
  0xd0   :  { %v565_v16 = vld [vmem:[#allocation10 + $0x6c8] sm:$0xff]  ;;  %1033 = vmatprep.subr.mxu1 %v829_v13  ;;  %v564_v18 = vld [vmem:[#allocation10 + $0x6c0] sm:$0xff]  ;;  %963 = vmatpush2.msra.mxu0 %v572_v14  ;;  %v727_v13 = vld [vmem:[#allocation10 + $0xbd8] sm:$0xff] }
  0xd1   :  { %v821_v17 = vld [vmem:[#allocation10 + $0xec8] sm:$0xff]  ;;  %v820_v19 = vld [vmem:[#allocation10 + $0xec0] sm:$0xff]  ;;  %1034 = vmatpush2.msra.mxu1 %v828_v15  ;;  %964 = vmatprep.subr.mxu0 %v565_v16  ;;  %v470_v14 = vld [vmem:[#allocation10 + $0x3d0] sm:$0xff] }
  0xd2   :  { %v557_v20 = vld [vmem:[#allocation10 + $0x688] sm:$0xff]  ;;  %1035 = vmatprep.subr.mxu1 %v821_v17  ;;  %v556_v22 = vld [vmem:[#allocation10 + $0x680] sm:$0xff]  ;;  %965 = vmatpush2.msra.mxu0 %v564_v18  ;;  %v726_v15 = vld [vmem:[#allocation10 + $0xbd0] sm:$0xff] }
  0xd3   :  { %v813_v21 = vld [vmem:[#allocation10 + $0xe88] sm:$0xff]  ;;  %v812_v23 = vld [vmem:[#allocation10 + $0xe80] sm:$0xff]  ;;  %1036 = vmatpush2.msra.mxu1 %v820_v19  ;;  %966 = vmatprep.subr.mxu0 %v557_v20  ;;  %v463_v16 = vld [vmem:[#allocation10 + $0x398] sm:$0xff] }
  0xd4   :  { %v549_v24 = vld [vmem:[#allocation10 + $0x648] sm:$0xff]  ;;  %1037 = vmatprep.subr.mxu1 %v813_v21  ;;  %v548_v26 = vld [vmem:[#allocation10 + $0x640] sm:$0xff]  ;;  %967 = vmatpush2.msra.mxu0 %v556_v22  ;;  %v719_v17 = vld [vmem:[#allocation10 + $0xb98] sm:$0xff] }
  0xd5   :  { %v805_v25 = vld [vmem:[#allocation10 + $0xe48] sm:$0xff]  ;;  %v804_v27 = vld [vmem:[#allocation10 + $0xe40] sm:$0xff]  ;;  %1038 = vmatpush2.msra.mxu1 %v812_v23  ;;  %968 = vmatprep.subr.mxu0 %v549_v24  ;;  %v462_v18 = vld [vmem:[#allocation10 + $0x390] sm:$0xff] }
  0xd6   :  { %v541_v28 = vld [vmem:[#allocation10 + $0x608] sm:$0xff]  ;;  %1039 = vmatprep.subr.mxu1 %v805_v25  ;;  %v540_v33 = vld [vmem:[#allocation10 + $0x600] sm:$0xff]  ;;  %969 = vmatpush2.msra.mxu0 %v548_v26  ;;  %v718_v19 = vld [vmem:[#allocation10 + $0xb90] sm:$0xff] }
  0xd7   :  { %v797_v29 = vld [vmem:[#allocation10 + $0xe08] sm:$0xff]  ;;  %v796_v34 = vld [vmem:[#allocation10 + $0xe00] sm:$0xff]  ;;  %1040 = vmatpush2.msra.mxu1 %v804_v27  ;;  %970 = vmatprep.subr.mxu0 %v541_v28  ;;  %v455_v20 = vld [vmem:[#allocation10 + $0x358] sm:$0xff] }
  0xd8   :  { %v533_v35 = vld [vmem:[#allocation10 + $0x5c8] sm:$0xff]  ;;  %1041 = vmatprep.subr.mxu1 %v797_v29  ;;  %v532_v37 = vld [vmem:[#allocation10 + $0x5c0] sm:$0xff]  ;;  %971 = vmatpush2.msra.mxu0 %v540_v33  ;;  %v711_v21 = vld [vmem:[#allocation10 + $0xb58] sm:$0xff] }
  0xd9   :  { %v789_v36 = vld [vmem:[#allocation10 + $0xdc8] sm:$0xff]  ;;  %v788_v38 = vld [vmem:[#allocation10 + $0xdc0] sm:$0xff]  ;;  %1042 = vmatpush2.msra.mxu1 %v796_v34  ;;  %972 = vmatprep.subr.mxu0 %v533_v35  ;;  %v454_v22 = vld [vmem:[#allocation10 + $0x350] sm:$0xff] }
  0xda   :  { %v525_v39 = vld [vmem:[#allocation10 + $0x588] sm:$0xff]  ;;  %1043 = vmatprep.subr.mxu1 %v789_v36  ;;  %v524_v43 = vld [vmem:[#allocation10 + $0x580] sm:$0xff]  ;;  %973 = vmatpush2.msra.mxu0 %v532_v37  ;;  %v710_v23 = vld [vmem:[#allocation10 + $0xb50] sm:$0xff] }
  0xdb   :  { %v781_v40 = vld [vmem:[#allocation10 + $0xd88] sm:$0xff]  ;;  %v780_v44 = vld [vmem:[#allocation10 + $0xd80] sm:$0xff]  ;;  %1044 = vmatpush2.msra.mxu1 %v788_v38  ;;  %974 = vmatprep.subr.mxu0 %v525_v39  ;;  %v447_v24 = vld [vmem:[#allocation10 + $0x318] sm:$0xff] }
  0xdc   :  { %v517_v45 = vld [vmem:[#allocation10 + $0x548] sm:$0xff]  ;;  %1045 = vmatprep.subr.mxu1 %v781_v40  ;;  %v516_v47 = vld [vmem:[#allocation10 + $0x540] sm:$0xff]  ;;  %975 = vmatpush2.msra.mxu0 %v524_v43  ;;  %v703_v25 = vld [vmem:[#allocation10 + $0xb18] sm:$0xff] }
  0xdd   :  { %v773_v46 = vld [vmem:[#allocation10 + $0xd48] sm:$0xff]  ;;  %v772_v48 = vld [vmem:[#allocation10 + $0xd40] sm:$0xff]  ;;  %1046 = vmatpush2.msra.mxu1 %v780_v44  ;;  %976 = vmatprep.subr.mxu0 %v517_v45  ;;  %v446_v26 = vld [vmem:[#allocation10 + $0x310] sm:$0xff] }
  0xde   :  { %v509_v50 = vld [vmem:[#allocation10 + $0x508] sm:$0xff]  ;;  %1047 = vmatprep.subr.mxu1 %v773_v46  ;;  %v508_v53 = vld [vmem:[#allocation10 + $0x500] sm:$0xff]  ;;  %977 = vmatpush2.msra.mxu0 %v516_v47  ;;  %v702_v27 = vld [vmem:[#allocation10 + $0xb10] sm:$0xff] }
  0xdf   :  { %v765_v51 = vld [vmem:[#allocation10 + $0xd08] sm:$0xff]  ;;  %v764_v54 = vld [vmem:[#allocation10 + $0xd00] sm:$0xff]  ;;  %1048 = vmatpush2.msra.mxu1 %v772_v48  ;;  %978 = vmatprep.subr.mxu0 %v509_v50  ;;  %v439_v28 = vld [vmem:[#allocation10 + $0x2d8] sm:$0xff] }
  0xe0   :  { %v501_v55 = vld [vmem:[#allocation10 + $0x4c8] sm:$0xff]  ;;  %1049 = vmatprep.subr.mxu1 %v765_v51  ;;  %v500_v58 = vld [vmem:[#allocation10 + $0x4c0] sm:$0xff]  ;;  %979 = vmatpush2.msra.mxu0 %v508_v53  ;;  %v695_v29 = vld [vmem:[#allocation10 + $0xad8] sm:$0xff] }
  0xe1   :  { %v757_v56 = vld [vmem:[#allocation10 + $0xcc8] sm:$0xff]  ;;  %v756_v59 = vld [vmem:[#allocation10 + $0xcc0] sm:$0xff]  ;;  %1050 = vmatpush2.msra.mxu1 %v764_v54  ;;  %980 = vmatprep.subr.mxu0 %v501_v55  ;;  %v687_v33 = vld [vmem:[#allocation10 + $0xa98] sm:$0xff] }
  0xe2   :  { %v493_v60 = vld [vmem:[#allocation10 + $0x488] sm:$0xff]  ;;  %1051 = vmatprep.subr.mxu1 %v757_v56  ;;  %v492_v63 = vld [vmem:[#allocation10 + $0x480] sm:$0xff]  ;;  %981 = vmatpush2.msra.mxu0 %v500_v58  ;;  %v430_v34 = vld [vmem:[#allocation10 + $0x290] sm:$0xff] }
  0xe3   :  { %v749_v61 = vld [vmem:[#allocation10 + $0xc88] sm:$0xff]  ;;  %v748_v0 = vld [vmem:[#allocation10 + $0xc80] sm:$0xff]  ;;  %1052 = vmatpush2.msra.mxu1 %v756_v59  ;;  %982 = vmatprep.subr.mxu0 %v493_v60  ;;  %v686_v35 = vld [vmem:[#allocation10 + $0xa90] sm:$0xff] }
  0xe4   :  { %v485_v1 = vld [vmem:[#allocation10 + $0x448] sm:$0xff]  ;;  %1053 = vmatprep.subr.mxu1 %v749_v61  ;;  %v484_v4 = vld [vmem:[#allocation10 + $0x440] sm:$0xff]  ;;  %983 = vmatpush2.msra.mxu0 %v492_v63  ;;  %v423_v36 = vld [vmem:[#allocation10 + $0x258] sm:$0xff] }
  0xe5   :  { %v741_v2 = vld [vmem:[#allocation10 + $0xc48] sm:$0xff]  ;;  %v740_v5 = vld [vmem:[#allocation10 + $0xc40] sm:$0xff]  ;;  %1054 = vmatpush2.msra.mxu1 %v748_v0  ;;  %984 = vmatprep.subr.mxu0 %v485_v1  ;;  %v679_v37 = vld [vmem:[#allocation10 + $0xa58] sm:$0xff] }
  0xe6   :  { %v477_v6 = vld [vmem:[#allocation10 + $0x408] sm:$0xff]  ;;  %1055 = vmatprep.subr.mxu1 %v741_v2  ;;  %v476_v9 = vld [vmem:[#allocation10 + $0x400] sm:$0xff]  ;;  %985 = vmatpush2.msra.mxu0 %v484_v4  ;;  %v422_v38 = vld [vmem:[#allocation10 + $0x250] sm:$0xff] }
  0xe7   :  { %v733_v7 = vld [vmem:[#allocation10 + $0xc08] sm:$0xff]  ;;  %1056 = vmatpush2.msra.mxu1 %v740_v5  ;;  %v732_v10 = vld [vmem:[#allocation10 + $0xc00] sm:$0xff]  ;;  %986 = vmatprep.subr.mxu0 %v477_v6  ;;  %v678_v39 = vld [vmem:[#allocation10 + $0xa50] sm:$0xff] }
  0xe8   :  { %1057 = vmatprep.subr.mxu1 %v733_v7  ;;  %987 = vmatpush2.msra.mxu0 %v476_v9  ;;  %v415_v40 = vld [vmem:[#allocation10 + $0x218] sm:$0xff]  ;;  %v414_v43 = vld [vmem:[#allocation10 + $0x210] sm:$0xff] }
  0xe9   :  { %988 = vmatprep.mubr.f32.mxu0 %v3437_v8  ;;  %1058 = vmatpush2.msra.mxu1 %v732_v10  ;;  %v670_v44 = vld [vmem:[#allocation10 + $0xa10] sm:$0xff]  ;;  %v407_v45 = vld [vmem:[#allocation10 + $0x1d8] sm:$0xff] }
  0xea   :  { %989 = vmatmul.mubr.f32.vlgmr.msra.gmra.mxu0 %v3431_v62  ;;  %1059 = vmatprep.mubr.f32.mxu1 %v3441_v11  ;;  %v663_v46 = vld [vmem:[#allocation10 + $0x9d8] sm:$0xff]  ;;  %v406_v47 = vld [vmem:[#allocation10 + $0x1d0] sm:$0xff] }
  0xeb   :  { %1066 = vmatprep.subr.mxu0 %v471_v12  ;;  %1137 = vmatprep.subr.mxu1 %v727_v13  ;;  %v662_v48 = vld [vmem:[#allocation10 + $0x9d0] sm:$0xff]  ;;  %v655_v50 = vld [vmem:[#allocation10 + $0x998] sm:$0xff] }
  0xec   :  { %1060 = vmatmul.mubr.f32.vlgmr.msra.gmra.mxu1 %v3433_v3  ;;  %1067 = vmatpush1.msra.mxu0 %v470_v14  ;;  %v398_v51 = vld [vmem:[#allocation10 + $0x190] sm:$0xff]  ;;  %v391_v53 = vld [vmem:[#allocation10 + $0x158] sm:$0xff] }
  0xed   :  { %1138 = vmatpush1.msra.mxu1 %v726_v15  ;;  %1068 = vmatprep.subr.mxu0 %v463_v16  ;;  %v647_v54 = vld [vmem:[#allocation10 + $0x958] sm:$0xff]  ;;  %v390_v55 = vld [vmem:[#allocation10 + $0x150] sm:$0xff] }
  0xee   :  { %1139 = vmatprep.subr.mxu1 %v719_v17  ;;  %1069 = vmatpush1.msra.mxu0 %v462_v18  ;;  %v646_v56 = vld [vmem:[#allocation10 + $0x950] sm:$0xff]  ;;  %v639_v58 = vld [vmem:[#allocation10 + $0x918] sm:$0xff] }
  0xef   :  { %1140 = vmatpush1.msra.mxu1 %v718_v19  ;;  %1070 = vmatprep.subr.mxu0 %v455_v20  ;;  %v382_v59 = vld [vmem:[#allocation10 + $0x110] sm:$0xff]  ;;  %v375_v61 = vld [vmem:[#allocation10 + $0xd8] sm:$0xff] }
  0xf0   :  { %1141 = vmatprep.subr.mxu1 %v711_v21  ;;  %1071 = vmatpush1.msra.mxu0 %v454_v22  ;;  %v638_v60 = vld [vmem:[#allocation10 + $0x910] sm:$0xff]  ;;  %v631_v63 = vld [vmem:[#allocation10 + $0x8d8] sm:$0xff] }
  0xf1   :  { %1142 = vmatpush1.msra.mxu1 %v710_v23  ;;  %1072 = vmatprep.subr.mxu0 %v447_v24  ;;  %v374_v0 = vld [vmem:[#allocation10 + $0xd0] sm:$0xff]  ;;  %v367_v2 = vld [vmem:[#allocation10 + $0x98] sm:$0xff] }
  0xf2   :  { %1143 = vmatprep.subr.mxu1 %v703_v25  ;;  %1073 = vmatpush1.msra.mxu0 %v446_v26  ;;  %v630_v1 = vld [vmem:[#allocation10 + $0x8d0] sm:$0xff]  ;;  %v623_v4 = vld [vmem:[#allocation10 + $0x898] sm:$0xff] }
  0xf3   :  { %1144 = vmatpush1.msra.mxu1 %v702_v27  ;;  %1074 = vmatprep.subr.mxu0 %v439_v28  ;;  %v366_v5 = vld [vmem:[#allocation10 + $0x90] sm:$0xff]  ;;  %v359_v7 = vld [vmem:[#allocation10 + $0x58] sm:$0xff] }
  0xf4   :  { %1145 = vmatprep.subr.mxu1 %v695_v29  ;;  %1075 = vmatpush1.msra.mxu0 %v438_v30  ;;  %v622_v6 = vld [vmem:[#allocation10 + $0x890] sm:$0xff]  ;;  %v615_v9 = vld [vmem:[#allocation10 + $0x858] sm:$0xff] }
  0xf5   :  { %1146 = vmatpush1.msra.mxu1 %v694_v31  ;;  %1076 = vmatprep.subr.mxu0 %v431_v32  ;;  %v358_v10 = vld [vmem:[#allocation10 + $0x50] sm:$0xff]  ;;  %v351_v13 = vld [vmem:[#allocation10 + $0x18] sm:$0xff] }
  0xf6   :  { %1147 = vmatprep.subr.mxu1 %v687_v33  ;;  %1077 = vmatpush1.msra.mxu0 %v430_v34  ;;  %v614_v12 = vld [vmem:[#allocation10 + $0x850] sm:$0xff]  ;;  %v607_v14 = vld [vmem:[#allocation10 + $0x818] sm:$0xff] }
  0xf7   :  { %1148 = vmatpush1.msra.mxu1 %v686_v35  ;;  %1078 = vmatprep.subr.mxu0 %v423_v36  ;;  %v350_v15 = vld [vmem:[#allocation10 + $0x10] sm:$0xff]  ;;  %v599_v17 = vld [vmem:[#allocation10 + $0x7d8] sm:$0xff] }
  0xf8   :  { %1149 = vmatprep.subr.mxu1 %v679_v37  ;;  %1079 = vmatpush1.msra.mxu0 %v422_v38  ;;  %v606_v16 = vld [vmem:[#allocation10 + $0x810] sm:$0xff]  ;;  %v855_v18 = vld [vmem:[#allocation10 + $0xfd8] sm:$0xff] }
  0xf9   :  { %1150 = vmatpush1.msra.mxu1 %v678_v39  ;;  %1080 = vmatprep.subr.mxu0 %v415_v40  ;;  %v598_v19 = vld [vmem:[#allocation10 + $0x7d0] sm:$0xff]  ;;  %v591_v21 = vld [vmem:[#allocation10 + $0x798] sm:$0xff] }
  0xfa   :  { %1151 = vmatprep.subr.mxu1 %v671_v42  ;;  %1081 = vmatpush1.msra.mxu0 %v414_v43  ;;  %v854_v20 = vld [vmem:[#allocation10 + $0xfd0] sm:$0xff]  ;;  %v847_v22 = vld [vmem:[#allocation10 + $0xf98] sm:$0xff] }
  0xfb   :  { %1152 = vmatpush1.msra.mxu1 %v670_v44  ;;  %1082 = vmatprep.subr.mxu0 %v407_v45  ;;  %v590_v23 = vld [vmem:[#allocation10 + $0x790] sm:$0xff]  ;;  %v583_v25 = vld [vmem:[#allocation10 + $0x758] sm:$0xff] }
  0xfc   :  { %1153 = vmatprep.subr.mxu1 %v663_v46  ;;  %1083 = vmatpush1.msra.mxu0 %v406_v47  ;;  %v846_v24 = vld [vmem:[#allocation10 + $0xf90] sm:$0xff]  ;;  %v839_v26 = vld [vmem:[#allocation10 + $0xf58] sm:$0xff] }
  0xfd   :  { %1154 = vmatpush1.msra.mxu1 %v662_v48  ;;  %1084 = vmatprep.subr.mxu0 %v399_v49  ;;  %v582_v27 = vld [vmem:[#allocation10 + $0x750] sm:$0xff]  ;;  %v575_v29 = vld [vmem:[#allocation10 + $0x718] sm:$0xff] }
  0xfe   :  { %1155 = vmatprep.subr.mxu1 %v655_v50  ;;  %1085 = vmatpush1.msra.mxu0 %v398_v51  ;;  %v838_v28 = vld [vmem:[#allocation10 + $0xf50] sm:$0xff]  ;;  %v831_v30 = vld [vmem:[#allocation10 + $0xf18] sm:$0xff] }
  0xff   :  { %1156 = vmatpush1.msra.mxu1 %v654_v52  ;;  %1086 = vmatprep.subr.mxu0 %v391_v53  ;;  %v574_v31 = vld [vmem:[#allocation10 + $0x710] sm:$0xff]  ;;  %v567_v33 = vld [vmem:[#allocation10 + $0x6d8] sm:$0xff] }
 0x100   :  { %1157 = vmatprep.subr.mxu1 %v647_v54  ;;  %1087 = vmatpush1.msra.mxu0 %v390_v55  ;;  %v830_v32 = vld [vmem:[#allocation10 + $0xf10] sm:$0xff]  ;;  %v823_v34 = vld [vmem:[#allocation10 + $0xed8] sm:$0xff] }
 0x101   :  { %1158 = vmatpush1.msra.mxu1 %v646_v56  ;;  %1088 = vmatprep.subr.mxu0 %v383_v57  ;;  %v566_v35 = vld [vmem:[#allocation10 + $0x6d0] sm:$0xff]  ;;  %v559_v37 = vld [vmem:[#allocation10 + $0x698] sm:$0xff] }
 0x102   :  { %1159 = vmatprep.subr.mxu1 %v639_v58  ;;  %1089 = vmatpush1.msra.mxu0 %v382_v59  ;;  %v822_v36 = vld [vmem:[#allocation10 + $0xed0] sm:$0xff]  ;;  %v815_v38 = vld [vmem:[#allocation10 + $0xe98] sm:$0xff] }
 0x103   :  { %1160 = vmatpush1.msra.mxu1 %v638_v60  ;;  %1090 = vmatprep.subr.mxu0 %v375_v61  ;;  %v558_v39 = vld [vmem:[#allocation10 + $0x690] sm:$0xff]  ;;  %v551_v42 = vld [vmem:[#allocation10 + $0x658] sm:$0xff] }
 0x104   :  { %1161 = vmatprep.subr.mxu1 %v631_v63  ;;  %1091 = vmatpush1.msra.mxu0 %v374_v0  ;;  %v814_v40 = vld [vmem:[#allocation10 + $0xe90] sm:$0xff]  ;;  %v807_v43 = vld [vmem:[#allocation10 + $0xe58] sm:$0xff] }
 0x105   :  { %1162 = vmatpush1.msra.mxu1 %v630_v1  ;;  %1092 = vmatprep.subr.mxu0 %v367_v2  ;;  %v550_v44 = vld [vmem:[#allocation10 + $0x650] sm:$0xff]  ;;  %v543_v46 = vld [vmem:[#allocation10 + $0x618] sm:$0xff] }
 0x106   :  { %1163 = vmatprep.subr.mxu1 %v623_v4  ;;  %1093 = vmatpush1.msra.mxu0 %v366_v5  ;;  %v806_v45 = vld [vmem:[#allocation10 + $0xe50] sm:$0xff]  ;;  %v799_v47 = vld [vmem:[#allocation10 + $0xe18] sm:$0xff] }
 0x107   :  { %1164 = vmatpush1.msra.mxu1 %v622_v6  ;;  %1094 = vmatprep.subr.mxu0 %v359_v7  ;;  %v542_v48 = vld [vmem:[#allocation10 + $0x610] sm:$0xff]  ;;  %v535_v50 = vld [vmem:[#allocation10 + $0x5d8] sm:$0xff] }
 0x108   :  { %1165 = vmatprep.subr.mxu1 %v615_v9  ;;  %1095 = vmatpush1.msra.mxu0 %v358_v10  ;;  %v798_v49 = vld [vmem:[#allocation10 + $0xe10] sm:$0xff]  ;;  %v791_v51 = vld [vmem:[#allocation10 + $0xdd8] sm:$0xff] }
 0x109   :  { %1166 = vmatpush1.msra.mxu1 %v614_v12  ;;  %1096 = vmatprep.subr.mxu0 %v351_v13  ;;  %v534_v52 = vld [vmem:[#allocation10 + $0x5d0] sm:$0xff]  ;;  %v527_v54 = vld [vmem:[#allocation10 + $0x598] sm:$0xff] }
 0x10a   :  { %1167 = vmatprep.subr.mxu1 %v607_v14  ;;  %1097 = vmatpush1.msra.mxu0 %v350_v15  ;;  %v790_v53 = vld [vmem:[#allocation10 + $0xdd0] sm:$0xff]  ;;  %v783_v55 = vld [vmem:[#allocation10 + $0xd98] sm:$0xff] }
 0x10b   :  { %1168 = vmatpush1.msra.mxu1 %v606_v16  ;;  %1098 = vmatprep.subr.mxu0 %v599_v17  ;;  %v526_v56 = vld [vmem:[#allocation10 + $0x590] sm:$0xff]  ;;  %v519_v58 = vld [vmem:[#allocation10 + $0x558] sm:$0xff] }
 0x10c   :  { %1169 = vmatprep.subr.mxu1 %v855_v18  ;;  %1099 = vmatpush2.msra.mxu0 %v598_v19  ;;  %v782_v57 = vld [vmem:[#allocation10 + $0xd90] sm:$0xff]  ;;  %v775_v59 = vld [vmem:[#allocation10 + $0xd58] sm:$0xff] }
 0x10d   :  { %1170 = vmatpush2.msra.mxu1 %v854_v20  ;;  %1100 = vmatprep.subr.mxu0 %v591_v21  ;;  %v518_v60 = vld [vmem:[#allocation10 + $0x550] sm:$0xff]  ;;  %v511_v63 = vld [vmem:[#allocation10 + $0x518] sm:$0xff] }
 0x10e   :  { %1171 = vmatprep.subr.mxu1 %v847_v22  ;;  %1101 = vmatpush2.msra.mxu0 %v590_v23  ;;  %v774_v61 = vld [vmem:[#allocation10 + $0xd50] sm:$0xff]  ;;  %v767_v0 = vld [vmem:[#allocation10 + $0xd18] sm:$0xff]  ;;  %v473_v22 = vld [vmem:[#allocation10 + $0x3e8] sm:$0xff] }
 0x10f   :  { %1172 = vmatpush2.msra.mxu1 %v846_v24  ;;  %1102 = vmatprep.subr.mxu0 %v583_v25  ;;  %v510_v1 = vld [vmem:[#allocation10 + $0x510] sm:$0xff]  ;;  %v503_v4 = vld [vmem:[#allocation10 + $0x4d8] sm:$0xff]  ;;  %v729_v23 = vld [vmem:[#allocation10 + $0xbe8] sm:$0xff] }
 0x110   :  { %1173 = vmatprep.subr.mxu1 %v839_v26  ;;  %1103 = vmatpush2.msra.mxu0 %v582_v27  ;;  %v766_v2 = vld [vmem:[#allocation10 + $0xd10] sm:$0xff]  ;;  %v759_v5 = vld [vmem:[#allocation10 + $0xcd8] sm:$0xff]  ;;  %v472_v24 = vld [vmem:[#allocation10 + $0x3e0] sm:$0xff] }
 0x111   :  { %1174 = vmatpush2.msra.mxu1 %v838_v28  ;;  %1104 = vmatprep.subr.mxu0 %v575_v29  ;;  %v502_v6 = vld [vmem:[#allocation10 + $0x4d0] sm:$0xff]  ;;  %v495_v9 = vld [vmem:[#allocation10 + $0x498] sm:$0xff]  ;;  %v728_v25 = vld [vmem:[#allocation10 + $0xbe0] sm:$0xff] }
 0x112   :  { %1175 = vmatprep.subr.mxu1 %v831_v30  ;;  %1105 = vmatpush2.msra.mxu0 %v574_v31  ;;  %v758_v7 = vld [vmem:[#allocation10 + $0xcd0] sm:$0xff]  ;;  %v751_v10 = vld [vmem:[#allocation10 + $0xc98] sm:$0xff]  ;;  %v465_v26 = vld [vmem:[#allocation10 + $0x3a8] sm:$0xff] }
 0x113   :  { %1176 = vmatpush2.msra.mxu1 %v830_v32  ;;  %1106 = vmatprep.subr.mxu0 %v567_v33  ;;  %v494_v12 = vld [vmem:[#allocation10 + $0x490] sm:$0xff]  ;;  %v487_v14 = vld [vmem:[#allocation10 + $0x458] sm:$0xff]  ;;  %v721_v27 = vld [vmem:[#allocation10 + $0xba8] sm:$0xff] }
 0x114   :  { %1177 = vmatprep.subr.mxu1 %v823_v34  ;;  %1107 = vmatpush2.msra.mxu0 %v566_v35  ;;  %v750_v13 = vld [vmem:[#allocation10 + $0xc90] sm:$0xff]  ;;  %v743_v15 = vld [vmem:[#allocation10 + $0xc58] sm:$0xff]  ;;  %v464_v28 = vld [vmem:[#allocation10 + $0x3a0] sm:$0xff] }
 0x115   :  { %1178 = vmatpush2.msra.mxu1 %v822_v36  ;;  %1108 = vmatprep.subr.mxu0 %v559_v37  ;;  %v486_v16 = vld [vmem:[#allocation10 + $0x450] sm:$0xff]  ;;  %v479_v18 = vld [vmem:[#allocation10 + $0x418] sm:$0xff]  ;;  %v720_v29 = vld [vmem:[#allocation10 + $0xba0] sm:$0xff] }
 0x116   :  { %1179 = vmatprep.subr.mxu1 %v815_v38  ;;  %1109 = vmatpush2.msra.mxu0 %v558_v39  ;;  %v742_v17 = vld [vmem:[#allocation10 + $0xc50] sm:$0xff]  ;;  %v735_v19 = vld [vmem:[#allocation10 + $0xc18] sm:$0xff]  ;;  %v457_v30 = vld [vmem:[#allocation10 + $0x368] sm:$0xff] }
 0x117   :  { %1180 = vmatpush2.msra.mxu1 %v814_v40  ;;  %1110 = vmatprep.subr.mxu0 %v551_v42  ;;  %v478_v20 = vld [vmem:[#allocation10 + $0x410] sm:$0xff]  ;;  %v713_v31 = vld [vmem:[#allocation10 + $0xb68] sm:$0xff]  ;;  %v456_v32 = vld [vmem:[#allocation10 + $0x360] sm:$0xff] }
 0x118   :  { %1181 = vmatprep.subr.mxu1 %v807_v43  ;;  %1111 = vmatpush2.msra.mxu0 %v550_v44  ;;  %v734_v21 = vld [vmem:[#allocation10 + $0xc10] sm:$0xff]  ;;  %v712_v33 = vld [vmem:[#allocation10 + $0xb60] sm:$0xff]  ;;  %v449_v34 = vld [vmem:[#allocation10 + $0x328] sm:$0xff] }
 0x119   :  { %1182 = vmatpush2.msra.mxu1 %v806_v45  ;;  %1112 = vmatprep.subr.mxu0 %v543_v46  ;;  %v705_v35 = vld [vmem:[#allocation10 + $0xb28] sm:$0xff]  ;;  %v448_v36 = vld [vmem:[#allocation10 + $0x320] sm:$0xff] }
 0x11a   :  { %1183 = vmatprep.subr.mxu1 %v799_v47  ;;  %1113 = vmatpush2.msra.mxu0 %v542_v48  ;;  %v704_v37 = vld [vmem:[#allocation10 + $0xb20] sm:$0xff]  ;;  %v441_v38 = vld [vmem:[#allocation10 + $0x2e8] sm:$0xff] }
 0x11b   :  { %1184 = vmatpush2.msra.mxu1 %v798_v49  ;;  %1114 = vmatprep.subr.mxu0 %v535_v50  ;;  %v697_v39 = vld [vmem:[#allocation10 + $0xae8] sm:$0xff]  ;;  %v440_v40 = vld [vmem:[#allocation10 + $0x2e0] sm:$0xff] }
 0x11c   :  { %1185 = vmatprep.subr.mxu1 %v791_v51  ;;  %1115 = vmatpush2.msra.mxu0 %v534_v52  ;;  %v696_v42 = vld [vmem:[#allocation10 + $0xae0] sm:$0xff]  ;;  %v433_v43 = vld [vmem:[#allocation10 + $0x2a8] sm:$0xff] }
 0x11d   :  { %1186 = vmatpush2.msra.mxu1 %v790_v53  ;;  %1116 = vmatprep.subr.mxu0 %v527_v54  ;;  %v689_v44 = vld [vmem:[#allocation10 + $0xaa8] sm:$0xff]  ;;  %v432_v45 = vld [vmem:[#allocation10 + $0x2a0] sm:$0xff] }
 0x11e   :  { %1187 = vmatprep.subr.mxu1 %v783_v55  ;;  %1117 = vmatpush2.msra.mxu0 %v526_v56  ;;  %v688_v46 = vld [vmem:[#allocation10 + $0xaa0] sm:$0xff]  ;;  %v425_v47 = vld [vmem:[#allocation10 + $0x268] sm:$0xff] }
 0x11f   :  { %1188 = vmatpush2.msra.mxu1 %v782_v57  ;;  %1118 = vmatprep.subr.mxu0 %v519_v58  ;;  %v681_v48 = vld [vmem:[#allocation10 + $0xa68] sm:$0xff]  ;;  %v424_v49 = vld [vmem:[#allocation10 + $0x260] sm:$0xff] }
 0x120   :  { %1189 = vmatprep.subr.mxu1 %v775_v59  ;;  %1119 = vmatpush2.msra.mxu0 %v518_v60  ;;  %v680_v50 = vld [vmem:[#allocation10 + $0xa60] sm:$0xff]  ;;  %v417_v51 = vld [vmem:[#allocation10 + $0x228] sm:$0xff] }
 0x121   :  { %1190 = vmatpush2.msra.mxu1 %v774_v61  ;;  %1120 = vmatprep.subr.mxu0 %v511_v63  ;;  %v673_v52 = vld [vmem:[#allocation10 + $0xa28] sm:$0xff]  ;;  %v416_v53 = vld [vmem:[#allocation10 + $0x220] sm:$0xff] }
 0x122   :  { %1191 = vmatprep.subr.mxu1 %v767_v0  ;;  %1121 = vmatpush2.msra.mxu0 %v510_v1  ;;  %v672_v54 = vld [vmem:[#allocation10 + $0xa20] sm:$0xff]  ;;  %v409_v55 = vld [vmem:[#allocation10 + $0x1e8] sm:$0xff] }
 0x123   :  { %1192 = vmatpush2.msra.mxu1 %v766_v2  ;;  %1122 = vmatprep.subr.mxu0 %v503_v4  ;;  %v665_v56 = vld [vmem:[#allocation10 + $0x9e8] sm:$0xff]  ;;  %v408_v57 = vld [vmem:[#allocation10 + $0x1e0] sm:$0xff] }
 0x124   :  { %1193 = vmatprep.subr.mxu1 %v759_v5  ;;  %1123 = vmatpush2.msra.mxu0 %v502_v6  ;;  %v664_v58 = vld [vmem:[#allocation10 + $0x9e0] sm:$0xff]  ;;  %v401_v59 = vld [vmem:[#allocation10 + $0x1a8] sm:$0xff] }
 0x125   :  { %1194 = vmatpush2.msra.mxu1 %v758_v7  ;;  %1124 = vmatprep.subr.mxu0 %v495_v9  ;;  %v657_v60 = vld [vmem:[#allocation10 + $0x9a8] sm:$0xff]  ;;  %v400_v61 = vld [vmem:[#allocation10 + $0x1a0] sm:$0xff] }
 0x126   :  { %1195 = vmatprep.subr.mxu1 %v751_v10  ;;  %1125 = vmatpush2.msra.mxu0 %v494_v12  ;;  %v656_v63 = vld [vmem:[#allocation10 + $0x9a0] sm:$0xff]  ;;  %v393_v0 = vld [vmem:[#allocation10 + $0x168] sm:$0xff] }
 0x127   :  { %1196 = vmatpush2.msra.mxu1 %v750_v13  ;;  %1126 = vmatprep.subr.mxu0 %v487_v14  ;;  %v649_v1 = vld [vmem:[#allocation10 + $0x968] sm:$0xff]  ;;  %v392_v2 = vld [vmem:[#allocation10 + $0x160] sm:$0xff] }
 0x128   :  { %1197 = vmatprep.subr.mxu1 %v743_v15  ;;  %1127 = vmatpush2.msra.mxu0 %v486_v16  ;;  %v648_v4 = vld [vmem:[#allocation10 + $0x960] sm:$0xff]  ;;  %v385_v5 = vld [vmem:[#allocation10 + $0x128] sm:$0xff] }
 0x129   :  { %1198 = vmatpush2.msra.mxu1 %v742_v17  ;;  %1128 = vmatprep.subr.mxu0 %v479_v18  ;;  %v641_v6 = vld [vmem:[#allocation10 + $0x928] sm:$0xff]  ;;  %v384_v7 = vld [vmem:[#allocation10 + $0x120] sm:$0xff] }
 0x12a   :  { %1199 = vmatprep.subr.mxu1 %v735_v19  ;;  %1129 = vmatpush2.msra.mxu0 %v478_v20  ;;  %v640_v9 = vld [vmem:[#allocation10 + $0x920] sm:$0xff]  ;;  %v377_v10 = vld [vmem:[#allocation10 + $0xe8] sm:$0xff] }
 0x12b   :  { %1130 = vmatprep.mubr.f32.mxu0 %v3437_v8  ;;  %1200 = vmatpush2.msra.mxu1 %v734_v21  ;;  %v633_v12 = vld [vmem:[#allocation10 + $0x8e8] sm:$0xff]  ;;  %v376_v13 = vld [vmem:[#allocation10 + $0xe0] sm:$0xff] }
 0x12c   :  { %1201 = vmatprep.mubr.f32.mxu1 %v3441_v11  ;;  %1131 = vmatmul.mubr.f32.vlgmr.msra.gmra.mxu0 %v3431_v62  ;;  %v632_v14 = vld [vmem:[#allocation10 + $0x8e0] sm:$0xff]  ;;  %v369_v15 = vld [vmem:[#allocation10 + $0xa8] sm:$0xff] }
 0x12d   :  { %1202 = vmatmul.mubr.f32.vlgmr.msra.gmra.mxu1 %v3433_v3  ;;  %1208 = vmatprep.subr.mxu0 %v473_v22  ;;  %v625_v16 = vld [vmem:[#allocation10 + $0x8a8] sm:$0xff]  ;;  %v368_v17 = vld [vmem:[#allocation10 + $0xa0] sm:$0xff] }
 0x12e   :  { %1279 = vmatprep.subr.mxu1 %v729_v23  ;;  %1209 = vmatpush1.msra.mxu0 %v472_v24  ;;  %v624_v18 = vld [vmem:[#allocation10 + $0x8a0] sm:$0xff]  ;;  %v361_v19 = vld [vmem:[#allocation10 + $0x68] sm:$0xff] }
 0x12f   :  { %1280 = vmatpush1.msra.mxu1 %v728_v25  ;;  %1210 = vmatprep.subr.mxu0 %v465_v26  ;;  %v617_v20 = vld [vmem:[#allocation10 + $0x868] sm:$0xff]  ;;  %v360_v21 = vld [vmem:[#allocation10 + $0x60] sm:$0xff] }
 0x130   :  { %1281 = vmatprep.subr.mxu1 %v721_v27  ;;  %1211 = vmatpush1.msra.mxu0 %v464_v28  ;;  %v616_v22 = vld [vmem:[#allocation10 + $0x860] sm:$0xff]  ;;  %v353_v23 = vld [vmem:[#allocation10 + $0x28] sm:$0xff] }
 0x131   :  { %1282 = vmatpush1.msra.mxu1 %v720_v29  ;;  %1212 = vmatprep.subr.mxu0 %v457_v30  ;;  %v609_v24 = vld [vmem:[#allocation10 + $0x828] sm:$0xff]  ;;  %v352_v25 = vld [vmem:[#allocation10 + $0x20] sm:$0xff] }
 0x132   :  { %1283 = vmatprep.subr.mxu1 %v713_v31  ;;  %1213 = vmatpush1.msra.mxu0 %v456_v32  ;;  %v608_v26 = vld [vmem:[#allocation10 + $0x820] sm:$0xff]  ;;  %v601_v27 = vld [vmem:[#allocation10 + $0x7e8] sm:$0xff] }
 0x133   :  { %1284 = vmatpush1.msra.mxu1 %v712_v33  ;;  %1214 = vmatprep.subr.mxu0 %v449_v34  ;;  %v857_v28 = vld [vmem:[#allocation10 + $0xfe8] sm:$0xff]  ;;  %v600_v29 = vld [vmem:[#allocation10 + $0x7e0] sm:$0xff] }
 0x134   :  { %1285 = vmatprep.subr.mxu1 %v705_v35  ;;  %1215 = vmatpush1.msra.mxu0 %v448_v36  ;;  %v856_v30 = vld [vmem:[#allocation10 + $0xfe0] sm:$0xff]  ;;  %v593_v31 = vld [vmem:[#allocation10 + $0x7a8] sm:$0xff] }
 0x135   :  { %1286 = vmatpush1.msra.mxu1 %v704_v37  ;;  %1216 = vmatprep.subr.mxu0 %v441_v38  ;;  %v849_v32 = vld [vmem:[#allocation10 + $0xfa8] sm:$0xff]  ;;  %v592_v33 = vld [vmem:[#allocation10 + $0x7a0] sm:$0xff] }
 0x136   :  { %1287 = vmatprep.subr.mxu1 %v697_v39  ;;  %1217 = vmatpush1.msra.mxu0 %v440_v40  ;;  %v848_v34 = vld [vmem:[#allocation10 + $0xfa0] sm:$0xff]  ;;  %v585_v35 = vld [vmem:[#allocation10 + $0x768] sm:$0xff] }
 0x137   :  { %1288 = vmatpush1.msra.mxu1 %v696_v42  ;;  %1218 = vmatprep.subr.mxu0 %v433_v43  ;;  %v841_v36 = vld [vmem:[#allocation10 + $0xf68] sm:$0xff]  ;;  %v584_v37 = vld [vmem:[#allocation10 + $0x760] sm:$0xff] }
 0x138   :  { %1289 = vmatprep.subr.mxu1 %v689_v44  ;;  %1219 = vmatpush1.msra.mxu0 %v432_v45  ;;  %v840_v38 = vld [vmem:[#allocation10 + $0xf60] sm:$0xff]  ;;  %v577_v39 = vld [vmem:[#allocation10 + $0x728] sm:$0xff] }
 0x139   :  { %1290 = vmatpush1.msra.mxu1 %v688_v46  ;;  %1220 = vmatprep.subr.mxu0 %v425_v47  ;;  %v833_v40 = vld [vmem:[#allocation10 + $0xf28] sm:$0xff]  ;;  %v576_v42 = vld [vmem:[#allocation10 + $0x720] sm:$0xff] }
 0x13a   :  { %1291 = vmatprep.subr.mxu1 %v681_v48  ;;  %1221 = vmatpush1.msra.mxu0 %v424_v49  ;;  %v832_v43 = vld [vmem:[#allocation10 + $0xf20] sm:$0xff]  ;;  %v569_v44 = vld [vmem:[#allocation10 + $0x6e8] sm:$0xff] }
 0x13b   :  { %1292 = vmatpush1.msra.mxu1 %v680_v50  ;;  %1222 = vmatprep.subr.mxu0 %v417_v51  ;;  %v825_v45 = vld [vmem:[#allocation10 + $0xee8] sm:$0xff]  ;;  %v568_v46 = vld [vmem:[#allocation10 + $0x6e0] sm:$0xff] }
 0x13c   :  { %1293 = vmatprep.subr.mxu1 %v673_v52  ;;  %1223 = vmatpush1.msra.mxu0 %v416_v53  ;;  %v824_v47 = vld [vmem:[#allocation10 + $0xee0] sm:$0xff]  ;;  %v561_v48 = vld [vmem:[#allocation10 + $0x6a8] sm:$0xff] }
 0x13d   :  { %1294 = vmatpush1.msra.mxu1 %v672_v54  ;;  %1224 = vmatprep.subr.mxu0 %v409_v55  ;;  %v817_v49 = vld [vmem:[#allocation10 + $0xea8] sm:$0xff]  ;;  %v560_v50 = vld [vmem:[#allocation10 + $0x6a0] sm:$0xff] }
 0x13e   :  { %1295 = vmatprep.subr.mxu1 %v665_v56  ;;  %1225 = vmatpush1.msra.mxu0 %v408_v57  ;;  %v816_v51 = vld [vmem:[#allocation10 + $0xea0] sm:$0xff]  ;;  %v553_v52 = vld [vmem:[#allocation10 + $0x668] sm:$0xff] }
 0x13f   :  { %1296 = vmatpush1.msra.mxu1 %v664_v58  ;;  %1226 = vmatprep.subr.mxu0 %v401_v59  ;;  %v809_v53 = vld [vmem:[#allocation10 + $0xe68] sm:$0xff]  ;;  %v552_v54 = vld [vmem:[#allocation10 + $0x660] sm:$0xff] }
 0x140   :  { %1297 = vmatprep.subr.mxu1 %v657_v60  ;;  %1227 = vmatpush1.msra.mxu0 %v400_v61  ;;  %v808_v55 = vld [vmem:[#allocation10 + $0xe60] sm:$0xff]  ;;  %v545_v56 = vld [vmem:[#allocation10 + $0x628] sm:$0xff] }
 0x141   :  { %1298 = vmatpush1.msra.mxu1 %v656_v63  ;;  %1228 = vmatprep.subr.mxu0 %v393_v0  ;;  %v801_v57 = vld [vmem:[#allocation10 + $0xe28] sm:$0xff]  ;;  %v544_v58 = vld [vmem:[#allocation10 + $0x620] sm:$0xff] }
 0x142   :  { %1299 = vmatprep.subr.mxu1 %v649_v1  ;;  %1229 = vmatpush1.msra.mxu0 %v392_v2  ;;  %v800_v59 = vld [vmem:[#allocation10 + $0xe20] sm:$0xff]  ;;  %v537_v60 = vld [vmem:[#allocation10 + $0x5e8] sm:$0xff] }
 0x143   :  { %1300 = vmatpush1.msra.mxu1 %v648_v4  ;;  %1230 = vmatprep.subr.mxu0 %v385_v5  ;;  %v793_v61 = vld [vmem:[#allocation10 + $0xde8] sm:$0xff]  ;;  %v536_v63 = vld [vmem:[#allocation10 + $0x5e0] sm:$0xff] }
 0x144   :  { %1301 = vmatprep.subr.mxu1 %v641_v6  ;;  %1231 = vmatpush1.msra.mxu0 %v384_v7  ;;  %v792_v0 = vld [vmem:[#allocation10 + $0xde0] sm:$0xff]  ;;  %v529_v1 = vld [vmem:[#allocation10 + $0x5a8] sm:$0xff] }
 0x145   :  { %1302 = vmatpush1.msra.mxu1 %v640_v9  ;;  %1232 = vmatprep.subr.mxu0 %v377_v10  ;;  %v785_v2 = vld [vmem:[#allocation10 + $0xda8] sm:$0xff]  ;;  %v528_v4 = vld [vmem:[#allocation10 + $0x5a0] sm:$0xff] }
 0x146   :  { %1303 = vmatprep.subr.mxu1 %v633_v12  ;;  %1233 = vmatpush1.msra.mxu0 %v376_v13  ;;  %v784_v5 = vld [vmem:[#allocation10 + $0xda0] sm:$0xff]  ;;  %v521_v6 = vld [vmem:[#allocation10 + $0x568] sm:$0xff] }
 0x147   :  { %1304 = vmatpush1.msra.mxu1 %v632_v14  ;;  %1234 = vmatprep.subr.mxu0 %v369_v15  ;;  %v777_v7 = vld [vmem:[#allocation10 + $0xd68] sm:$0xff]  ;;  %v520_v9 = vld [vmem:[#allocation10 + $0x560] sm:$0xff] }
 0x148   :  { %1305 = vmatprep.subr.mxu1 %v625_v16  ;;  %1235 = vmatpush1.msra.mxu0 %v368_v17  ;;  %v776_v10 = vld [vmem:[#allocation10 + $0xd60] sm:$0xff]  ;;  %v513_v12 = vld [vmem:[#allocation10 + $0x528] sm:$0xff] }
 0x149   :  { %1306 = vmatpush1.msra.mxu1 %v624_v18  ;;  %1236 = vmatprep.subr.mxu0 %v361_v19  ;;  %v769_v13 = vld [vmem:[#allocation10 + $0xd28] sm:$0xff]  ;;  %v512_v14 = vld [vmem:[#allocation10 + $0x520] sm:$0xff] }
 0x14a   :  { %1307 = vmatprep.subr.mxu1 %v617_v20  ;;  %1237 = vmatpush1.msra.mxu0 %v360_v21  ;;  %v768_v15 = vld [vmem:[#allocation10 + $0xd20] sm:$0xff]  ;;  %v505_v16 = vld [vmem:[#allocation10 + $0x4e8] sm:$0xff] }
 0x14b   :  { %1308 = vmatpush1.msra.mxu1 %v616_v22  ;;  %1238 = vmatprep.subr.mxu0 %v353_v23  ;;  %v761_v17 = vld [vmem:[#allocation10 + $0xce8] sm:$0xff]  ;;  %v504_v18 = vld [vmem:[#allocation10 + $0x4e0] sm:$0xff] }
 0x14c   :  { %1309 = vmatprep.subr.mxu1 %v609_v24  ;;  %1239 = vmatpush1.msra.mxu0 %v352_v25  ;;  %v760_v19 = vld [vmem:[#allocation10 + $0xce0] sm:$0xff]  ;;  %v497_v20 = vld [vmem:[#allocation10 + $0x4a8] sm:$0xff] }
 0x14d   :  { %1310 = vmatpush1.msra.mxu1 %v608_v26  ;;  %1240 = vmatprep.subr.mxu0 %v601_v27  ;;  %v753_v21 = vld [vmem:[#allocation10 + $0xca8] sm:$0xff]  ;;  %v496_v22 = vld [vmem:[#allocation10 + $0x4a0] sm:$0xff] }
 0x14e   :  { %1311 = vmatprep.subr.mxu1 %v857_v28  ;;  %1241 = vmatpush2.msra.mxu0 %v600_v29  ;;  %v752_v23 = vld [vmem:[#allocation10 + $0xca0] sm:$0xff]  ;;  %v489_v24 = vld [vmem:[#allocation10 + $0x468] sm:$0xff] }
 0x14f   :  { %1312 = vmatpush2.msra.mxu1 %v856_v30  ;;  %1242 = vmatprep.subr.mxu0 %v593_v31  ;;  %v745_v25 = vld [vmem:[#allocation10 + $0xc68] sm:$0xff]  ;;  %v488_v26 = vld [vmem:[#allocation10 + $0x460] sm:$0xff] }
 0x150   :  { %1313 = vmatprep.subr.mxu1 %v849_v32  ;;  %1243 = vmatpush2.msra.mxu0 %v592_v33  ;;  %v744_v27 = vld [vmem:[#allocation10 + $0xc60] sm:$0xff]  ;;  %v481_v28 = vld [vmem:[#allocation10 + $0x428] sm:$0xff]  ;;  %v475_v32 = vld [vmem:[#allocation10 + $0x3f8] sm:$0xff] }
 0x151   :  { %1314 = vmatpush2.msra.mxu1 %v848_v34  ;;  %1244 = vmatprep.subr.mxu0 %v585_v35  ;;  %v737_v29 = vld [vmem:[#allocation10 + $0xc28] sm:$0xff]  ;;  %v480_v30 = vld [vmem:[#allocation10 + $0x420] sm:$0xff]  ;;  %v731_v33 = vld [vmem:[#allocation10 + $0xbf8] sm:$0xff] }
 0x152   :  { %1315 = vmatprep.subr.mxu1 %v841_v36  ;;  %1245 = vmatpush2.msra.mxu0 %v584_v37  ;;  %v736_v31 = vld [vmem:[#allocation10 + $0xc20] sm:$0xff]  ;;  %v474_v34 = vld [vmem:[#allocation10 + $0x3f0] sm:$0xff]  ;;  %v467_v36 = vld [vmem:[#allocation10 + $0x3b8] sm:$0xff] }
 0x153   :  { %1316 = vmatpush2.msra.mxu1 %v840_v38  ;;  %1246 = vmatprep.subr.mxu0 %v577_v39  ;;  %v730_v35 = vld [vmem:[#allocation10 + $0xbf0] sm:$0xff]  ;;  %v723_v37 = vld [vmem:[#allocation10 + $0xbb8] sm:$0xff] }
 0x154   :  { %1317 = vmatprep.subr.mxu1 %v833_v40  ;;  %1247 = vmatpush2.msra.mxu0 %v576_v42  ;;  %v466_v38 = vld [vmem:[#allocation10 + $0x3b0] sm:$0xff]  ;;  %v459_v40 = vld [vmem:[#allocation10 + $0x378] sm:$0xff] }
 0x155   :  { %1318 = vmatpush2.msra.mxu1 %v832_v43  ;;  %1248 = vmatprep.subr.mxu0 %v569_v44  ;;  %v722_v39 = vld [vmem:[#allocation10 + $0xbb0] sm:$0xff]  ;;  %v715_v42 = vld [vmem:[#allocation10 + $0xb78] sm:$0xff] }
 0x156   :  { %1319 = vmatprep.subr.mxu1 %v825_v45  ;;  %1249 = vmatpush2.msra.mxu0 %v568_v46  ;;  %v458_v43 = vld [vmem:[#allocation10 + $0x370] sm:$0xff]  ;;  %v451_v45 = vld [vmem:[#allocation10 + $0x338] sm:$0xff] }
 0x157   :  { %1320 = vmatpush2.msra.mxu1 %v824_v47  ;;  %1250 = vmatprep.subr.mxu0 %v561_v48  ;;  %v714_v44 = vld [vmem:[#allocation10 + $0xb70] sm:$0xff]  ;;  %v707_v46 = vld [vmem:[#allocation10 + $0xb38] sm:$0xff] }
 0x158   :  { %1321 = vmatprep.subr.mxu1 %v817_v49  ;;  %1251 = vmatpush2.msra.mxu0 %v560_v50  ;;  %v450_v47 = vld [vmem:[#allocation10 + $0x330] sm:$0xff]  ;;  %v443_v49 = vld [vmem:[#allocation10 + $0x2f8] sm:$0xff] }
 0x159   :  { %1322 = vmatpush2.msra.mxu1 %v816_v51  ;;  %1252 = vmatprep.subr.mxu0 %v553_v52  ;;  %v706_v48 = vld [vmem:[#allocation10 + $0xb30] sm:$0xff]  ;;  %v699_v50 = vld [vmem:[#allocation10 + $0xaf8] sm:$0xff] }
 0x15a   :  { %1323 = vmatprep.subr.mxu1 %v809_v53  ;;  %1253 = vmatpush2.msra.mxu0 %v552_v54  ;;  %v442_v51 = vld [vmem:[#allocation10 + $0x2f0] sm:$0xff]  ;;  %v435_v53 = vld [vmem:[#allocation10 + $0x2b8] sm:$0xff] }
 0x15b   :  { %1324 = vmatpush2.msra.mxu1 %v808_v55  ;;  %1254 = vmatprep.subr.mxu0 %v545_v56  ;;  %v698_v52 = vld [vmem:[#allocation10 + $0xaf0] sm:$0xff]  ;;  %v691_v54 = vld [vmem:[#allocation10 + $0xab8] sm:$0xff] }
 0x15c   :  { %1325 = vmatprep.subr.mxu1 %v801_v57  ;;  %1255 = vmatpush2.msra.mxu0 %v544_v58  ;;  %v434_v55 = vld [vmem:[#allocation10 + $0x2b0] sm:$0xff]  ;;  %v427_v57 = vld [vmem:[#allocation10 + $0x278] sm:$0xff] }
 0x15d   :  { %1326 = vmatpush2.msra.mxu1 %v800_v59  ;;  %1256 = vmatprep.subr.mxu0 %v537_v60  ;;  %v690_v56 = vld [vmem:[#allocation10 + $0xab0] sm:$0xff]  ;;  %v683_v58 = vld [vmem:[#allocation10 + $0xa78] sm:$0xff] }
 0x15e   :  { %1327 = vmatprep.subr.mxu1 %v793_v61  ;;  %1257 = vmatpush2.msra.mxu0 %v536_v63  ;;  %v426_v59 = vld [vmem:[#allocation10 + $0x270] sm:$0xff]  ;;  %v419_v61 = vld [vmem:[#allocation10 + $0x238] sm:$0xff] }
 0x15f   :  { %1328 = vmatpush2.msra.mxu1 %v792_v0  ;;  %1258 = vmatprep.subr.mxu0 %v529_v1  ;;  %v682_v60 = vld [vmem:[#allocation10 + $0xa70] sm:$0xff]  ;;  %v675_v63 = vld [vmem:[#allocation10 + $0xa38] sm:$0xff] }
 0x160   :  { %1329 = vmatprep.subr.mxu1 %v785_v2  ;;  %1259 = vmatpush2.msra.mxu0 %v528_v4  ;;  %v418_v0 = vld [vmem:[#allocation10 + $0x230] sm:$0xff]  ;;  %v411_v2 = vld [vmem:[#allocation10 + $0x1f8] sm:$0xff] }
 0x161   :  { %1330 = vmatpush2.msra.mxu1 %v784_v5  ;;  %1260 = vmatprep.subr.mxu0 %v521_v6  ;;  %v674_v1 = vld [vmem:[#allocation10 + $0xa30] sm:$0xff]  ;;  %v667_v4 = vld [vmem:[#allocation10 + $0x9f8] sm:$0xff] }
 0x162   :  { %1331 = vmatprep.subr.mxu1 %v777_v7  ;;  %1261 = vmatpush2.msra.mxu0 %v520_v9  ;;  %v410_v5 = vld [vmem:[#allocation10 + $0x1f0] sm:$0xff]  ;;  %v403_v7 = vld [vmem:[#allocation10 + $0x1b8] sm:$0xff] }
 0x163   :  { %1332 = vmatpush2.msra.mxu1 %v776_v10  ;;  %1262 = vmatprep.subr.mxu0 %v513_v12  ;;  %v666_v6 = vld [vmem:[#allocation10 + $0x9f0] sm:$0xff]  ;;  %v659_v9 = vld [vmem:[#allocation10 + $0x9b8] sm:$0xff] }
 0x164   :  { %1333 = vmatprep.subr.mxu1 %v769_v13  ;;  %1263 = vmatpush2.msra.mxu0 %v512_v14  ;;  %v402_v10 = vld [vmem:[#allocation10 + $0x1b0] sm:$0xff]  ;;  %v395_v13 = vld [vmem:[#allocation10 + $0x178] sm:$0xff] }
 0x165   :  { %1334 = vmatpush2.msra.mxu1 %v768_v15  ;;  %1264 = vmatprep.subr.mxu0 %v505_v16  ;;  %v658_v12 = vld [vmem:[#allocation10 + $0x9b0] sm:$0xff]  ;;  %v651_v14 = vld [vmem:[#allocation10 + $0x978] sm:$0xff] }
 0x166   :  { %1335 = vmatprep.subr.mxu1 %v761_v17  ;;  %1265 = vmatpush2.msra.mxu0 %v504_v18  ;;  %v394_v15 = vld [vmem:[#allocation10 + $0x170] sm:$0xff]  ;;  %v387_v17 = vld [vmem:[#allocation10 + $0x138] sm:$0xff] }
 0x167   :  { %1336 = vmatpush2.msra.mxu1 %v760_v19  ;;  %1266 = vmatprep.subr.mxu0 %v497_v20  ;;  %v650_v16 = vld [vmem:[#allocation10 + $0x970] sm:$0xff]  ;;  %v643_v18 = vld [vmem:[#allocation10 + $0x938] sm:$0xff] }
 0x168   :  { %1337 = vmatprep.subr.mxu1 %v753_v21  ;;  %1267 = vmatpush2.msra.mxu0 %v496_v22  ;;  %v386_v19 = vld [vmem:[#allocation10 + $0x130] sm:$0xff]  ;;  %v379_v21 = vld [vmem:[#allocation10 + $0xf8] sm:$0xff] }
 0x169   :  { %1338 = vmatpush2.msra.mxu1 %v752_v23  ;;  %1268 = vmatprep.subr.mxu0 %v489_v24  ;;  %v642_v20 = vld [vmem:[#allocation10 + $0x930] sm:$0xff]  ;;  %v635_v22 = vld [vmem:[#allocation10 + $0x8f8] sm:$0xff] }
 0x16a   :  { %1339 = vmatprep.subr.mxu1 %v745_v25  ;;  %1269 = vmatpush2.msra.mxu0 %v488_v26  ;;  %v378_v23 = vld [vmem:[#allocation10 + $0xf0] sm:$0xff]  ;;  %v371_v25 = vld [vmem:[#allocation10 + $0xb8] sm:$0xff] }
 0x16b   :  { %1340 = vmatpush2.msra.mxu1 %v744_v27  ;;  %1270 = vmatprep.subr.mxu0 %v481_v28  ;;  %v634_v24 = vld [vmem:[#allocation10 + $0x8f0] sm:$0xff]  ;;  %v627_v26 = vld [vmem:[#allocation10 + $0x8b8] sm:$0xff] }
 0x16c   :  { %1341 = vmatprep.subr.mxu1 %v737_v29  ;;  %1271 = vmatpush2.msra.mxu0 %v480_v30  ;;  %v370_v27 = vld [vmem:[#allocation10 + $0xb0] sm:$0xff]  ;;  %v363_v29 = vld [vmem:[#allocation10 + $0x78] sm:$0xff] }
 0x16d   :  { %1272 = vmatprep.mubr.f32.mxu0 %v3437_v8  ;;  %1342 = vmatpush2.msra.mxu1 %v736_v31  ;;  %v626_v28 = vld [vmem:[#allocation10 + $0x8b0] sm:$0xff]  ;;  %v619_v30 = vld [vmem:[#allocation10 + $0x878] sm:$0xff] }
 0x16e   :  { %1273 = vmatmul.mubr.f32.vlgmr.msra.gmra.mxu0 %v3431_v62  ;;  %1343 = vmatprep.mubr.f32.mxu1 %v3441_v11  ;;  %v362_v31 = vld [vmem:[#allocation10 + $0x70] sm:$0xff] }
 0x16f   :  { %1350 = vmatprep.subr.mxu0 %v475_v32  ;;  %1421 = vmatprep.subr.mxu1 %v731_v33  ;;  %v618_v32 = vld [vmem:[#allocation10 + $0x870] sm:$0xff]  ;;  %v355_v33 = vld [vmem:[#allocation10 + $0x38] sm:$0xff] }
 0x170   :  { %1344 = vmatmul.mubr.f32.vlgmr.msra.gmra.mxu1 %v3433_v3  ;;  %1351 = vmatpush1.msra.mxu0 %v474_v34  ;;  %v611_v34 = vld [vmem:[#allocation10 + $0x838] sm:$0xff] }
 0x171   :  { %1422 = vmatpush1.msra.mxu1 %v730_v35  ;;  %1352 = vmatprep.subr.mxu0 %v467_v36  ;;  %v354_v35 = vld [vmem:[#allocation10 + $0x30] sm:$0xff] }
 0x172   :  { %1423 = vmatprep.subr.mxu1 %v723_v37  ;;  %1353 = vmatpush1.msra.mxu0 %v466_v38  ;;  %v610_v36 = vld [vmem:[#allocation10 + $0x830] sm:$0xff]  ;;  %v603_v37 = vld [vmem:[#allocation10 + $0x7f8] sm:$0xff] }
 0x173   :  { %1424 = vmatpush1.msra.mxu1 %v722_v39  ;;  %1354 = vmatprep.subr.mxu0 %v459_v40  ;;  %v859_v38 = vld [vmem:[#allocation10 + $0xff8] sm:$0xff]  ;;  %v602_v39 = vld [vmem:[#allocation10 + $0x7f0] sm:$0xff] }
 0x174   :  { %1425 = vmatprep.subr.mxu1 %v715_v42  ;;  %1355 = vmatpush1.msra.mxu0 %v458_v43  ;;  %v858_v40 = vld [vmem:[#allocation10 + $0xff0] sm:$0xff]  ;;  %v595_v42 = vld [vmem:[#allocation10 + $0x7b8] sm:$0xff] }
 0x175   :  { %1426 = vmatpush1.msra.mxu1 %v714_v44  ;;  %1356 = vmatprep.subr.mxu0 %v451_v45  ;;  %v851_v43 = vld [vmem:[#allocation10 + $0xfb8] sm:$0xff]  ;;  %v594_v44 = vld [vmem:[#allocation10 + $0x7b0] sm:$0xff] }
 0x176   :  { %1427 = vmatprep.subr.mxu1 %v707_v46  ;;  %1357 = vmatpush1.msra.mxu0 %v450_v47  ;;  %v850_v45 = vld [vmem:[#allocation10 + $0xfb0] sm:$0xff]  ;;  %v587_v46 = vld [vmem:[#allocation10 + $0x778] sm:$0xff] }
 0x177   :  { %1428 = vmatpush1.msra.mxu1 %v706_v48  ;;  %1358 = vmatprep.subr.mxu0 %v443_v49  ;;  %v843_v47 = vld [vmem:[#allocation10 + $0xf78] sm:$0xff]  ;;  %v586_v48 = vld [vmem:[#allocation10 + $0x770] sm:$0xff] }
 0x178   :  { %1429 = vmatprep.subr.mxu1 %v699_v50  ;;  %1359 = vmatpush1.msra.mxu0 %v442_v51  ;;  %v842_v49 = vld [vmem:[#allocation10 + $0xf70] sm:$0xff]  ;;  %v579_v50 = vld [vmem:[#allocation10 + $0x738] sm:$0xff] }
 0x179   :  { %1430 = vmatpush1.msra.mxu1 %v698_v52  ;;  %1360 = vmatprep.subr.mxu0 %v435_v53  ;;  %v835_v51 = vld [vmem:[#allocation10 + $0xf38] sm:$0xff]  ;;  %v578_v52 = vld [vmem:[#allocation10 + $0x730] sm:$0xff] }
 0x17a   :  { %1431 = vmatprep.subr.mxu1 %v691_v54  ;;  %1361 = vmatpush1.msra.mxu0 %v434_v55  ;;  %v834_v53 = vld [vmem:[#allocation10 + $0xf30] sm:$0xff]  ;;  %v571_v54 = vld [vmem:[#allocation10 + $0x6f8] sm:$0xff] }
 0x17b   :  { %1432 = vmatpush1.msra.mxu1 %v690_v56  ;;  %1362 = vmatprep.subr.mxu0 %v427_v57  ;;  %v827_v55 = vld [vmem:[#allocation10 + $0xef8] sm:$0xff]  ;;  %v570_v56 = vld [vmem:[#allocation10 + $0x6f0] sm:$0xff] }
 0x17c   :  { %1433 = vmatprep.subr.mxu1 %v683_v58  ;;  %1363 = vmatpush1.msra.mxu0 %v426_v59  ;;  %v826_v57 = vld [vmem:[#allocation10 + $0xef0] sm:$0xff]  ;;  %v563_v58 = vld [vmem:[#allocation10 + $0x6b8] sm:$0xff] }
 0x17d   :  { %1434 = vmatpush1.msra.mxu1 %v682_v60  ;;  %1364 = vmatprep.subr.mxu0 %v419_v61  ;;  %v819_v59 = vld [vmem:[#allocation10 + $0xeb8] sm:$0xff]  ;;  %v562_v60 = vld [vmem:[#allocation10 + $0x6b0] sm:$0xff] }
 0x17e   :  { %1435 = vmatprep.subr.mxu1 %v675_v63  ;;  %1365 = vmatpush1.msra.mxu0 %v418_v0  ;;  %v818_v61 = vld [vmem:[#allocation10 + $0xeb0] sm:$0xff]  ;;  %v555_v63 = vld [vmem:[#allocation10 + $0x678] sm:$0xff] }
 0x17f   :  { %1436 = vmatpush1.msra.mxu1 %v674_v1  ;;  %1366 = vmatprep.subr.mxu0 %v411_v2  ;;  %v811_v0 = vld [vmem:[#allocation10 + $0xe78] sm:$0xff]  ;;  %v554_v1 = vld [vmem:[#allocation10 + $0x670] sm:$0xff] }
 0x180   :  { %1437 = vmatprep.subr.mxu1 %v667_v4  ;;  %1367 = vmatpush1.msra.mxu0 %v410_v5  ;;  %v810_v2 = vld [vmem:[#allocation10 + $0xe70] sm:$0xff]  ;;  %v547_v4 = vld [vmem:[#allocation10 + $0x638] sm:$0xff] }
 0x181   :  { %1438 = vmatpush1.msra.mxu1 %v666_v6  ;;  %1368 = vmatprep.subr.mxu0 %v403_v7  ;;  %v803_v5 = vld [vmem:[#allocation10 + $0xe38] sm:$0xff]  ;;  %v546_v6 = vld [vmem:[#allocation10 + $0x630] sm:$0xff] }
 0x182   :  { %1439 = vmatprep.subr.mxu1 %v659_v9  ;;  %1369 = vmatpush1.msra.mxu0 %v402_v10  ;;  %v802_v7 = vld [vmem:[#allocation10 + $0xe30] sm:$0xff]  ;;  %v539_v9 = vld [vmem:[#allocation10 + $0x5f8] sm:$0xff] }
 0x183   :  { %1440 = vmatpush1.msra.mxu1 %v658_v12  ;;  %1370 = vmatprep.subr.mxu0 %v395_v13  ;;  %v795_v10 = vld [vmem:[#allocation10 + $0xdf8] sm:$0xff]  ;;  %v538_v12 = vld [vmem:[#allocation10 + $0x5f0] sm:$0xff] }
 0x184   :  { %1441 = vmatprep.subr.mxu1 %v651_v14  ;;  %1371 = vmatpush1.msra.mxu0 %v394_v15  ;;  %v794_v13 = vld [vmem:[#allocation10 + $0xdf0] sm:$0xff]  ;;  %v531_v14 = vld [vmem:[#allocation10 + $0x5b8] sm:$0xff] }
 0x185   :  { %1442 = vmatpush1.msra.mxu1 %v650_v16  ;;  %1372 = vmatprep.subr.mxu0 %v387_v17  ;;  %v787_v15 = vld [vmem:[#allocation10 + $0xdb8] sm:$0xff]  ;;  %v530_v16 = vld [vmem:[#allocation10 + $0x5b0] sm:$0xff] }
 0x186   :  { %1443 = vmatprep.subr.mxu1 %v643_v18  ;;  %1373 = vmatpush1.msra.mxu0 %v386_v19  ;;  %v786_v17 = vld [vmem:[#allocation10 + $0xdb0] sm:$0xff]  ;;  %v523_v18 = vld [vmem:[#allocation10 + $0x578] sm:$0xff] }
 0x187   :  { %1444 = vmatpush1.msra.mxu1 %v642_v20  ;;  %1374 = vmatprep.subr.mxu0 %v379_v21  ;;  %v779_v19 = vld [vmem:[#allocation10 + $0xd78] sm:$0xff]  ;;  %v522_v20 = vld [vmem:[#allocation10 + $0x570] sm:$0xff] }
 0x188   :  { %1445 = vmatprep.subr.mxu1 %v635_v22  ;;  %1375 = vmatpush1.msra.mxu0 %v378_v23  ;;  %v778_v21 = vld [vmem:[#allocation10 + $0xd70] sm:$0xff]  ;;  %v515_v22 = vld [vmem:[#allocation10 + $0x538] sm:$0xff] }
 0x189   :  { %1446 = vmatpush1.msra.mxu1 %v634_v24  ;;  %1376 = vmatprep.subr.mxu0 %v371_v25  ;;  %v771_v23 = vld [vmem:[#allocation10 + $0xd38] sm:$0xff]  ;;  %v3456_v24 = vsub.s32 0, %v3428_v41  ;;  %v514_v25 = vld [vmem:[#allocation10 + $0x530] sm:$0xff] }
 0x18a   :  { %1447 = vmatprep.subr.mxu1 %v627_v26  ;;  %1377 = vmatpush1.msra.mxu0 %v370_v27  ;;  %v770_v26 = vld [vmem:[#allocation10 + $0xd30] sm:$0xff]  ;;  %v3458_v27 = vld [vmem:[#allocation11] sm:$0xff] }
 0x18b   :  { %1448 = vmatpush1.msra.mxu1 %v626_v28  ;;  %1378 = vmatprep.subr.mxu0 %v363_v29  ;;  %v507_v28 = vld [vmem:[#allocation10 + $0x4f8] sm:$0xff] }
 0x18c   :  { %1449 = vmatprep.subr.mxu1 %v619_v30  ;;  %1379 = vmatpush1.msra.mxu0 %v362_v31  ;;  %v763_v29 = vld [vmem:[#allocation10 + $0xcf8] sm:$0xff]  ;;  %v3461_v30 = vsub.s32 1, %v3428_v41  ;;  %v506_v31 = vld [vmem:[#allocation10 + $0x4f0] sm:$0xff] }
 0x18d   :  { %1450 = vmatpush1.msra.mxu1 %v618_v32  ;;  %1380 = vmatprep.subr.mxu0 %v355_v33  ;;  %v762_v32 = vld [vmem:[#allocation10 + $0xcf0] sm:$0xff]  ;;  %v499_v33 = vld [vmem:[#allocation10 + $0x4b8] sm:$0xff] }
 0x18e   :  { %1451 = vmatprep.subr.mxu1 %v611_v34  ;;  %1381 = vmatpush1.msra.mxu0 %v354_v35  ;;  %v755_v34 = vld [vmem:[#allocation10 + $0xcb8] sm:$0xff]  ;;  %v865_v35 = vrot.slane %v3458_v27, %v3456_v24 }
 0x18f   :  { %1452 = vmatpush1.msra.mxu1 %v610_v36  ;;  %1382 = vmatprep.subr.mxu0 %v603_v37  ;;  %v498_v36 = vld [vmem:[#allocation10 + $0x4b0] sm:$0xff] }
 0x190   :  { %1453 = vmatprep.subr.mxu1 %v859_v38  ;;  %1383 = vmatpush2.msra.mxu0 %v602_v39  ;;  %v754_v37 = vld [vmem:[#allocation10 + $0xcb0] sm:$0xff]  ;;  %v491_v38 = vld [vmem:[#allocation10 + $0x478] sm:$0xff] }
 0x191   :  { %1454 = vmatpush2.msra.mxu1 %v858_v40  ;;  %1384 = vmatprep.subr.mxu0 %v595_v42  ;;  %v747_v39 = vld [vmem:[#allocation10 + $0xc78] sm:$0xff]  ;;  %v869_v40 = vrot.slane %v3458_v27, %v3461_v30  ;;  %v490_v42 = vld [vmem:[#allocation10 + $0x470] sm:$0xff] }
 0x192   :  { %1455 = vmatprep.subr.mxu1 %v851_v43  ;;  %1385 = vmatpush2.msra.mxu0 %v594_v44  ;;  %v746_v43 = vld [vmem:[#allocation10 + $0xc70] sm:$0xff] }
 0x193   :  { %1456 = vmatpush2.msra.mxu1 %v850_v45  ;;  %1386 = vmatprep.subr.mxu0 %v587_v46  ;;  %v483_v45 = vld [vmem:[#allocation10 + $0x438] sm:$0xff] }
 0x194   :  { %1457 = vmatprep.subr.mxu1 %v843_v47  ;;  %1387 = vmatpush2.msra.mxu0 %v586_v48  ;;  %v739_v46 = vld [vmem:[#allocation10 + $0xc38] sm:$0xff]  ;;  %v482_v48 = vld [vmem:[#allocation10 + $0x430] sm:$0xff] }
 0x195   :  { %1458 = vmatpush2.msra.mxu1 %v842_v49  ;;  %1388 = vmatprep.subr.mxu0 %v579_v50 }
 0x196   :  { %1459 = vmatprep.subr.mxu1 %v835_v51  ;;  %1389 = vmatpush2.msra.mxu0 %v578_v52  ;;  %v738_v51 = vld [vmem:[#allocation10 + $0xc30] sm:$0xff] }
 0x197   :  { %1460 = vmatpush2.msra.mxu1 %v834_v53  ;;  %1390 = vmatprep.subr.mxu0 %v571_v54 }
 0x198   :  { %1461 = vmatprep.subr.mxu1 %v827_v55  ;;  %1391 = vmatpush2.msra.mxu0 %v570_v56  ;;  %v1553_v55 = vld [vmem:[#allocation13 + $0x1e8] sm:$0xff] }
 0x199   :  { %1462 = vmatpush2.msra.mxu1 %v826_v57  ;;  %1392 = vmatprep.subr.mxu0 %v563_v58  ;;  %v1552_v57 = vld [vmem:[#allocation13 + $0x1e0] sm:$0xff]  ;;  %v1681_v58 = vld [vmem:[#allocation13 + $0x5e8] sm:$0xff] }
 0x19a   :  { %1463 = vmatprep.subr.mxu1 %v819_v59  ;;  %1393 = vmatpush2.msra.mxu0 %v562_v60  ;;  %v1549_v59 = vld [vmem:[#allocation13 + $0x1c8] sm:$0xff]  ;;  %v1680_v60 = vld [vmem:[#allocation13 + $0x5e0] sm:$0xff] }
 0x19b   :  { %1464 = vmatpush2.msra.mxu1 %v818_v61  ;;  %1394 = vmatprep.subr.mxu0 %v555_v63  ;;  %v1548_v61 = vld [vmem:[#allocation13 + $0x1c0] sm:$0xff]  ;;  %v1677_v63 = vld [vmem:[#allocation13 + $0x5c8] sm:$0xff] }
 0x19c   :  { %1465 = vmatprep.subr.mxu1 %v811_v0  ;;  %1395 = vmatpush2.msra.mxu0 %v554_v1  ;;  %v1676_v0 = vld [vmem:[#allocation13 + $0x5c0] sm:$0xff] }
 0x19d   :  { %1466 = vmatpush2.msra.mxu1 %v810_v2  ;;  %1396 = vmatprep.subr.mxu0 %v547_v4  ;;  %v1544_v1 = vld [vmem:[#allocation13 + $0x1a0] sm:$0xff]  ;;  %v1541_v2 = vld [vmem:[#allocation13 + $0x188] sm:$0xff] }
 0x19e   :  { %1467 = vmatprep.subr.mxu1 %v803_v5  ;;  %1397 = vmatpush2.msra.mxu0 %v546_v6  ;;  %v1669_v4 = vld [vmem:[#allocation13 + $0x588] sm:$0xff]  ;;  %v1668_v6 = vld [vmem:[#allocation13 + $0x580] sm:$0xff] }
 0x19f   :  { %1468 = vmatpush2.msra.mxu1 %v802_v7  ;;  %1398 = vmatprep.subr.mxu0 %v539_v9  ;;  %v1537_v5 = vld [vmem:[#allocation13 + $0x168] sm:$0xff]  ;;  %v1536_v7 = vld [vmem:[#allocation13 + $0x160] sm:$0xff] }
 0x1a0   :  { %1469 = vmatprep.subr.mxu1 %v795_v10  ;;  %1399 = vmatpush2.msra.mxu0 %v538_v12  ;;  %v1665_v9 = vld [vmem:[#allocation13 + $0x568] sm:$0xff]  ;;  %v1664_v12 = vld [vmem:[#allocation13 + $0x560] sm:$0xff] }
 0x1a1   :  { %1470 = vmatpush2.msra.mxu1 %v794_v13  ;;  %1400 = vmatprep.subr.mxu0 %v531_v14  ;;  %v1533_v10 = vld [vmem:[#allocation13 + $0x148] sm:$0xff]  ;;  %v1532_v13 = vld [vmem:[#allocation13 + $0x140] sm:$0xff] }
 0x1a2   :  { %1471 = vmatprep.subr.mxu1 %v787_v15  ;;  %1401 = vmatpush2.msra.mxu0 %v530_v16  ;;  %v1661_v14 = vld [vmem:[#allocation13 + $0x548] sm:$0xff]  ;;  %v1660_v16 = vld [vmem:[#allocation13 + $0x540] sm:$0xff] }
 0x1a3   :  { %1472 = vmatpush2.msra.mxu1 %v786_v17  ;;  %1402 = vmatprep.subr.mxu0 %v523_v18  ;;  %v1529_v15 = vld [vmem:[#allocation13 + $0x128] sm:$0xff]  ;;  %v1528_v17 = vld [vmem:[#allocation13 + $0x120] sm:$0xff] }
 0x1a4   :  { %1473 = vmatprep.subr.mxu1 %v779_v19  ;;  %1403 = vmatpush2.msra.mxu0 %v522_v20  ;;  %v1657_v18 = vld [vmem:[#allocation13 + $0x528] sm:$0xff]  ;;  %v1656_v20 = vld [vmem:[#allocation13 + $0x520] sm:$0xff] }
 0x1a5   :  { %1474 = vmatpush2.msra.mxu1 %v778_v21  ;;  %1404 = vmatprep.subr.mxu0 %v515_v22  ;;  %v1525_v19 = vld [vmem:[#allocation13 + $0x108] sm:$0xff]  ;;  %v1524_v21 = vld [vmem:[#allocation13 + $0x100] sm:$0xff] }
 0x1a6   :  { %1475 = vmatprep.subr.mxu1 %v771_v23  ;;  %1405 = vmatpush2.msra.mxu0 %v514_v25  ;;  %v1653_v22 = vld [vmem:[#allocation13 + $0x508] sm:$0xff]  ;;  %v1652_v25 = vld [vmem:[#allocation13 + $0x500] sm:$0xff] }
 0x1a7   :  { %1476 = vmatpush2.msra.mxu1 %v770_v26  ;;  %1406 = vmatprep.subr.mxu0 %v507_v28  ;;  %v1521_v23 = vld [vmem:[#allocation13 + $0xe8] sm:$0xff]  ;;  %v1520_v26 = vld [vmem:[#allocation13 + $0xe0] sm:$0xff] }
 0x1a8   :  { %1477 = vmatprep.subr.mxu1 %v763_v29  ;;  %1407 = vmatpush2.msra.mxu0 %v506_v31  ;;  %v1649_v28 = vld [vmem:[#allocation13 + $0x4e8] sm:$0xff]  ;;  %v1648_v31 = vld [vmem:[#allocation13 + $0x4e0] sm:$0xff] }
 0x1a9   :  { %1478 = vmatpush2.msra.mxu1 %v762_v32  ;;  %1408 = vmatprep.subr.mxu0 %v499_v33  ;;  %v1517_v29 = vld [vmem:[#allocation13 + $0xc8] sm:$0xff]  ;;  %v1516_v32 = vld [vmem:[#allocation13 + $0xc0] sm:$0xff] }
 0x1aa   :  { %1479 = vmatprep.subr.mxu1 %v755_v34  ;;  %v990_v44 = vpop.f32.mrf.mxu0  ;;  %1409 = vmatpush2.msra.mxu0 %v498_v36  ;;  %v1645_v33 = vld [vmem:[#allocation13 + $0x4c8] sm:$0xff]  ;;  %v1512_v36 = vld [vmem:[#allocation13 + $0xa0] sm:$0xff] }
 0x1ab   :  { %1480 = vmatpush2.msra.mxu1 %v754_v37  ;;  %v991_v47 = vadd.f32 %v990_v44, %v865_v35  ;;  %1410 = vmatprep.subr.mxu0 %v491_v38  ;;  %v1513_v34 = vld [vmem:[#allocation13 + $0xa8] sm:$0xff]  ;;  %v1644_v35 = vld [vmem:[#allocation13 + $0x4c0] sm:$0xff] }
 0x1ac   :  { %1481 = vmatprep.subr.mxu1 %v747_v39  ;;  %v1061_v49 = vpop.f32.mrf.mxu1  ;;  %v992_v50 = vpop.f32.mrf.mxu0  ;;  %1411 = vmatpush2.msra.mxu0 %v490_v42  ;;  %v1641_v37 = vld [vmem:[#allocation13 + $0x4a8] sm:$0xff]  ;;  %v1640_v39 = vld [vmem:[#allocation13 + $0x4a0] sm:$0xff] }
 0x1ad   :  { %1482 = vmatpush2.msra.mxu1 %v746_v43  ;;  %v3467_v52 = vadd.f32 %v1061_v49, %v991_v47  ;;  %v993_v53 = vadd.f32 %v992_v50, %v869_v40  ;;  %1412 = vmatprep.subr.mxu0 %v483_v45  ;;  %v1509_v38 = vld [vmem:[#allocation13 + $0x88] sm:$0xff]  ;;  %v1508_v40 = vld [vmem:[#allocation13 + $0x80] sm:$0xff] }
 0x1ae   :  { %1483 = vmatprep.subr.mxu1 %v739_v46  ;;  %v1063_v54 = vpop.f32.mrf.mxu1  ;;  %1413 = vmatpush2.msra.mxu0 %v482_v48  ;;  %v1637_v42 = vld [vmem:[#allocation13 + $0x488] sm:$0xff]  ;;  %v1636_v44 = vld [vmem:[#allocation13 + $0x480] sm:$0xff] }
 0x1af   :  { %1414 = vmatprep.mubr.f32.mxu0 %v3437_v8  ;;  %v3470_v56 = vadd.f32 %v1063_v54, %v993_v53  ;;  %1484 = vmatpush2.msra.mxu1 %v738_v51  ;;  %v1545_v8 = vld [vmem:[#allocation13 + $0x1a8] sm:$0xff]  ;;  %v1504_v45 = vld [vmem:[#allocation13 + $0x60] sm:$0xff] }
 0x1b0   :  { %1485 = vmatprep.mubr.f32.mxu1 %v3441_v11  ;;  %1415 = vmatmul.mubr.f32.vlgmr.msra.gmra.mxu0 %v3431_v62  ;;  %v1673_v11 = vld [vmem:[#allocation13 + $0x5a8] sm:$0xff]  ;;  %v1672_v62 = vld [vmem:[#allocation13 + $0x5a0] sm:$0xff] }
 0x1b1   :  { %1486 = vmatmul.mubr.f32.vlgmr.msra.gmra.mxu1 %v3433_v3  ;;  %1770 = vmatprep.subr.mxu0 %v1553_v55  ;;  %v1540_v3 = vld [vmem:[#allocation13 + $0x180] sm:$0xff]  ;;  %v1505_v43 = vld [vmem:[#allocation13 + $0x68] sm:$0xff] }
 0x1b2   :  { %1834 = vmatprep.mubr.f32.mxu0 %v3470_v56  ;;  %1771 = vmatpush1.msra.mxu0 %v1552_v57  ;;  %v1633_v46 = vld [vmem:[#allocation13 + $0x468] sm:$0xff]  ;;  %v1632_v48 = vld [vmem:[#allocation13 + $0x460] sm:$0xff] }
 0x1b3   :  { %1841 = vmatprep.subr.mxu1 %v1681_v58  ;;  %1772 = vmatprep.subr.mxu0 %v1549_v59  ;;  %v1501_v47 = vld [vmem:[#allocation13 + $0x48] sm:$0xff]  ;;  %v1500_v49 = vld [vmem:[#allocation13 + $0x40] sm:$0xff] }
 0x1b4   :  { %1842 = vmatpush1.msra.mxu1 %v1680_v60  ;;  %1773 = vmatpush1.msra.mxu0 %v1548_v61  ;;  %v1629_v50 = vld [vmem:[#allocation13 + $0x448] sm:$0xff]  ;;  %v1628_v53 = vld [vmem:[#allocation13 + $0x440] sm:$0xff] }
 0x1b5   :  { %1843 = vmatprep.subr.mxu1 %v1677_v63  ;;  %1774 = vmatprep.subr.mxu0 %v1545_v8  ;;  %v1497_v51 = vld [vmem:[#allocation13 + $0x28] sm:$0xff]  ;;  %v1496_v54 = vld [vmem:[#allocation13 + $0x20] sm:$0xff] }
 0x1b6   :  { %1844 = vmatpush1.msra.mxu1 %v1676_v0  ;;  %1775 = vmatpush1.msra.mxu0 %v1544_v1  ;;  %v1625_v55 = vld [vmem:[#allocation13 + $0x428] sm:$0xff]  ;;  %v1624_v58 = vld [vmem:[#allocation13 + $0x420] sm:$0xff] }
 0x1b7   :  { %1845 = vmatprep.subr.mxu1 %v1673_v11  ;;  %1776 = vmatprep.subr.mxu0 %v1541_v2  ;;  %v1493_v57 = vld [vmem:[#allocation13 + $0x8] sm:$0xff]  ;;  %v1492_v59 = vld [vmem:[#allocation13] sm:$0xff] }
 0x1b8   :  { %1846 = vmatpush1.msra.mxu1 %v1672_v62  ;;  %1777 = vmatpush1.msra.mxu0 %v1540_v3  ;;  %v1621_v60 = vld [vmem:[#allocation13 + $0x408] sm:$0xff]  ;;  %v1620_v63 = vld [vmem:[#allocation13 + $0x400] sm:$0xff] }
 0x1b9   :  { %1847 = vmatprep.subr.mxu1 %v1669_v4  ;;  %1778 = vmatprep.subr.mxu0 %v1537_v5  ;;  %v1617_v61 = vld [vmem:[#allocation13 + $0x3e8] sm:$0xff]  ;;  %v1616_v8 = vld [vmem:[#allocation13 + $0x3e0] sm:$0xff] }
 0x1ba   :  { %1848 = vmatpush1.msra.mxu1 %v1668_v6  ;;  %1779 = vmatpush1.msra.mxu0 %v1536_v7  ;;  %v1745_v0 = vld [vmem:[#allocation13 + $0x7e8] sm:$0xff]  ;;  %v1744_v11 = vld [vmem:[#allocation13 + $0x7e0] sm:$0xff] }
 0x1bb   :  { %1849 = vmatprep.subr.mxu1 %v1665_v9  ;;  %1780 = vmatprep.subr.mxu0 %v1533_v10  ;;  %v1613_v1 = vld [vmem:[#allocation13 + $0x3c8] sm:$0xff]  ;;  %v1612_v2 = vld [vmem:[#allocation13 + $0x3c0] sm:$0xff] }
 0x1bc   :  { %1850 = vmatpush1.msra.mxu1 %v1664_v12  ;;  %1781 = vmatpush1.msra.mxu0 %v1532_v13  ;;  %v1741_v62 = vld [vmem:[#allocation13 + $0x7c8] sm:$0xff]  ;;  %v1740_v4 = vld [vmem:[#allocation13 + $0x7c0] sm:$0xff] }
 0x1bd   :  { %1851 = vmatprep.subr.mxu1 %v1661_v14  ;;  %1782 = vmatprep.subr.mxu0 %v1529_v15  ;;  %v1609_v3 = vld [vmem:[#allocation13 + $0x3a8] sm:$0xff]  ;;  %v1608_v5 = vld [vmem:[#allocation13 + $0x3a0] sm:$0xff] }
 0x1be   :  { %1852 = vmatpush1.msra.mxu1 %v1660_v16  ;;  %1783 = vmatpush1.msra.mxu0 %v1528_v17  ;;  %v1737_v6 = vld [vmem:[#allocation13 + $0x7a8] sm:$0xff]  ;;  %v1736_v9 = vld [vmem:[#allocation13 + $0x7a0] sm:$0xff] }
 0x1bf   :  { %1853 = vmatprep.subr.mxu1 %v1657_v18  ;;  %1784 = vmatprep.subr.mxu0 %v1525_v19  ;;  %v1605_v7 = vld [vmem:[#allocation13 + $0x388] sm:$0xff]  ;;  %v1604_v10 = vld [vmem:[#allocation13 + $0x380] sm:$0xff] }
 0x1c0   :  { %1854 = vmatpush1.msra.mxu1 %v1656_v20  ;;  %1785 = vmatpush1.msra.mxu0 %v1524_v21  ;;  %v1733_v12 = vld [vmem:[#allocation13 + $0x788] sm:$0xff]  ;;  %v1732_v14 = vld [vmem:[#allocation13 + $0x780] sm:$0xff] }
 0x1c1   :  { %1855 = vmatprep.subr.mxu1 %v1653_v22  ;;  %1786 = vmatprep.subr.mxu0 %v1521_v23  ;;  %v1601_v13 = vld [vmem:[#allocation13 + $0x368] sm:$0xff]  ;;  %v1600_v15 = vld [vmem:[#allocation13 + $0x360] sm:$0xff] }
 0x1c2   :  { %1856 = vmatpush1.msra.mxu1 %v1652_v25  ;;  %1787 = vmatpush1.msra.mxu0 %v1520_v26  ;;  %v1729_v16 = vld [vmem:[#allocation13 + $0x768] sm:$0xff]  ;;  %v1728_v18 = vld [vmem:[#allocation13 + $0x760] sm:$0xff] }
 0x1c3   :  { %1857 = vmatprep.subr.mxu1 %v1649_v28  ;;  %1788 = vmatprep.subr.mxu0 %v1517_v29  ;;  %v1597_v17 = vld [vmem:[#allocation13 + $0x348] sm:$0xff]  ;;  %v1596_v19 = vld [vmem:[#allocation13 + $0x340] sm:$0xff] }
 0x1c4   :  { %1858 = vmatpush1.msra.mxu1 %v1648_v31  ;;  %1789 = vmatpush1.msra.mxu0 %v1516_v32  ;;  %v1725_v20 = vld [vmem:[#allocation13 + $0x748] sm:$0xff]  ;;  %v1724_v22 = vld [vmem:[#allocation13 + $0x740] sm:$0xff] }
 0x1c5   :  { %1859 = vmatprep.subr.mxu1 %v1645_v33  ;;  %1790 = vmatprep.subr.mxu0 %v1513_v34  ;;  %v1593_v21 = vld [vmem:[#allocation13 + $0x328] sm:$0xff]  ;;  %v1592_v23 = vld [vmem:[#allocation13 + $0x320] sm:$0xff] }
 0x1c6   :  { %1860 = vmatpush1.msra.mxu1 %v1644_v35  ;;  %1791 = vmatpush1.msra.mxu0 %v1512_v36  ;;  %v1721_v25 = vld [vmem:[#allocation13 + $0x728] sm:$0xff]  ;;  %v1720_v28 = vld [vmem:[#allocation13 + $0x720] sm:$0xff] }
 0x1c7   :  { %1861 = vmatprep.subr.mxu1 %v1641_v37  ;;  %1792 = vmatprep.subr.mxu0 %v1509_v38  ;;  %v1589_v26 = vld [vmem:[#allocation13 + $0x308] sm:$0xff]  ;;  %v1588_v29 = vld [vmem:[#allocation13 + $0x300] sm:$0xff] }
 0x1c8   :  { %1862 = vmatpush1.msra.mxu1 %v1640_v39  ;;  %1793 = vmatpush1.msra.mxu0 %v1508_v40  ;;  %v1717_v31 = vld [vmem:[#allocation13 + $0x708] sm:$0xff]  ;;  %v1716_v33 = vld [vmem:[#allocation13 + $0x700] sm:$0xff] }
 0x1c9   :  { %1863 = vmatprep.subr.mxu1 %v1637_v42  ;;  %1794 = vmatprep.subr.mxu0 %v1505_v43  ;;  %v1585_v32 = vld [vmem:[#allocation13 + $0x2e8] sm:$0xff]  ;;  %v1584_v34 = vld [vmem:[#allocation13 + $0x2e0] sm:$0xff] }
 0x1ca   :  { %1864 = vmatpush1.msra.mxu1 %v1636_v44  ;;  %1795 = vmatpush1.msra.mxu0 %v1504_v45  ;;  %v1713_v35 = vld [vmem:[#allocation13 + $0x6e8] sm:$0xff]  ;;  %v1712_v37 = vld [vmem:[#allocation13 + $0x6e0] sm:$0xff] }
 0x1cb   :  { %1865 = vmatprep.subr.mxu1 %v1633_v46  ;;  %1796 = vmatprep.subr.mxu0 %v1501_v47  ;;  %v1581_v36 = vld [vmem:[#allocation13 + $0x2c8] sm:$0xff]  ;;  %v1580_v38 = vld [vmem:[#allocation13 + $0x2c0] sm:$0xff] }
 0x1cc   :  { %1866 = vmatpush1.msra.mxu1 %v1632_v48  ;;  %1797 = vmatpush1.msra.mxu0 %v1500_v49  ;;  %v1709_v39 = vld [vmem:[#allocation13 + $0x6c8] sm:$0xff]  ;;  %v1708_v42 = vld [vmem:[#allocation13 + $0x6c0] sm:$0xff] }
 0x1cd   :  { %1867 = vmatprep.subr.mxu1 %v1629_v50  ;;  %1798 = vmatprep.subr.mxu0 %v1497_v51  ;;  %v1577_v40 = vld [vmem:[#allocation13 + $0x2a8] sm:$0xff]  ;;  %v1576_v43 = vld [vmem:[#allocation13 + $0x2a0] sm:$0xff] }
 0x1ce   :  { %1868 = vmatpush1.msra.mxu1 %v1628_v53  ;;  %1799 = vmatpush1.msra.mxu0 %v1496_v54  ;;  %v1705_v44 = vld [vmem:[#allocation13 + $0x6a8] sm:$0xff]  ;;  %v1704_v46 = vld [vmem:[#allocation13 + $0x6a0] sm:$0xff]  ;;  %v3477_v54 = vsub.s32 3, %v3428_v41 }
 0x1cf   :  { %1869 = vmatprep.subr.mxu1 %v1625_v55  ;;  %1800 = vmatprep.subr.mxu0 %v1493_v57  ;;  %v1573_v45 = vld [vmem:[#allocation13 + $0x288] sm:$0xff]  ;;  %v1572_v47 = vld [vmem:[#allocation13 + $0x280] sm:$0xff]  ;;  %v3480_v57 = vsub.s32 2, %v3428_v41 }
 0x1d0   :  { %1870 = vmatpush1.msra.mxu1 %v1624_v58  ;;  %1801 = vmatpush1.msra.mxu0 %v1492_v59  ;;  %v1701_v48 = vld [vmem:[#allocation13 + $0x688] sm:$0xff]  ;;  %v1700_v50 = vld [vmem:[#allocation13 + $0x680] sm:$0xff] }
 0x1d1   :  { %1871 = vmatprep.subr.mxu1 %v1621_v60  ;;  %1802 = vmatprep.subr.mxu0 %v1617_v61  ;;  %v1569_v49 = vld [vmem:[#allocation13 + $0x268] sm:$0xff]  ;;  %v1568_v51 = vld [vmem:[#allocation13 + $0x260] sm:$0xff] }
 0x1d2   :  { %1872 = vmatpush1.msra.mxu1 %v1620_v63  ;;  %1803 = vmatpush2.msra.mxu0 %v1616_v8  ;;  %v1697_v53 = vld [vmem:[#allocation13 + $0x668] sm:$0xff]  ;;  %v1696_v58 = vld [vmem:[#allocation13 + $0x660] sm:$0xff] }
 0x1d3   :  { %1873 = vmatprep.subr.mxu1 %v1745_v0  ;;  %1804 = vmatprep.subr.mxu0 %v1613_v1  ;;  %v1565_v55 = vld [vmem:[#allocation13 + $0x248] sm:$0xff]  ;;  %v1564_v59 = vld [vmem:[#allocation13 + $0x240] sm:$0xff]  ;;  %v877_v0 = vrot.slane %v3458_v27, %v3477_v54 }
 0x1d4   :  { %1874 = vmatpush2.msra.mxu1 %v1744_v11  ;;  %1805 = vmatpush2.msra.mxu0 %v1612_v2  ;;  %v1693_v60 = vld [vmem:[#allocation13 + $0x648] sm:$0xff]  ;;  %v1692_v63 = vld [vmem:[#allocation13 + $0x640] sm:$0xff]  ;;  %v873_v2 = vrot.slane %v3458_v27, %v3480_v57  ;;  %v1551_v27 = vld [vmem:[#allocation13 + $0x1d8] sm:$0xff] }
 0x1d5   :  { %1875 = vmatprep.subr.mxu1 %v1741_v62  ;;  %1806 = vmatprep.subr.mxu0 %v1609_v3  ;;  %v1561_v61 = vld [vmem:[#allocation13 + $0x228] sm:$0xff]  ;;  %v1560_v8 = vld [vmem:[#allocation13 + $0x220] sm:$0xff] }
 0x1d6   :  { %1876 = vmatpush2.msra.mxu1 %v1740_v4  ;;  %1807 = vmatpush2.msra.mxu0 %v1608_v5  ;;  %v1689_v1 = vld [vmem:[#allocation13 + $0x628] sm:$0xff]  ;;  %v1688_v4 = vld [vmem:[#allocation13 + $0x620] sm:$0xff] }
 0x1d7   :  { %1877 = vmatprep.subr.mxu1 %v1737_v6  ;;  %1808 = vmatprep.subr.mxu0 %v1605_v7  ;;  %v1557_v11 = vld [vmem:[#allocation13 + $0x208] sm:$0xff]  ;;  %v1556_v5 = vld [vmem:[#allocation13 + $0x200] sm:$0xff]  ;;  %v1555_v7 = vld [vmem:[#allocation13 + $0x1f8] sm:$0xff] }
 0x1d8   :  { %1878 = vmatpush2.msra.mxu1 %v1736_v9  ;;  %1809 = vmatpush2.msra.mxu0 %v1604_v10  ;;  %v1685_v6 = vld [vmem:[#allocation13 + $0x608] sm:$0xff]  ;;  %v1554_v10 = vld [vmem:[#allocation13 + $0x1f0] sm:$0xff] }
 0x1d9   :  { %1879 = vmatprep.subr.mxu1 %v1733_v12  ;;  %1810 = vmatprep.subr.mxu0 %v1601_v13 }
 0x1da   :  { %1880 = vmatpush2.msra.mxu1 %v1732_v14  ;;  %1811 = vmatpush2.msra.mxu0 %v1600_v15  ;;  %v1684_v15 = vld [vmem:[#allocation13 + $0x600] sm:$0xff] }
 0x1db   :  { %1881 = vmatprep.subr.mxu1 %v1729_v16  ;;  %1812 = vmatprep.subr.mxu0 %v1597_v17  ;;  %v1550_v17 = vld [vmem:[#allocation13 + $0x1d0] sm:$0xff] }
 0x1dc   :  { %1882 = vmatpush2.msra.mxu1 %v1728_v18  ;;  %1813 = vmatpush2.msra.mxu0 %v1596_v19  ;;  %v1547_v18 = vld [vmem:[#allocation13 + $0x1b8] sm:$0xff] }
 0x1dd   :  { %1883 = vmatprep.subr.mxu1 %v1725_v20  ;;  %1814 = vmatprep.subr.mxu0 %v1593_v21  ;;  %v1683_v19 = vld [vmem:[#allocation13 + $0x5f8] sm:$0xff]  ;;  %v1546_v20 = vld [vmem:[#allocation13 + $0x1b0] sm:$0xff] }
 0x1de   :  { %1884 = vmatpush2.msra.mxu1 %v1724_v22  ;;  %1815 = vmatpush2.msra.mxu0 %v1592_v23  ;;  %v1543_v22 = vld [vmem:[#allocation13 + $0x198] sm:$0xff]  ;;  %v1682_v23 = vld [vmem:[#allocation13 + $0x5f0] sm:$0xff] }
 0x1df   :  { %1885 = vmatprep.subr.mxu1 %v1721_v25  ;;  %1816 = vmatprep.subr.mxu0 %v1589_v26  ;;  %v1542_v25 = vld [vmem:[#allocation13 + $0x190] sm:$0xff]  ;;  %v1679_v26 = vld [vmem:[#allocation13 + $0x5d8] sm:$0xff] }
 0x1e0   :  { %1886 = vmatpush2.msra.mxu1 %v1720_v28  ;;  %1817 = vmatpush2.msra.mxu0 %v1588_v29  ;;  %v1539_v28 = vld [vmem:[#allocation13 + $0x178] sm:$0xff]  ;;  %v1678_v29 = vld [vmem:[#allocation13 + $0x5d0] sm:$0xff] }
 0x1e1   :  { %1887 = vmatprep.subr.mxu1 %v1717_v31  ;;  %1818 = vmatprep.subr.mxu0 %v1585_v32  ;;  %v1535_v31 = vld [vmem:[#allocation13 + $0x158] sm:$0xff] }
 0x1e2   :  { %1888 = vmatpush2.msra.mxu1 %v1716_v33  ;;  %1819 = vmatpush2.msra.mxu0 %v1584_v34  ;;  %v1675_v32 = vld [vmem:[#allocation13 + $0x5b8] sm:$0xff]  ;;  %v1534_v33 = vld [vmem:[#allocation13 + $0x150] sm:$0xff] }
 0x1e3   :  { %1889 = vmatprep.subr.mxu1 %v1713_v35  ;;  %1820 = vmatprep.subr.mxu0 %v1581_v36  ;;  %v1674_v34 = vld [vmem:[#allocation13 + $0x5b0] sm:$0xff]  ;;  %v1531_v35 = vld [vmem:[#allocation13 + $0x138] sm:$0xff] }
 0x1e4   :  { %1890 = vmatpush2.msra.mxu1 %v1712_v37  ;;  %1821 = vmatpush2.msra.mxu0 %v1580_v38  ;;  %v1671_v36 = vld [vmem:[#allocation13 + $0x598] sm:$0xff]  ;;  %v1530_v37 = vld [vmem:[#allocation13 + $0x130] sm:$0xff] }
 0x1e5   :  { %1891 = vmatprep.subr.mxu1 %v1709_v39  ;;  %1822 = vmatprep.subr.mxu0 %v1577_v40  ;;  %v1670_v38 = vld [vmem:[#allocation13 + $0x590] sm:$0xff]  ;;  %v1527_v39 = vld [vmem:[#allocation13 + $0x118] sm:$0xff] }
 0x1e6   :  { %1892 = vmatpush2.msra.mxu1 %v1708_v42  ;;  %1823 = vmatpush2.msra.mxu0 %v1576_v43  ;;  %v1667_v40 = vld [vmem:[#allocation13 + $0x578] sm:$0xff]  ;;  %v1526_v42 = vld [vmem:[#allocation13 + $0x110] sm:$0xff] }
 0x1e7   :  { %1893 = vmatprep.subr.mxu1 %v1705_v44  ;;  %1824 = vmatprep.subr.mxu0 %v1573_v45  ;;  %v1666_v43 = vld [vmem:[#allocation13 + $0x570] sm:$0xff]  ;;  %v1523_v44 = vld [vmem:[#allocation13 + $0xf8] sm:$0xff] }
 0x1e8   :  { %1894 = vmatpush2.msra.mxu1 %v1704_v46  ;;  %1825 = vmatpush2.msra.mxu0 %v1572_v47  ;;  %v1663_v45 = vld [vmem:[#allocation13 + $0x558] sm:$0xff]  ;;  %v1522_v46 = vld [vmem:[#allocation13 + $0xf0] sm:$0xff] }
 0x1e9   :  { %1895 = vmatprep.subr.mxu1 %v1701_v48  ;;  %1826 = vmatprep.subr.mxu0 %v1569_v49  ;;  %v1662_v47 = vld [vmem:[#allocation13 + $0x550] sm:$0xff]  ;;  %v1519_v48 = vld [vmem:[#allocation13 + $0xd8] sm:$0xff] }
 0x1ea   :  { %1896 = vmatpush2.msra.mxu1 %v1700_v50  ;;  %1827 = vmatpush2.msra.mxu0 %v1568_v51  ;;  %v1659_v49 = vld [vmem:[#allocation13 + $0x538] sm:$0xff]  ;;  %v1518_v50 = vld [vmem:[#allocation13 + $0xd0] sm:$0xff] }
 0x1eb   :  { %1897 = vmatprep.subr.mxu1 %v1697_v53  ;;  %1828 = vmatprep.subr.mxu0 %v1565_v55  ;;  %v1658_v51 = vld [vmem:[#allocation13 + $0x530] sm:$0xff]  ;;  %v1515_v53 = vld [vmem:[#allocation13 + $0xb8] sm:$0xff] }
 0x1ec   :  { %1898 = vmatpush2.msra.mxu1 %v1696_v58  ;;  %1829 = vmatpush2.msra.mxu0 %v1564_v59  ;;  %v1132_v62 = vpop.f32.mrf.mxu0  ;;  %v1655_v55 = vld [vmem:[#allocation13 + $0x518] sm:$0xff]  ;;  %v1514_v58 = vld [vmem:[#allocation13 + $0xb0] sm:$0xff] }
 0x1ed   :  { %v1203_v3 = vpop.f32.mrf.mxu1  ;;  %1899 = vmatprep.subr.mxu1 %v1693_v60  ;;  %1830 = vmatprep.subr.mxu0 %v1561_v61  ;;  %v1133_v13 = vadd.f32 %v1132_v62, %v873_v2  ;;  %v1654_v59 = vld [vmem:[#allocation13 + $0x510] sm:$0xff]  ;;  %v1511_v60 = vld [vmem:[#allocation13 + $0x98] sm:$0xff] }
 0x1ee   :  { %1900 = vmatpush2.msra.mxu1 %v1692_v63  ;;  %1831 = vmatpush2.msra.mxu0 %v1560_v8  ;;  %v1134_v9 = vpop.f32.mrf.mxu0  ;;  %v1651_v61 = vld [vmem:[#allocation13 + $0x4f8] sm:$0xff]  ;;  %v1510_v63 = vld [vmem:[#allocation13 + $0x90] sm:$0xff] }
 0x1ef   :  { %1901 = vmatprep.subr.mxu1 %v1689_v1  ;;  %1832 = vmatprep.subr.mxu0 %v1557_v11  ;;  %v1135_v12 = vadd.f32 %v1134_v9, %v877_v0  ;;  %v1205_v14 = vpop.f32.mrf.mxu1  ;;  %v3488_v21 = vadd.f32 %v1203_v3, %v1133_v13  ;;  %v1650_v8 = vld [vmem:[#allocation13 + $0x4f0] sm:$0xff]  ;;  %v1507_v0 = vld [vmem:[#allocation13 + $0x78] sm:$0xff] }
 0x1f0   :  { %1902 = vmatpush2.msra.mxu1 %v1688_v4  ;;  %1833 = vmatpush2.msra.mxu0 %v1556_v5  ;;  %v1647_v1 = vld [vmem:[#allocation13 + $0x4d8] sm:$0xff]  ;;  %v1506_v11 = vld [vmem:[#allocation13 + $0x70] sm:$0xff] }
 0x1f1   :  { %1903 = vmatprep.subr.mxu1 %v1685_v6  ;;  %1835 = vmatmul.mubr.f32.vlgmr.msra.gmra.mxu0 %v3467_v52  ;;  %v1206_v16 = vadd.f32 %v1205_v14, %v1135_v12  ;;  %v1646_v2 = vld [vmem:[#allocation13 + $0x4d0] sm:$0xff]  ;;  %v1503_v62 = vld [vmem:[#allocation13 + $0x58] sm:$0xff] }
 0x1f2   :  { %1912 = vmatprep.subr.mxu0 %v1555_v7  ;;  %1976 = vmatprep.mubr.f32.mxu0 %v3470_v56  ;;  %v1538_v56 = vld [vmem:[#allocation13 + $0x170] sm:$0xff]  ;;  %v1643_v3 = vld [vmem:[#allocation13 + $0x4b8] sm:$0xff] }
 0x1f3   :  { %1913 = vmatpush1.msra.mxu0 %v1554_v10  ;;  %1904 = vmatpush2.msra.mxu1 %v1684_v15  ;;  %v1502_v4 = vld [vmem:[#allocation13 + $0x50] sm:$0xff]  ;;  %v1499_v6 = vld [vmem:[#allocation13 + $0x38] sm:$0xff] }
 0x1f4   :  { %1914 = vmatprep.subr.mxu0 %v1551_v27  ;;  %1905 = vmatprep.mubr.f32.mxu1 %v1206_v16  ;;  %v1642_v5 = vld [vmem:[#allocation13 + $0x4b0] sm:$0xff]  ;;  %v1639_v7 = vld [vmem:[#allocation13 + $0x498] sm:$0xff] }
 0x1f5   :  { %1915 = vmatpush1.msra.mxu0 %v1550_v17  ;;  %1983 = vmatprep.subr.mxu1 %v1683_v19  ;;  %v1498_v9 = vld [vmem:[#allocation13 + $0x30] sm:$0xff]  ;;  %v1495_v12 = vld [vmem:[#allocation13 + $0x18] sm:$0xff] }
 0x1f6   :  { %1916 = vmatprep.subr.mxu0 %v1547_v18  ;;  %1906 = vmatmul.mubr.f32.vlgmr.msra.gmra.mxu1 %v3488_v21  ;;  %v1638_v10 = vld [vmem:[#allocation13 + $0x490] sm:$0xff]  ;;  %v1635_v13 = vld [vmem:[#allocation13 + $0x478] sm:$0xff] }
 0x1f7   :  { %1917 = vmatpush1.msra.mxu0 %v1546_v20  ;;  %1984 = vmatpush1.msra.mxu1 %v1682_v23  ;;  %v1494_v14 = vld [vmem:[#allocation13 + $0x10] sm:$0xff]  ;;  %v1619_v15 = vld [vmem:[#allocation13 + $0x3f8] sm:$0xff] }
 0x1f8   :  { %1918 = vmatprep.subr.mxu0 %v1543_v22  ;;  %1985 = vmatprep.subr.mxu1 %v1679_v26  ;;  %v1634_v27 = vld [vmem:[#allocation13 + $0x470] sm:$0xff]  ;;  %v1615_v19 = vld [vmem:[#allocation13 + $0x3d8] sm:$0xff] }
 0x1f9   :  { %1919 = vmatpush1.msra.mxu0 %v1542_v25  ;;  %2047 = vmatprep.mubr.f32.mxu1 %v1206_v16  ;;  %v1631_v16 = vld [vmem:[#allocation13 + $0x458] sm:$0xff]  ;;  %v1618_v17 = vld [vmem:[#allocation13 + $0x3f0] sm:$0xff] }
 0x1fa   :  { %1920 = vmatprep.subr.mxu0 %v1539_v28  ;;  %1986 = vmatpush1.msra.mxu1 %v1678_v29  ;;  %v1630_v18 = vld [vmem:[#allocation13 + $0x450] sm:$0xff]  ;;  %v1627_v20 = vld [vmem:[#allocation13 + $0x438] sm:$0xff] }
 0x1fb   :  { %1921 = vmatpush1.msra.mxu0 %v1538_v56  ;;  %1987 = vmatprep.subr.mxu1 %v1675_v32  ;;  %v1614_v22 = vld [vmem:[#allocation13 + $0x3d0] sm:$0xff]  ;;  %v1611_v25 = vld [vmem:[#allocation13 + $0x3b8] sm:$0xff] }
 0x1fc   :  { %1922 = vmatprep.subr.mxu0 %v1535_v31  ;;  %1988 = vmatpush1.msra.mxu1 %v1674_v34  ;;  %v1626_v23 = vld [vmem:[#allocation13 + $0x430] sm:$0xff]  ;;  %v1623_v26 = vld [vmem:[#allocation13 + $0x418] sm:$0xff] }
 0x1fd   :  { %1923 = vmatpush1.msra.mxu0 %v1534_v33  ;;  %1989 = vmatprep.subr.mxu1 %v1671_v36  ;;  %v1610_v28 = vld [vmem:[#allocation13 + $0x3b0] sm:$0xff]  ;;  %v1607_v29 = vld [vmem:[#allocation13 + $0x398] sm:$0xff] }
 0x1fe   :  { %1924 = vmatprep.subr.mxu0 %v1531_v35  ;;  %1990 = vmatpush1.msra.mxu1 %v1670_v38  ;;  %v1622_v56 = vld [vmem:[#allocation13 + $0x410] sm:$0xff]  ;;  %v1747_v31 = vld [vmem:[#allocation13 + $0x7f8] sm:$0xff] }
 0x1ff   :  { %1925 = vmatpush1.msra.mxu0 %v1530_v37  ;;  %1991 = vmatprep.subr.mxu1 %v1667_v40  ;;  %v1606_v32 = vld [vmem:[#allocation13 + $0x390] sm:$0xff]  ;;  %v1603_v34 = vld [vmem:[#allocation13 + $0x378] sm:$0xff] }
 0x200   :  { %1926 = vmatprep.subr.mxu0 %v1527_v39  ;;  %1992 = vmatpush1.msra.mxu1 %v1666_v43  ;;  %v1746_v33 = vld [vmem:[#allocation13 + $0x7f0] sm:$0xff]  ;;  %v1743_v35 = vld [vmem:[#allocation13 + $0x7d8] sm:$0xff] }
 0x201   :  { %1927 = vmatpush1.msra.mxu0 %v1526_v42  ;;  %1993 = vmatprep.subr.mxu1 %v1663_v45  ;;  %v1602_v36 = vld [vmem:[#allocation13 + $0x370] sm:$0xff]  ;;  %v1599_v38 = vld [vmem:[#allocation13 + $0x358] sm:$0xff] }
 0x202   :  { %1928 = vmatprep.subr.mxu0 %v1523_v44  ;;  %1994 = vmatpush1.msra.mxu1 %v1662_v47  ;;  %v1742_v37 = vld [vmem:[#allocation13 + $0x7d0] sm:$0xff]  ;;  %v1739_v39 = vld [vmem:[#allocation13 + $0x7b8] sm:$0xff] }
 0x203   :  { %1929 = vmatpush1.msra.mxu0 %v1522_v46  ;;  %1995 = vmatprep.subr.mxu1 %v1659_v49  ;;  %v1598_v40 = vld [vmem:[#allocation13 + $0x350] sm:$0xff]  ;;  %v1595_v43 = vld [vmem:[#allocation13 + $0x338] sm:$0xff] }
 0x204   :  { %1930 = vmatprep.subr.mxu0 %v1519_v48  ;;  %1996 = vmatpush1.msra.mxu1 %v1658_v51  ;;  %v1738_v42 = vld [vmem:[#allocation13 + $0x7b0] sm:$0xff]  ;;  %v1735_v44 = vld [vmem:[#allocation13 + $0x798] sm:$0xff] }
 0x205   :  { %1931 = vmatpush1.msra.mxu0 %v1518_v50  ;;  %1997 = vmatprep.subr.mxu1 %v1655_v55  ;;  %v1594_v45 = vld [vmem:[#allocation13 + $0x330] sm:$0xff]  ;;  %v1591_v47 = vld [vmem:[#allocation13 + $0x318] sm:$0xff] }
 0x206   :  { %1932 = vmatprep.subr.mxu0 %v1515_v53  ;;  %1998 = vmatpush1.msra.mxu1 %v1654_v59  ;;  %v1734_v46 = vld [vmem:[#allocation13 + $0x790] sm:$0xff]  ;;  %v1731_v48 = vld [vmem:[#allocation13 + $0x778] sm:$0xff] }
 0x207   :  { %1933 = vmatpush1.msra.mxu0 %v1514_v58  ;;  %1999 = vmatprep.subr.mxu1 %v1651_v61  ;;  %v1590_v49 = vld [vmem:[#allocation13 + $0x310] sm:$0xff]  ;;  %v1587_v51 = vld [vmem:[#allocation13 + $0x2f8] sm:$0xff] }
 0x208   :  { %1934 = vmatprep.subr.mxu0 %v1511_v60  ;;  %2000 = vmatpush1.msra.mxu1 %v1650_v8  ;;  %v1730_v50 = vld [vmem:[#allocation13 + $0x770] sm:$0xff]  ;;  %v1727_v53 = vld [vmem:[#allocation13 + $0x758] sm:$0xff] }
 0x209   :  { %1935 = vmatpush1.msra.mxu0 %v1510_v63  ;;  %2001 = vmatprep.subr.mxu1 %v1647_v1  ;;  %v1586_v55 = vld [vmem:[#allocation13 + $0x2f0] sm:$0xff]  ;;  %v1583_v59 = vld [vmem:[#allocation13 + $0x2d8] sm:$0xff] }
 0x20a   :  { %1936 = vmatprep.subr.mxu0 %v1507_v0  ;;  %2002 = vmatpush1.msra.mxu1 %v1646_v2  ;;  %v1726_v58 = vld [vmem:[#allocation13 + $0x750] sm:$0xff]  ;;  %v1723_v60 = vld [vmem:[#allocation13 + $0x738] sm:$0xff] }
 0x20b   :  { %1937 = vmatpush1.msra.mxu0 %v1506_v11  ;;  %2003 = vmatprep.subr.mxu1 %v1643_v3  ;;  %v1582_v61 = vld [vmem:[#allocation13 + $0x2d0] sm:$0xff]  ;;  %v1579_v8 = vld [vmem:[#allocation13 + $0x2b8] sm:$0xff] }
 0x20c   :  { %1938 = vmatprep.subr.mxu0 %v1503_v62  ;;  %2004 = vmatpush1.msra.mxu1 %v1642_v5  ;;  %v1722_v63 = vld [vmem:[#allocation13 + $0x730] sm:$0xff]  ;;  %v1719_v0 = vld [vmem:[#allocation13 + $0x718] sm:$0xff] }
 0x20d   :  { %1939 = vmatpush1.msra.mxu0 %v1502_v4  ;;  %2005 = vmatprep.subr.mxu1 %v1639_v7  ;;  %v1578_v1 = vld [vmem:[#allocation13 + $0x2b0] sm:$0xff]  ;;  %v1575_v2 = vld [vmem:[#allocation13 + $0x298] sm:$0xff] }
 0x20e   :  { %1940 = vmatprep.subr.mxu0 %v1499_v6  ;;  %2006 = vmatpush1.msra.mxu1 %v1638_v10  ;;  %v1718_v11 = vld [vmem:[#allocation13 + $0x710] sm:$0xff]  ;;  %v1715_v62 = vld [vmem:[#allocation13 + $0x6f8] sm:$0xff] }
 0x20f   :  { %1941 = vmatpush1.msra.mxu0 %v1498_v9  ;;  %2007 = vmatprep.subr.mxu1 %v1635_v13  ;;  %v1574_v3 = vld [vmem:[#allocation13 + $0x290] sm:$0xff]  ;;  %v1571_v5 = vld [vmem:[#allocation13 + $0x278] sm:$0xff] }
 0x210   :  { %1942 = vmatprep.subr.mxu0 %v1495_v12  ;;  %2008 = vmatpush1.msra.mxu1 %v1634_v27  ;;  %v1714_v4 = vld [vmem:[#allocation13 + $0x6f0] sm:$0xff]  ;;  %v1711_v6 = vld [vmem:[#allocation13 + $0x6d8] sm:$0xff]  ;;  %v884_v27 = vsub.s32 5, %v3428_v41 }
 0x211   :  { %1943 = vmatpush1.msra.mxu0 %v1494_v14  ;;  %2009 = vmatprep.subr.mxu1 %v1631_v16  ;;  %v1570_v7 = vld [vmem:[#allocation13 + $0x270] sm:$0xff]  ;;  %v1567_v10 = vld [vmem:[#allocation13 + $0x258] sm:$0xff] }
 0x212   :  { %1944 = vmatprep.subr.mxu0 %v1619_v15  ;;  %2010 = vmatpush1.msra.mxu1 %v1630_v18  ;;  %v1710_v9 = vld [vmem:[#allocation13 + $0x6d0] sm:$0xff]  ;;  %v1707_v12 = vld [vmem:[#allocation13 + $0x6b8] sm:$0xff] }
 0x213   :  { %1945 = vmatpush2.msra.mxu0 %v1618_v17  ;;  %2011 = vmatprep.subr.mxu1 %v1627_v20  ;;  %v1566_v13 = vld [vmem:[#allocation13 + $0x250] sm:$0xff]  ;;  %v1563_v15 = vld [vmem:[#allocation13 + $0x238] sm:$0xff] }
 0x214   :  { %1946 = vmatprep.subr.mxu0 %v1615_v19  ;;  %2012 = vmatpush1.msra.mxu1 %v1626_v23  ;;  %v1706_v14 = vld [vmem:[#allocation13 + $0x6b0] sm:$0xff]  ;;  %v1703_v16 = vld [vmem:[#allocation13 + $0x698] sm:$0xff] }
 0x215   :  { %1947 = vmatpush2.msra.mxu0 %v1614_v22  ;;  %2013 = vmatprep.subr.mxu1 %v1623_v26  ;;  %v1562_v17 = vld [vmem:[#allocation13 + $0x230] sm:$0xff]  ;;  %v1559_v19 = vld [vmem:[#allocation13 + $0x218] sm:$0xff] }
 0x216   :  { %1948 = vmatprep.subr.mxu0 %v1611_v25  ;;  %2014 = vmatpush1.msra.mxu1 %v1622_v56  ;;  %v1702_v18 = vld [vmem:[#allocation13 + $0x690] sm:$0xff]  ;;  %v1699_v20 = vld [vmem:[#allocation13 + $0x678] sm:$0xff] }
 0x217   :  { %1949 = vmatpush2.msra.mxu0 %v1610_v28  ;;  %2015 = vmatprep.subr.mxu1 %v1747_v31  ;;  %v1558_v22 = vld [vmem:[#allocation13 + $0x210] sm:$0xff]  ;;  %v3494_v26 = vld [vmem:[#allocation11] sm:$0xff] }
 0x218   :  { %1950 = vmatprep.subr.mxu0 %v1607_v29  ;;  %2016 = vmatpush2.msra.mxu1 %v1746_v33  ;;  %v1698_v25 = vld [vmem:[#allocation13 + $0x670] sm:$0xff]  ;;  %v885_v28 = vrot.slane %v3494_v26, %v884_v27  ;;  %v1695_v31 = vld [vmem:[#allocation13 + $0x658] sm:$0xff] }
 0x219   :  { %1951 = vmatpush2.msra.mxu0 %v1606_v32  ;;  %2017 = vmatprep.subr.mxu1 %v1743_v35  ;;  %v2115_v56 = vld [vmem:[#allocation16 + $0x1e8] sm:$0xff]  ;;  %v2114_v32 = vld [vmem:[#allocation16 + $0x1e0] sm:$0xff] }
 0x21a   :  { %1952 = vmatprep.subr.mxu0 %v1603_v34  ;;  %2018 = vmatpush2.msra.mxu1 %v1742_v37  ;;  %v1694_v34 = vld [vmem:[#allocation13 + $0x650] sm:$0xff]  ;;  %v1691_v37 = vld [vmem:[#allocation13 + $0x638] sm:$0xff] }
 0x21b   :  { %1953 = vmatpush2.msra.mxu0 %v1602_v36  ;;  %2019 = vmatprep.subr.mxu1 %v1739_v39  ;;  %v2111_v35 = vld [vmem:[#allocation16 + $0x1c8] sm:$0xff] }
 0x21c   :  { %1954 = vmatprep.subr.mxu0 %v1599_v38  ;;  %2020 = vmatpush2.msra.mxu1 %v1738_v42  ;;  %v2110_v38 = vld [vmem:[#allocation16 + $0x1c0] sm:$0xff]  ;;  %v2107_v42 = vld [vmem:[#allocation16 + $0x1a8] sm:$0xff] }
 0x21d   :  { %1955 = vmatpush2.msra.mxu0 %v1598_v40  ;;  %2021 = vmatprep.subr.mxu1 %v1735_v44  ;;  %v1690_v40 = vld [vmem:[#allocation13 + $0x630] sm:$0xff]  ;;  %v2106_v44 = vld [vmem:[#allocation16 + $0x1a0] sm:$0xff] }
 0x21e   :  { %1956 = vmatprep.subr.mxu0 %v1595_v43  ;;  %2022 = vmatpush2.msra.mxu1 %v1734_v46  ;;  %v1687_v43 = vld [vmem:[#allocation13 + $0x618] sm:$0xff]  ;;  %v2103_v46 = vld [vmem:[#allocation16 + $0x188] sm:$0xff] }
 0x21f   :  { %1957 = vmatpush2.msra.mxu0 %v1594_v45  ;;  %2023 = vmatprep.subr.mxu1 %v1731_v48  ;;  %v1686_v45 = vld [vmem:[#allocation13 + $0x610] sm:$0xff] }
 0x220   :  { %1958 = vmatprep.subr.mxu0 %v1591_v47  ;;  %2024 = vmatpush2.msra.mxu1 %v1730_v50  ;;  %v2243_v48 = vld [vmem:[#allocation16 + $0x5e8] sm:$0xff]  ;;  %v2242_v50 = vld [vmem:[#allocation16 + $0x5e0] sm:$0xff] }
 0x221   :  { %1959 = vmatpush2.msra.mxu0 %v1590_v49  ;;  %2025 = vmatprep.subr.mxu1 %v1727_v53  ;;  %v2099_v49 = vld [vmem:[#allocation16 + $0x168] sm:$0xff] }
 0x222   :  { %1960 = vmatprep.subr.mxu0 %v1587_v51  ;;  %2026 = vmatpush2.msra.mxu1 %v1726_v58  ;;  %v2098_v51 = vld [vmem:[#allocation16 + $0x160] sm:$0xff]  ;;  %v2239_v53 = vld [vmem:[#allocation16 + $0x5c8] sm:$0xff] }
 0x223   :  { %1961 = vmatpush2.msra.mxu0 %v1586_v55  ;;  %2027 = vmatprep.subr.mxu1 %v1723_v60  ;;  %v2095_v55 = vld [vmem:[#allocation16 + $0x148] sm:$0xff]  ;;  %v2238_v58 = vld [vmem:[#allocation16 + $0x5c0] sm:$0xff] }
 0x224   :  { %1962 = vmatprep.subr.mxu0 %v1583_v59  ;;  %2028 = vmatpush2.msra.mxu1 %v1722_v63  ;;  %v2094_v59 = vld [vmem:[#allocation16 + $0x140] sm:$0xff]  ;;  %v2235_v60 = vld [vmem:[#allocation16 + $0x5a8] sm:$0xff] }
 0x225   :  { %1963 = vmatpush2.msra.mxu0 %v1582_v61  ;;  %2029 = vmatprep.subr.mxu1 %v1719_v0  ;;  %v2091_v61 = vld [vmem:[#allocation16 + $0x128] sm:$0xff]  ;;  %v2234_v63 = vld [vmem:[#allocation16 + $0x5a0] sm:$0xff] }
 0x226   :  { %1964 = vmatprep.subr.mxu0 %v1579_v8  ;;  %2030 = vmatpush2.msra.mxu1 %v1718_v11  ;;  %v2090_v8 = vld [vmem:[#allocation16 + $0x120] sm:$0xff]  ;;  %v2087_v0 = vld [vmem:[#allocation16 + $0x108] sm:$0xff] }
 0x227   :  { %1965 = vmatpush2.msra.mxu0 %v1578_v1  ;;  %2031 = vmatprep.subr.mxu1 %v1715_v62  ;;  %v2230_v1 = vld [vmem:[#allocation16 + $0x580] sm:$0xff]  ;;  %v2083_v62 = vld [vmem:[#allocation16 + $0xe8] sm:$0xff] }
 0x228   :  { %1966 = vmatprep.subr.mxu0 %v1575_v2  ;;  %2032 = vmatpush2.msra.mxu1 %v1714_v4  ;;  %v2086_v11 = vld [vmem:[#allocation16 + $0x100] sm:$0xff]  ;;  %v2227_v2 = vld [vmem:[#allocation16 + $0x568] sm:$0xff] }
 0x229   :  { %1967 = vmatpush2.msra.mxu0 %v1574_v3  ;;  %2033 = vmatprep.subr.mxu1 %v1711_v6  ;;  %v2226_v3 = vld [vmem:[#allocation16 + $0x560] sm:$0xff]  ;;  %v2079_v6 = vld [vmem:[#allocation16 + $0xc8] sm:$0xff] }
 0x22a   :  { %1968 = vmatprep.subr.mxu0 %v1571_v5  ;;  %2034 = vmatpush2.msra.mxu1 %v1710_v9  ;;  %v2082_v4 = vld [vmem:[#allocation16 + $0xe0] sm:$0xff]  ;;  %v2223_v5 = vld [vmem:[#allocation16 + $0x548] sm:$0xff] }
 0x22b   :  { %1969 = vmatpush2.msra.mxu0 %v1570_v7  ;;  %2035 = vmatprep.subr.mxu1 %v1707_v12  ;;  %v2222_v7 = vld [vmem:[#allocation16 + $0x540] sm:$0xff]  ;;  %v2075_v12 = vld [vmem:[#allocation16 + $0xa8] sm:$0xff] }
 0x22c   :  { %1970 = vmatprep.subr.mxu0 %v1567_v10  ;;  %2036 = vmatpush2.msra.mxu1 %v1706_v14  ;;  %v2078_v9 = vld [vmem:[#allocation16 + $0xc0] sm:$0xff]  ;;  %v2219_v10 = vld [vmem:[#allocation16 + $0x528] sm:$0xff] }
 0x22d   :  { %1971 = vmatpush2.msra.mxu0 %v1566_v13  ;;  %2037 = vmatprep.subr.mxu1 %v1703_v16  ;;  %v2218_v13 = vld [vmem:[#allocation16 + $0x520] sm:$0xff]  ;;  %v2215_v27 = vld [vmem:[#allocation16 + $0x508] sm:$0xff] }
 0x22e   :  { %1972 = vmatprep.subr.mxu0 %v1563_v15  ;;  %v3492_v23 = vpop.f32.mrf.mxu0  ;;  %2038 = vmatpush2.msra.mxu1 %v1702_v18  ;;  %v2074_v14 = vld [vmem:[#allocation16 + $0xa0] sm:$0xff]  ;;  %v2071_v15 = vld [vmem:[#allocation16 + $0x88] sm:$0xff] }
 0x22f   :  { %1973 = vmatpush2.msra.mxu0 %v1562_v17  ;;  %2039 = vmatprep.subr.mxu1 %v1699_v20  ;;  %v2214_v16 = vld [vmem:[#allocation16 + $0x500] sm:$0xff]  ;;  %v2211_v18 = vld [vmem:[#allocation16 + $0x4e8] sm:$0xff] }
 0x230   :  { %1974 = vmatprep.subr.mxu0 %v1559_v19  ;;  %v3497_v29 = vpop.f32.mrf.mxu1  ;;  %v1276_v33 = vpop.f32.mrf.mxu0  ;;  %2040 = vmatpush2.msra.mxu1 %v1698_v25  ;;  %v2070_v17 = vld [vmem:[#allocation16 + $0x80] sm:$0xff]  ;;  %v2067_v19 = vld [vmem:[#allocation16 + $0x68] sm:$0xff] }
 0x231   :  { %1975 = vmatpush2.msra.mxu0 %v1558_v22  ;;  %v1277_v36 = vadd.f32 %v1276_v33, %v885_v28  ;;  %2041 = vmatprep.subr.mxu1 %v1695_v31  ;;  %v2210_v20 = vld [vmem:[#allocation16 + $0x4e0] sm:$0xff]  ;;  %v2207_v25 = vld [vmem:[#allocation16 + $0x4c8] sm:$0xff] }
 0x232   :  { %1977 = vmatmul.mubr.f32.vlgmr.msra.gmra.mxu0 %v3467_v52  ;;  %2332 = vmatprep.subr.mxu0 %v2115_v56  ;;  %v1347_v39 = vpop.f32.mrf.mxu1  ;;  %v2102_v52 = vld [vmem:[#allocation16 + $0x180] sm:$0xff]  ;;  %v2063_v28 = vld [vmem:[#allocation16 + $0x48] sm:$0xff] }
 0x233   :  { %2333 = vmatpush1.msra.mxu0 %v2114_v32  ;;  %2042 = vmatpush2.msra.mxu1 %v1694_v34  ;;  %v3500_v47 = vadd.f32 %v1347_v39, %v1277_v36  ;;  %v2066_v22 = vld [vmem:[#allocation16 + $0x60] sm:$0xff]  ;;  %v2203_v32 = vld [vmem:[#allocation16 + $0x4a8] sm:$0xff] }
 0x234   :  { %2334 = vmatprep.subr.mxu0 %v2111_v35  ;;  %2043 = vmatprep.subr.mxu1 %v1691_v37  ;;  %v2206_v56 = vld [vmem:[#allocation16 + $0x4c0] sm:$0xff]  ;;  %v2059_v33 = vld [vmem:[#allocation16 + $0x28] sm:$0xff] }
 0x235   :  { %2335 = vmatpush1.msra.mxu0 %v2110_v38  ;;  %2044 = vmatpush2.msra.mxu1 %v1690_v40  ;;  %v2062_v31 = vld [vmem:[#allocation16 + $0x40] sm:$0xff]  ;;  %v2199_v36 = vld [vmem:[#allocation16 + $0x488] sm:$0xff] }
 0x236   :  { %2336 = vmatprep.subr.mxu0 %v2107_v42  ;;  %2045 = vmatprep.subr.mxu1 %v1687_v43  ;;  %v2202_v34 = vld [vmem:[#allocation16 + $0x4a0] sm:$0xff]  ;;  %v2055_v37 = vld [vmem:[#allocation16 + $0x8] sm:$0xff] }
 0x237   :  { %2337 = vmatpush1.msra.mxu0 %v2106_v44  ;;  %2046 = vmatpush2.msra.mxu1 %v1686_v45  ;;  %v2058_v35 = vld [vmem:[#allocation16 + $0x20] sm:$0xff]  ;;  %v2195_v40 = vld [vmem:[#allocation16 + $0x468] sm:$0xff] }
 0x238   :  { %2338 = vmatprep.subr.mxu0 %v2103_v46  ;;  %2048 = vmatmul.mubr.f32.vlgmr.msra.gmra.mxu1 %v3488_v21  ;;  %v2231_v21 = vld [vmem:[#allocation16 + $0x588] sm:$0xff]  ;;  %v2198_v38 = vld [vmem:[#allocation16 + $0x480] sm:$0xff] }
 0x239   :  { %2339 = vmatpush1.msra.mxu0 %v2102_v52  ;;  %2396 = vmatprep.mubr.f32.mxu0 %v3500_v47  ;;  %v2054_v39 = vld [vmem:[#allocation16] sm:$0xff]  ;;  %v2179_v42 = vld [vmem:[#allocation16 + $0x3e8] sm:$0xff] }
 0x23a   :  { %2403 = vmatprep.subr.mxu1 %v2243_v48  ;;  %2340 = vmatprep.subr.mxu0 %v2099_v49  ;;  %v2194_v43 = vld [vmem:[#allocation16 + $0x460] sm:$0xff]  ;;  %v2191_v45 = vld [vmem:[#allocation16 + $0x448] sm:$0xff] }
 0x23b   :  { %2404 = vmatpush1.msra.mxu1 %v2242_v50  ;;  %2341 = vmatpush1.msra.mxu0 %v2098_v51  ;;  %v2178_v44 = vld [vmem:[#allocation16 + $0x3e0] sm:$0xff]  ;;  %v2175_v46 = vld [vmem:[#allocation16 + $0x3c8] sm:$0xff] }
 0x23c   :  { %2405 = vmatprep.subr.mxu1 %v2239_v53  ;;  %2342 = vmatprep.subr.mxu0 %v2095_v55  ;;  %v2190_v52 = vld [vmem:[#allocation16 + $0x440] sm:$0xff]  ;;  %v2187_v49 = vld [vmem:[#allocation16 + $0x428] sm:$0xff] }
 0x23d   :  { %2406 = vmatpush1.msra.mxu1 %v2238_v58  ;;  %2343 = vmatpush1.msra.mxu0 %v2094_v59  ;;  %v2174_v48 = vld [vmem:[#allocation16 + $0x3c0] sm:$0xff]  ;;  %v2171_v50 = vld [vmem:[#allocation16 + $0x3a8] sm:$0xff] }
 0x23e   :  { %2407 = vmatprep.subr.mxu1 %v2235_v60  ;;  %2344 = vmatprep.subr.mxu0 %v2091_v61  ;;  %v2186_v51 = vld [vmem:[#allocation16 + $0x420] sm:$0xff]  ;;  %v2183_v55 = vld [vmem:[#allocation16 + $0x408] sm:$0xff] }
 0x23f   :  { %2408 = vmatpush1.msra.mxu1 %v2234_v63  ;;  %2345 = vmatpush1.msra.mxu0 %v2090_v8  ;;  %v2170_v53 = vld [vmem:[#allocation16 + $0x3a0] sm:$0xff]  ;;  %v2167_v58 = vld [vmem:[#allocation16 + $0x388] sm:$0xff] }
 0x240   :  { %2409 = vmatprep.subr.mxu1 %v2231_v21  ;;  %2346 = vmatprep.subr.mxu0 %v2087_v0  ;;  %v2182_v59 = vld [vmem:[#allocation16 + $0x400] sm:$0xff]  ;;  %v2307_v61 = vld [vmem:[#allocation16 + $0x7e8] sm:$0xff] }
 0x241   :  { %2410 = vmatpush1.msra.mxu1 %v2230_v1  ;;  %2347 = vmatpush1.msra.mxu0 %v2086_v11  ;;  %v2166_v60 = vld [vmem:[#allocation16 + $0x380] sm:$0xff]  ;;  %v2163_v63 = vld [vmem:[#allocation16 + $0x368] sm:$0xff] }
 0x242   :  { %2411 = vmatprep.subr.mxu1 %v2227_v2  ;;  %2348 = vmatprep.subr.mxu0 %v2083_v62  ;;  %v2306_v8 = vld [vmem:[#allocation16 + $0x7e0] sm:$0xff]  ;;  %v2303_v0 = vld [vmem:[#allocation16 + $0x7c8] sm:$0xff] }
 0x243   :  { %2412 = vmatpush1.msra.mxu1 %v2226_v3  ;;  %2349 = vmatpush1.msra.mxu0 %v2082_v4  ;;  %v2162_v21 = vld [vmem:[#allocation16 + $0x360] sm:$0xff]  ;;  %v2159_v1 = vld [vmem:[#allocation16 + $0x348] sm:$0xff] }
 0x244   :  { %2413 = vmatprep.subr.mxu1 %v2223_v5  ;;  %2350 = vmatprep.subr.mxu0 %v2079_v6  ;;  %v2302_v11 = vld [vmem:[#allocation16 + $0x7c0] sm:$0xff]  ;;  %v2299_v62 = vld [vmem:[#allocation16 + $0x7a8] sm:$0xff] }
 0x245   :  { %2414 = vmatpush1.msra.mxu1 %v2222_v7  ;;  %2351 = vmatpush1.msra.mxu0 %v2078_v9  ;;  %v2158_v2 = vld [vmem:[#allocation16 + $0x340] sm:$0xff]  ;;  %v2155_v3 = vld [vmem:[#allocation16 + $0x328] sm:$0xff] }
 0x246   :  { %2415 = vmatprep.subr.mxu1 %v2219_v10  ;;  %2352 = vmatprep.subr.mxu0 %v2075_v12  ;;  %v2298_v4 = vld [vmem:[#allocation16 + $0x7a0] sm:$0xff]  ;;  %v2295_v6 = vld [vmem:[#allocation16 + $0x788] sm:$0xff] }
 0x247   :  { %2416 = vmatpush1.msra.mxu1 %v2218_v13  ;;  %2353 = vmatpush1.msra.mxu0 %v2074_v14  ;;  %v2154_v5 = vld [vmem:[#allocation16 + $0x320] sm:$0xff]  ;;  %v2151_v7 = vld [vmem:[#allocation16 + $0x308] sm:$0xff] }
 0x248   :  { %2417 = vmatprep.subr.mxu1 %v2215_v27  ;;  %2354 = vmatprep.subr.mxu0 %v2071_v15  ;;  %v2294_v9 = vld [vmem:[#allocation16 + $0x780] sm:$0xff]  ;;  %v2291_v12 = vld [vmem:[#allocation16 + $0x768] sm:$0xff] }
 0x249   :  { %2418 = vmatpush1.msra.mxu1 %v2214_v16  ;;  %2355 = vmatpush1.msra.mxu0 %v2070_v17  ;;  %v2150_v10 = vld [vmem:[#allocation16 + $0x300] sm:$0xff]  ;;  %v2147_v13 = vld [vmem:[#allocation16 + $0x2e8] sm:$0xff] }
 0x24a   :  { %2419 = vmatprep.subr.mxu1 %v2211_v18  ;;  %2356 = vmatprep.subr.mxu0 %v2067_v19  ;;  %v2290_v14 = vld [vmem:[#allocation16 + $0x760] sm:$0xff]  ;;  %v2287_v15 = vld [vmem:[#allocation16 + $0x748] sm:$0xff] }
 0x24b   :  { %2420 = vmatpush1.msra.mxu1 %v2210_v20  ;;  %2357 = vmatpush1.msra.mxu0 %v2066_v22  ;;  %v2146_v27 = vld [vmem:[#allocation16 + $0x2e0] sm:$0xff]  ;;  %v2143_v16 = vld [vmem:[#allocation16 + $0x2c8] sm:$0xff] }
 0x24c   :  { %2421 = vmatprep.subr.mxu1 %v2207_v25  ;;  %2358 = vmatprep.subr.mxu0 %v2063_v28  ;;  %v2286_v17 = vld [vmem:[#allocation16 + $0x740] sm:$0xff]  ;;  %v2283_v19 = vld [vmem:[#allocation16 + $0x728] sm:$0xff]  ;;  %v880_v25 = vsub.s32 4, %v3428_v41 }
 0x24d   :  { %2422 = vmatpush1.msra.mxu1 %v2206_v56  ;;  %2359 = vmatpush1.msra.mxu0 %v2062_v31  ;;  %v2142_v18 = vld [vmem:[#allocation16 + $0x2c0] sm:$0xff]  ;;  %v2139_v20 = vld [vmem:[#allocation16 + $0x2a8] sm:$0xff] }
 0x24e   :  { %2423 = vmatprep.subr.mxu1 %v2203_v32  ;;  %2360 = vmatprep.subr.mxu0 %v2059_v33  ;;  %v2282_v22 = vld [vmem:[#allocation16 + $0x720] sm:$0xff]  ;;  %v2279_v56 = vld [vmem:[#allocation16 + $0x708] sm:$0xff] }
 0x24f   :  { %2424 = vmatpush1.msra.mxu1 %v2202_v34  ;;  %2361 = vmatpush1.msra.mxu0 %v2058_v35  ;;  %v2138_v28 = vld [vmem:[#allocation16 + $0x2a0] sm:$0xff]  ;;  %v2135_v31 = vld [vmem:[#allocation16 + $0x288] sm:$0xff] }
 0x250   :  { %2425 = vmatprep.subr.mxu1 %v2199_v36  ;;  %2362 = vmatprep.subr.mxu0 %v2055_v37  ;;  %v2278_v32 = vld [vmem:[#allocation16 + $0x700] sm:$0xff]  ;;  %v2275_v34 = vld [vmem:[#allocation16 + $0x6e8] sm:$0xff]  ;;  %v881_v37 = vrot.slane %v3494_v26, %v880_v25  ;;  %v2240_v25 = vld [vmem:[#allocation16 + $0x5d0] sm:$0xff] }
 0x251   :  { %2426 = vmatpush1.msra.mxu1 %v2198_v38  ;;  %2363 = vmatpush1.msra.mxu0 %v2054_v39  ;;  %v2134_v33 = vld [vmem:[#allocation16 + $0x280] sm:$0xff]  ;;  %v2131_v35 = vld [vmem:[#allocation16 + $0x268] sm:$0xff] }
 0x252   :  { %2427 = vmatprep.subr.mxu1 %v2195_v40  ;;  %2364 = vmatprep.subr.mxu0 %v2179_v42  ;;  %v2274_v36 = vld [vmem:[#allocation16 + $0x6e0] sm:$0xff]  ;;  %v2271_v39 = vld [vmem:[#allocation16 + $0x6c8] sm:$0xff] }
 0x253   :  { %2428 = vmatpush1.msra.mxu1 %v2194_v43  ;;  %2365 = vmatpush2.msra.mxu0 %v2178_v44  ;;  %v2130_v38 = vld [vmem:[#allocation16 + $0x260] sm:$0xff]  ;;  %v2127_v40 = vld [vmem:[#allocation16 + $0x248] sm:$0xff] }
 0x254   :  { %2429 = vmatprep.subr.mxu1 %v2191_v45  ;;  %2366 = vmatprep.subr.mxu0 %v2175_v46  ;;  %v2270_v42 = vld [vmem:[#allocation16 + $0x6c0] sm:$0xff]  ;;  %v2267_v44 = vld [vmem:[#allocation16 + $0x6a8] sm:$0xff] }
 0x255   :  { %2430 = vmatpush1.msra.mxu1 %v2190_v52  ;;  %2367 = vmatpush2.msra.mxu0 %v2174_v48  ;;  %v2126_v43 = vld [vmem:[#allocation16 + $0x240] sm:$0xff]  ;;  %v2123_v45 = vld [vmem:[#allocation16 + $0x228] sm:$0xff]  ;;  %v892_v52 = vsub.s32 7, %v3428_v41  ;;  %v1275_v48 = vadd.f32 %v3492_v23, %v881_v37  ;;  %v2088_v37 = vld [vmem:[#allocation16 + $0x110] sm:$0xff] }
 0x256   :  { %2431 = vmatprep.subr.mxu1 %v2187_v49  ;;  %2368 = vmatprep.subr.mxu0 %v2171_v50  ;;  %v2266_v46 = vld [vmem:[#allocation16 + $0x6a0] sm:$0xff]  ;;  %v2263_v50 = vld [vmem:[#allocation16 + $0x688] sm:$0xff] }
 0x257   :  { %2432 = vmatpush1.msra.mxu1 %v2186_v51  ;;  %2369 = vmatpush2.msra.mxu0 %v2170_v53  ;;  %v2122_v49 = vld [vmem:[#allocation16 + $0x220] sm:$0xff]  ;;  %v2119_v51 = vld [vmem:[#allocation16 + $0x208] sm:$0xff]  ;;  %v3511_v23 = vadd.f32 %v3497_v29, %v1275_v48  ;;  %v2077_v48 = vld [vmem:[#allocation16 + $0xb8] sm:$0xff] }
 0x258   :  { %2433 = vmatprep.subr.mxu1 %v2183_v55  ;;  %2370 = vmatprep.subr.mxu0 %v2167_v58  ;;  %v2262_v53 = vld [vmem:[#allocation16 + $0x680] sm:$0xff]  ;;  %v888_v55 = vsub.s32 6, %v3428_v41 }
 0x259   :  { %2434 = vmatpush1.msra.mxu1 %v2182_v59  ;;  %2371 = vmatpush2.msra.mxu0 %v2166_v60  ;;  %v2118_v58 = vld [vmem:[#allocation16 + $0x200] sm:$0xff]  ;;  %v2259_v59 = vld [vmem:[#allocation16 + $0x668] sm:$0xff] }
 0x25a   :  { %2435 = vmatprep.subr.mxu1 %v2307_v61  ;;  %2372 = vmatprep.subr.mxu0 %v2163_v63  ;;  %v2258_v60 = vld [vmem:[#allocation16 + $0x660] sm:$0xff]  ;;  %v893_v61 = vrot.slane %v3494_v26, %v892_v52  ;;  %v2221_v52 = vld [vmem:[#allocation16 + $0x538] sm:$0xff] }
 0x25b   :  { %2436 = vmatpush2.msra.mxu1 %v2306_v8  ;;  %2373 = vmatpush2.msra.mxu0 %v2162_v21  ;;  %v2117_v8 = vld [vmem:[#allocation16 + $0x1f8] sm:$0xff]  ;;  %v2255_v21 = vld [vmem:[#allocation16 + $0x648] sm:$0xff] }
 0x25c   :  { %2437 = vmatprep.subr.mxu1 %v2303_v0  ;;  %2374 = vmatprep.subr.mxu0 %v2159_v1  ;;  %v889_v0 = vrot.slane %v3494_v26, %v888_v55  ;;  %v2216_v55 = vld [vmem:[#allocation16 + $0x510] sm:$0xff] }
 0x25d   :  { %2438 = vmatpush2.msra.mxu1 %v2302_v11  ;;  %2375 = vmatpush2.msra.mxu0 %v2158_v2  ;;  %v2116_v11 = vld [vmem:[#allocation16 + $0x1f0] sm:$0xff] }
 0x25e   :  { %2439 = vmatprep.subr.mxu1 %v2299_v62  ;;  %2376 = vmatprep.subr.mxu0 %v2155_v3  ;;  %v2254_v62 = vld [vmem:[#allocation16 + $0x640] sm:$0xff]  ;;  %v2113_v3 = vld [vmem:[#allocation16 + $0x1d8] sm:$0xff] }
 0x25f   :  { %2440 = vmatpush2.msra.mxu1 %v2298_v4  ;;  %2377 = vmatpush2.msra.mxu0 %v2154_v5  ;;  %v2251_v4 = vld [vmem:[#allocation16 + $0x628] sm:$0xff]  ;;  %v2112_v5 = vld [vmem:[#allocation16 + $0x1d0] sm:$0xff] }
 0x260   :  { %2441 = vmatprep.subr.mxu1 %v2295_v6  ;;  %2378 = vmatprep.subr.mxu0 %v2151_v7  ;;  %v2250_v6 = vld [vmem:[#allocation16 + $0x620] sm:$0xff]  ;;  %v2109_v7 = vld [vmem:[#allocation16 + $0x1b8] sm:$0xff] }
 0x261   :  { %2442 = vmatpush2.msra.mxu1 %v2294_v9  ;;  %2379 = vmatpush2.msra.mxu0 %v2150_v10  ;;  %v2247_v10 = vld [vmem:[#allocation16 + $0x608] sm:$0xff] }
 0x262   :  { %2443 = vmatprep.subr.mxu1 %v2291_v12  ;;  %2380 = vmatprep.subr.mxu0 %v2147_v13  ;;  %v2108_v12 = vld [vmem:[#allocation16 + $0x1b0] sm:$0xff] }
 0x263   :  { %2444 = vmatpush2.msra.mxu1 %v2290_v14  ;;  %2381 = vmatpush2.msra.mxu0 %v2146_v27  ;;  %v2246_v14 = vld [vmem:[#allocation16 + $0x600] sm:$0xff]  ;;  %v2105_v27 = vld [vmem:[#allocation16 + $0x198] sm:$0xff] }
 0x264   :  { %2445 = vmatprep.subr.mxu1 %v2287_v15  ;;  %2382 = vmatprep.subr.mxu0 %v2143_v16  ;;  %v2104_v15 = vld [vmem:[#allocation16 + $0x190] sm:$0xff]  ;;  %v2245_v16 = vld [vmem:[#allocation16 + $0x5f8] sm:$0xff] }
 0x265   :  { %2446 = vmatpush2.msra.mxu1 %v2286_v17  ;;  %2383 = vmatpush2.msra.mxu0 %v2142_v18  ;;  %v2101_v17 = vld [vmem:[#allocation16 + $0x178] sm:$0xff]  ;;  %v2244_v18 = vld [vmem:[#allocation16 + $0x5f0] sm:$0xff] }
 0x266   :  { %2447 = vmatprep.subr.mxu1 %v2283_v19  ;;  %2384 = vmatprep.subr.mxu0 %v2139_v20  ;;  %v2100_v19 = vld [vmem:[#allocation16 + $0x170] sm:$0xff]  ;;  %v2241_v20 = vld [vmem:[#allocation16 + $0x5d8] sm:$0xff] }
 0x267   :  { %2448 = vmatpush2.msra.mxu1 %v2282_v22  ;;  %2385 = vmatpush2.msra.mxu0 %v2138_v28  ;;  %v2097_v22 = vld [vmem:[#allocation16 + $0x158] sm:$0xff]  ;;  %v2096_v28 = vld [vmem:[#allocation16 + $0x150] sm:$0xff] }
 0x268   :  { %2449 = vmatprep.subr.mxu1 %v2279_v56  ;;  %2386 = vmatprep.subr.mxu0 %v2135_v31  ;;  %v2237_v56 = vld [vmem:[#allocation16 + $0x5b8] sm:$0xff] }
 0x269   :  { %2450 = vmatpush2.msra.mxu1 %v2278_v32  ;;  %2387 = vmatpush2.msra.mxu0 %v2134_v33  ;;  %v2093_v31 = vld [vmem:[#allocation16 + $0x138] sm:$0xff]  ;;  %v2236_v32 = vld [vmem:[#allocation16 + $0x5b0] sm:$0xff] }
 0x26a   :  { %2451 = vmatprep.subr.mxu1 %v2275_v34  ;;  %2388 = vmatprep.subr.mxu0 %v2131_v35  ;;  %v2092_v33 = vld [vmem:[#allocation16 + $0x130] sm:$0xff]  ;;  %v2233_v34 = vld [vmem:[#allocation16 + $0x598] sm:$0xff] }
 0x26b   :  { %2452 = vmatpush2.msra.mxu1 %v2274_v36  ;;  %2389 = vmatpush2.msra.mxu0 %v2130_v38  ;;  %v2089_v35 = vld [vmem:[#allocation16 + $0x118] sm:$0xff]  ;;  %v2232_v36 = vld [vmem:[#allocation16 + $0x590] sm:$0xff] }
 0x26c   :  { %2453 = vmatprep.subr.mxu1 %v2271_v39  ;;  %2390 = vmatprep.subr.mxu0 %v2127_v40  ;;  %v2229_v38 = vld [vmem:[#allocation16 + $0x578] sm:$0xff]  ;;  %v2228_v40 = vld [vmem:[#allocation16 + $0x570] sm:$0xff] }
 0x26d   :  { %2454 = vmatpush2.msra.mxu1 %v2270_v42  ;;  %2391 = vmatpush2.msra.mxu0 %v2126_v43  ;;  %v2085_v39 = vld [vmem:[#allocation16 + $0xf8] sm:$0xff]  ;;  %v2084_v42 = vld [vmem:[#allocation16 + $0xf0] sm:$0xff] }
 0x26e   :  { %2455 = vmatprep.subr.mxu1 %v2267_v44  ;;  %2392 = vmatprep.subr.mxu0 %v2123_v45  ;;  %v2225_v43 = vld [vmem:[#allocation16 + $0x558] sm:$0xff]  ;;  %v2224_v45 = vld [vmem:[#allocation16 + $0x550] sm:$0xff] }
 0x26f   :  { %2456 = vmatpush2.msra.mxu1 %v2266_v46  ;;  %2393 = vmatpush2.msra.mxu0 %v2122_v49  ;;  %v2081_v44 = vld [vmem:[#allocation16 + $0xd8] sm:$0xff]  ;;  %v2080_v46 = vld [vmem:[#allocation16 + $0xd0] sm:$0xff] }
 0x270   :  { %2457 = vmatprep.subr.mxu1 %v2263_v50  ;;  %2394 = vmatprep.subr.mxu0 %v2119_v51  ;;  %v1416_v63 = vpop.f32.mrf.mxu0  ;;  %v2220_v49 = vld [vmem:[#allocation16 + $0x530] sm:$0xff]  ;;  %v2217_v51 = vld [vmem:[#allocation16 + $0x518] sm:$0xff] }
 0x271   :  { %2458 = vmatpush2.msra.mxu1 %v2262_v53  ;;  %2395 = vmatpush2.msra.mxu0 %v2118_v58  ;;  %v1487_v1 = vpop.f32.mrf.mxu1  ;;  %v1417_v9 = vadd.f32 %v1416_v63, %v889_v0  ;;  %v2076_v50 = vld [vmem:[#allocation16 + $0xb0] sm:$0xff]  ;;  %v2073_v53 = vld [vmem:[#allocation16 + $0x98] sm:$0xff] }
 0x272   :  { %2459 = vmatprep.subr.mxu1 %v2259_v59  ;;  %2397 = vmatmul.mubr.f32.vlgmr.msra.gmra.mxu0 %v3511_v23  ;;  %v1418_v2 = vpop.f32.mrf.mxu0  ;;  %v2072_v58 = vld [vmem:[#allocation16 + $0x90] sm:$0xff]  ;;  %v2213_v59 = vld [vmem:[#allocation16 + $0x4f8] sm:$0xff] }
 0x273   :  { %2460 = vmatpush2.msra.mxu1 %v2258_v60  ;;  %2474 = vmatprep.subr.mxu0 %v2117_v8  ;;  %v1419_v29 = vadd.f32 %v1418_v2, %v893_v61  ;;  %v1489_v26 = vpop.f32.mrf.mxu1  ;;  %v2069_v60 = vld [vmem:[#allocation16 + $0x78] sm:$0xff]  ;;  %v2212_v61 = vld [vmem:[#allocation16 + $0x4f0] sm:$0xff] }
 0x274   :  { %2461 = vmatprep.subr.mxu1 %v2255_v21  ;;  %2475 = vmatpush1.msra.mxu0 %v2116_v11  ;;  %v2068_v63 = vld [vmem:[#allocation16 + $0x70] sm:$0xff]  ;;  %v2209_v8 = vld [vmem:[#allocation16 + $0x4d8] sm:$0xff] }
 0x275   :  { %2538 = vmatprep.mubr.f32.mxu0 %v3500_v47  ;;  %2462 = vmatpush2.msra.mxu1 %v2254_v62  ;;  %v1490_v13 = vadd.f32 %v1489_v26, %v1419_v29  ;;  %v3516_v47 = vadd.f32 %v1487_v1, %v1417_v9  ;;  %v2065_v21 = vld [vmem:[#allocation16 + $0x58] sm:$0xff]  ;;  %v2208_v0 = vld [vmem:[#allocation16 + $0x4d0] sm:$0xff] }
 0x276   :  { %2476 = vmatprep.subr.mxu0 %v2113_v3  ;;  %2463 = vmatprep.subr.mxu1 %v2251_v4  ;;  %v2064_v1 = vld [vmem:[#allocation16 + $0x50] sm:$0xff]  ;;  %v2205_v11 = vld [vmem:[#allocation16 + $0x4b8] sm:$0xff] }
 0x277   :  { %2477 = vmatpush1.msra.mxu0 %v2112_v5  ;;  %2464 = vmatpush2.msra.mxu1 %v2250_v6  ;;  %v2061_v2 = vld [vmem:[#allocation16 + $0x38] sm:$0xff]  ;;  %v2204_v62 = vld [vmem:[#allocation16 + $0x4b0] sm:$0xff] }
 0x278   :  { %2478 = vmatprep.subr.mxu0 %v2109_v7  ;;  %2465 = vmatprep.subr.mxu1 %v2247_v10  ;;  %v2060_v3 = vld [vmem:[#allocation16 + $0x30] sm:$0xff]  ;;  %v2201_v29 = vld [vmem:[#allocation16 + $0x498] sm:$0xff] }
 0x279   :  { %2479 = vmatpush1.msra.mxu0 %v2108_v12  ;;  %2466 = vmatpush2.msra.mxu1 %v2246_v14  ;;  %v2057_v4 = vld [vmem:[#allocation16 + $0x18] sm:$0xff]  ;;  %v2200_v5 = vld [vmem:[#allocation16 + $0x490] sm:$0xff] }
 0x27a   :  { %2480 = vmatprep.subr.mxu0 %v2105_v27  ;;  %2467 = vmatprep.mubr.f32.mxu1 %v1490_v13  ;;  %v2056_v6 = vld [vmem:[#allocation16 + $0x10] sm:$0xff]  ;;  %v2197_v7 = vld [vmem:[#allocation16 + $0x478] sm:$0xff] }
 0x27b   :  { %2481 = vmatpush1.msra.mxu0 %v2104_v15  ;;  %2545 = vmatprep.subr.mxu1 %v2245_v16  ;;  %v2181_v9 = vld [vmem:[#allocation16 + $0x3f8] sm:$0xff]  ;;  %v2196_v26 = vld [vmem:[#allocation16 + $0x470] sm:$0xff] }
 0x27c   :  { %2468 = vmatmul.mubr.f32.vlgmr.msra.gmra.mxu1 %v3516_v47  ;;  %2482 = vmatprep.subr.mxu0 %v2101_v17  ;;  %v2180_v10 = vld [vmem:[#allocation16 + $0x3f0] sm:$0xff]  ;;  %v2193_v12 = vld [vmem:[#allocation16 + $0x458] sm:$0xff] }
 0x27d   :  { %2546 = vmatpush1.msra.mxu1 %v2244_v18  ;;  %2483 = vmatpush1.msra.mxu0 %v2100_v19  ;;  %v2192_v14 = vld [vmem:[#allocation16 + $0x450] sm:$0xff]  ;;  %v2189_v15 = vld [vmem:[#allocation16 + $0x438] sm:$0xff] }
 0x27e   :  { %2547 = vmatprep.subr.mxu1 %v2241_v20  ;;  %2609 = vmatprep.mubr.f32.mxu1 %v1490_v13  ;;  %v2177_v13 = vld [vmem:[#allocation16 + $0x3d8] sm:$0xff]  ;;  %v2176_v27 = vld [vmem:[#allocation16 + $0x3d0] sm:$0xff] }
 0x27f   :  { %2484 = vmatprep.subr.mxu0 %v2097_v22  ;;  %2548 = vmatpush1.msra.mxu1 %v2240_v25  ;;  %v2173_v16 = vld [vmem:[#allocation16 + $0x3b8] sm:$0xff]  ;;  %v2188_v17 = vld [vmem:[#allocation16 + $0x430] sm:$0xff] }
 0x280   :  { %2485 = vmatpush1.msra.mxu0 %v2096_v28  ;;  %2549 = vmatprep.subr.mxu1 %v2237_v56  ;;  %v2172_v18 = vld [vmem:[#allocation16 + $0x3b0] sm:$0xff]  ;;  %v2185_v19 = vld [vmem:[#allocation16 + $0x418] sm:$0xff] }
 0x281   :  { %2486 = vmatprep.subr.mxu0 %v2093_v31  ;;  %2550 = vmatpush1.msra.mxu1 %v2236_v32  ;;  %v2169_v20 = vld [vmem:[#allocation16 + $0x398] sm:$0xff]  ;;  %v2184_v22 = vld [vmem:[#allocation16 + $0x410] sm:$0xff] }
 0x282   :  { %2487 = vmatpush1.msra.mxu0 %v2092_v33  ;;  %2551 = vmatprep.subr.mxu1 %v2233_v34  ;;  %v2168_v25 = vld [vmem:[#allocation16 + $0x390] sm:$0xff]  ;;  %v2309_v28 = vld [vmem:[#allocation16 + $0x7f8] sm:$0xff] }
 0x283   :  { %2488 = vmatprep.subr.mxu0 %v2089_v35  ;;  %2552 = vmatpush1.msra.mxu1 %v2232_v36  ;;  %v2165_v56 = vld [vmem:[#allocation16 + $0x378] sm:$0xff]  ;;  %v2308_v31 = vld [vmem:[#allocation16 + $0x7f0] sm:$0xff] }
 0x284   :  { %2489 = vmatpush1.msra.mxu0 %v2088_v37  ;;  %2553 = vmatprep.subr.mxu1 %v2229_v38  ;;  %v2164_v32 = vld [vmem:[#allocation16 + $0x370] sm:$0xff]  ;;  %v2305_v33 = vld [vmem:[#allocation16 + $0x7d8] sm:$0xff] }
 0x285   :  { %2490 = vmatprep.subr.mxu0 %v2085_v39  ;;  %2554 = vmatpush1.msra.mxu1 %v2228_v40  ;;  %v2161_v34 = vld [vmem:[#allocation16 + $0x358] sm:$0xff]  ;;  %v2304_v35 = vld [vmem:[#allocation16 + $0x7d0] sm:$0xff] }
 0x286   :  { %2491 = vmatpush1.msra.mxu0 %v2084_v42  ;;  %2555 = vmatprep.subr.mxu1 %v2225_v43  ;;  %v2160_v36 = vld [vmem:[#allocation16 + $0x350] sm:$0xff]  ;;  %v2301_v37 = vld [vmem:[#allocation16 + $0x7b8] sm:$0xff] }
 0x287   :  { %2492 = vmatprep.subr.mxu0 %v2081_v44  ;;  %2556 = vmatpush1.msra.mxu1 %v2224_v45  ;;  %v2157_v38 = vld [vmem:[#allocation16 + $0x338] sm:$0xff]  ;;  %v2300_v39 = vld [vmem:[#allocation16 + $0x7b0] sm:$0xff] }
 0x288   :  { %2493 = vmatpush1.msra.mxu0 %v2080_v46  ;;  %2557 = vmatprep.subr.mxu1 %v2221_v52  ;;  %v2156_v40 = vld [vmem:[#allocation16 + $0x330] sm:$0xff]  ;;  %v2297_v42 = vld [vmem:[#allocation16 + $0x798] sm:$0xff] }
 0x289   :  { %2494 = vmatprep.subr.mxu0 %v2077_v48  ;;  %2558 = vmatpush1.msra.mxu1 %v2220_v49  ;;  %v2153_v43 = vld [vmem:[#allocation16 + $0x318] sm:$0xff]  ;;  %v2296_v44 = vld [vmem:[#allocation16 + $0x790] sm:$0xff] }
 0x28a   :  { %2495 = vmatpush1.msra.mxu0 %v2076_v50  ;;  %2559 = vmatprep.subr.mxu1 %v2217_v51  ;;  %v2152_v45 = vld [vmem:[#allocation16 + $0x310] sm:$0xff]  ;;  %v2293_v46 = vld [vmem:[#allocation16 + $0x778] sm:$0xff] }
 0x28b   :  { %2496 = vmatprep.subr.mxu0 %v2073_v53  ;;  %2560 = vmatpush1.msra.mxu1 %v2216_v55  ;;  %v2149_v52 = vld [vmem:[#allocation16 + $0x2f8] sm:$0xff]  ;;  %v2292_v48 = vld [vmem:[#allocation16 + $0x770] sm:$0xff] }
 0x28c   :  { %2497 = vmatpush1.msra.mxu0 %v2072_v58  ;;  %2561 = vmatprep.subr.mxu1 %v2213_v59  ;;  %v2148_v49 = vld [vmem:[#allocation16 + $0x2f0] sm:$0xff]  ;;  %v2289_v50 = vld [vmem:[#allocation16 + $0x758] sm:$0xff] }
 0x28d   :  { %2498 = vmatprep.subr.mxu0 %v2069_v60  ;;  %2562 = vmatpush1.msra.mxu1 %v2212_v61  ;;  %v2145_v51 = vld [vmem:[#allocation16 + $0x2d8] sm:$0xff]  ;;  %v2288_v53 = vld [vmem:[#allocation16 + $0x750] sm:$0xff] }
 0x28e   :  { %2499 = vmatpush1.msra.mxu0 %v2068_v63  ;;  %2563 = vmatprep.subr.mxu1 %v2209_v8  ;;  %v2144_v55 = vld [vmem:[#allocation16 + $0x2d0] sm:$0xff]  ;;  %v2285_v58 = vld [vmem:[#allocation16 + $0x738] sm:$0xff] }
 0x28f   :  { %2500 = vmatprep.subr.mxu0 %v2065_v21  ;;  %2564 = vmatpush1.msra.mxu1 %v2208_v0  ;;  %v2141_v59 = vld [vmem:[#allocation16 + $0x2b8] sm:$0xff]  ;;  %v2284_v60 = vld [vmem:[#allocation16 + $0x730] sm:$0xff] }
 0x290   :  { %2501 = vmatpush1.msra.mxu0 %v2064_v1  ;;  %2565 = vmatprep.subr.mxu1 %v2205_v11  ;;  %v2140_v61 = vld [vmem:[#allocation16 + $0x2b0] sm:$0xff]  ;;  %v2281_v63 = vld [vmem:[#allocation16 + $0x718] sm:$0xff] }
 0x291   :  { %2502 = vmatprep.subr.mxu0 %v2061_v2  ;;  %2566 = vmatpush1.msra.mxu1 %v2204_v62  ;;  %v2137_v8 = vld [vmem:[#allocation16 + $0x298] sm:$0xff]  ;;  %v2280_v21 = vld [vmem:[#allocation16 + $0x710] sm:$0xff] }
 0x292   :  { %2503 = vmatpush1.msra.mxu0 %v2060_v3  ;;  %2567 = vmatprep.subr.mxu1 %v2201_v29  ;;  %v2136_v0 = vld [vmem:[#allocation16 + $0x290] sm:$0xff]  ;;  %v2277_v1 = vld [vmem:[#allocation16 + $0x6f8] sm:$0xff] }
 0x293   :  { %2504 = vmatprep.subr.mxu0 %v2057_v4  ;;  %2568 = vmatpush1.msra.mxu1 %v2200_v5  ;;  %v2133_v11 = vld [vmem:[#allocation16 + $0x278] sm:$0xff]  ;;  %v2276_v2 = vld [vmem:[#allocation16 + $0x6f0] sm:$0xff] }
 0x294   :  { %2505 = vmatpush1.msra.mxu0 %v2056_v6  ;;  %2569 = vmatprep.subr.mxu1 %v2197_v7  ;;  %v2132_v62 = vld [vmem:[#allocation16 + $0x270] sm:$0xff]  ;;  %v2273_v3 = vld [vmem:[#allocation16 + $0x6d8] sm:$0xff] }
 0x295   :  { %2506 = vmatprep.subr.mxu0 %v2181_v9  ;;  %2570 = vmatpush1.msra.mxu1 %v2196_v26  ;;  %v2129_v29 = vld [vmem:[#allocation16 + $0x258] sm:$0xff]  ;;  %v2272_v4 = vld [vmem:[#allocation16 + $0x6d0] sm:$0xff] }
 0x296   :  { %2507 = vmatpush2.msra.mxu0 %v2180_v10  ;;  %2571 = vmatprep.subr.mxu1 %v2193_v12  ;;  %v2128_v5 = vld [vmem:[#allocation16 + $0x250] sm:$0xff]  ;;  %v2269_v6 = vld [vmem:[#allocation16 + $0x6b8] sm:$0xff] }
 0x297   :  { %2508 = vmatprep.subr.mxu0 %v2177_v13  ;;  %2572 = vmatpush1.msra.mxu1 %v2192_v14  ;;  %v2125_v7 = vld [vmem:[#allocation16 + $0x238] sm:$0xff]  ;;  %v2268_v9 = vld [vmem:[#allocation16 + $0x6b0] sm:$0xff] }
 0x298   :  { %2509 = vmatpush2.msra.mxu0 %v2176_v27  ;;  %2573 = vmatprep.subr.mxu1 %v2189_v15  ;;  %v2124_v26 = vld [vmem:[#allocation16 + $0x230] sm:$0xff]  ;;  %v2265_v10 = vld [vmem:[#allocation16 + $0x698] sm:$0xff] }
 0x299   :  { %2510 = vmatprep.subr.mxu0 %v2173_v16  ;;  %2574 = vmatpush1.msra.mxu1 %v2188_v17  ;;  %v2121_v12 = vld [vmem:[#allocation16 + $0x218] sm:$0xff]  ;;  %v2264_v13 = vld [vmem:[#allocation16 + $0x690] sm:$0xff] }
 0x29a   :  { %2511 = vmatpush2.msra.mxu0 %v2172_v18  ;;  %2575 = vmatprep.subr.mxu1 %v2185_v19  ;;  %v2120_v14 = vld [vmem:[#allocation16 + $0x210] sm:$0xff]  ;;  %v2261_v27 = vld [vmem:[#allocation16 + $0x678] sm:$0xff] }
 0x29b   :  { %2512 = vmatprep.subr.mxu0 %v2169_v20  ;;  %2576 = vmatpush1.msra.mxu1 %v2184_v22  ;;  %v2260_v15 = vld [vmem:[#allocation16 + $0x670] sm:$0xff]  ;;  %v2257_v16 = vld [vmem:[#allocation16 + $0x658] sm:$0xff] }
 0x29c   :  { %2513 = vmatpush2.msra.mxu0 %v2168_v25  ;;  %2577 = vmatprep.subr.mxu1 %v2309_v28  ;;  %v2256_v17 = vld [vmem:[#allocation16 + $0x650] sm:$0xff]  ;;  %v2253_v18 = vld [vmem:[#allocation16 + $0x638] sm:$0xff] }
 0x29d   :  { %2514 = vmatprep.subr.mxu0 %v2165_v56  ;;  %2578 = vmatpush2.msra.mxu1 %v2308_v31  ;;  %v2252_v19 = vld [vmem:[#allocation16 + $0x630] sm:$0xff]  ;;  %v2249_v20 = vld [vmem:[#allocation16 + $0x618] sm:$0xff] }
 0x29e   :  { %2515 = vmatpush2.msra.mxu0 %v2164_v32  ;;  %2579 = vmatprep.subr.mxu1 %v2305_v33  ;;  %v2248_v22 = vld [vmem:[#allocation16 + $0x610] sm:$0xff]  ;;  %v1748_v28 = vld [vmem:[#allocation14] sm:$0xf] }
 0x29f   :  { %2516 = vmatprep.subr.mxu0 %v2161_v34  ;;  %2580 = vmatpush2.msra.mxu1 %v2304_v35  ;;  %v1757_v31 = vrot.slane %v1748_v28, %v3461_v30 }
 0x2a0   :  { %2517 = vmatpush2.msra.mxu0 %v2160_v36  ;;  %2581 = vmatprep.subr.mxu1 %v2301_v37 }
 0x2a1   :  { %2518 = vmatprep.subr.mxu0 %v2157_v38  ;;  %2582 = vmatpush2.msra.mxu1 %v2300_v39  ;;  %v1761_v39 = vrot.slane %v1748_v28, %v3480_v57 }
 0x2a2   :  { %2519 = vmatpush2.msra.mxu0 %v2156_v40  ;;  %2583 = vmatprep.subr.mxu1 %v2297_v42  ;;  %v3528_v40 = vld [vmem:[#allocation2 + $0x10] sm:$0xff]  ;;  %v1765_v42 = vrot.slane %v1748_v28, %v3477_v54 }
 0x2a3   :  { %2520 = vmatprep.subr.mxu0 %v2153_v43  ;;  %2584 = vmatpush2.msra.mxu1 %v2296_v44  ;;  %v228_v43 = vcombine.high %v3528_v40, %v3528_v40 }
 0x2a4   :  { %2521 = vmatpush2.msra.mxu0 %v2152_v45  ;;  %2585 = vmatprep.subr.mxu1 %v2293_v46 }
 0x2a5   :  { %2522 = vmatprep.subr.mxu0 %v2149_v52  ;;  %2586 = vmatpush2.msra.mxu1 %v2292_v48  ;;  %v244_v48 = vsel %vm234_vm1, %v3528_v40, 0.0 }
 0x2a6   :  { %2523 = vmatpush2.msra.mxu0 %v2148_v49  ;;  %2587 = vmatprep.subr.mxu1 %v2289_v50  ;;  %v245_v49 = vsel %vm234_vm1, %v228_v43, 0.0 }
 0x2a7   :  { %2524 = vmatprep.subr.mxu0 %v2145_v51  ;;  %2588 = vmatpush2.msra.mxu1 %v2288_v53  ;;  %v3542_v51 = vld [vmem:[#allocation2 + $0x18] sm:$0xff] }
 0x2a8   :  { %2525 = vmatpush2.msra.mxu0 %v2144_v55  ;;  %2589 = vmatprep.subr.mxu1 %v2285_v58 }
 0x2a9   :  { %2526 = vmatprep.subr.mxu0 %v2141_v59  ;;  %2590 = vmatpush2.msra.mxu1 %v2284_v60 }
 0x2aa   :  { %2527 = vmatpush2.msra.mxu0 %v2140_v61  ;;  %2591 = vmatprep.subr.mxu1 %v2281_v63 }
 0x2ab   :  { %2528 = vmatprep.subr.mxu0 %v2137_v8  ;;  %2592 = vmatpush2.msra.mxu1 %v2280_v21  ;;  %v229_v8 = vcombine.high %v3542_v51, %v3542_v51  ;;  %v246_v21 = vadd.f32 %v245_v49, %v244_v48 }
 0x2ac   :  { %2529 = vmatpush2.msra.mxu0 %v2136_v0  ;;  %2593 = vmatprep.subr.mxu1 %v2277_v1 }
 0x2ad   :  { %2530 = vmatprep.subr.mxu0 %v2133_v11  ;;  %2594 = vmatpush2.msra.mxu1 %v2276_v2  ;;  %v247_v2 = vsel %vm234_vm1, %v3542_v51, 0.0 }
 0x2ae   :  { %2531 = vmatpush2.msra.mxu0 %v2132_v62  ;;  %2595 = vmatprep.subr.mxu1 %v2273_v3 }
 0x2af   :  { %2532 = vmatprep.subr.mxu0 %v2129_v29  ;;  %2596 = vmatpush2.msra.mxu1 %v2272_v4 }
 0x2b0   :  { %2533 = vmatpush2.msra.mxu0 %v2128_v5  ;;  %2597 = vmatprep.subr.mxu1 %v2269_v6 }
 0x2b1   :  { %2534 = vmatprep.subr.mxu0 %v2125_v7  ;;  %2598 = vmatpush2.msra.mxu1 %v2268_v9  ;;  %v1836_v25 = vpop.f32.mrf.mxu0  ;;  %v248_v9 = vadd.f32 %v247_v2, %v246_v21 }
 0x2b2   :  { %2535 = vmatpush2.msra.mxu0 %v2124_v26  ;;  %2599 = vmatprep.subr.mxu1 %v2265_v10  ;;  %v249_v10 = vsel %vm234_vm1, %v229_v8, 0.0 }
 0x2b3   :  { %2536 = vmatprep.subr.mxu0 %v2121_v12  ;;  %2600 = vmatpush2.msra.mxu1 %v2264_v13  ;;  %v1838_v32 = vpop.f32.mrf.mxu0  ;;  %v250_v13 = vadd.f32 %v249_v10, %v248_v9 }
 0x2b4   :  { %2537 = vmatpush2.msra.mxu0 %v2120_v14  ;;  %2601 = vmatprep.subr.mxu1 %v2261_v27  ;;  %v1839_v34 = vadd.f32 %v1838_v32, %v1757_v31  ;;  %v3567_v27 = vld [vmem:[#allocation2] sm:$0xff]  ;;  %v269_v31 = vmul.f32 %v3528_v40, %v3528_v40 }
 0x2b5   :  { %2539 = vmatmul.mubr.f32.vlgmr.msra.gmra.mxu0 %v3511_v23  ;;  %2602 = vmatpush2.msra.mxu1 %v2260_v15  ;;  %v1753_v23 = vrot.slane %v1748_v28, %v3456_v24  ;;  %v2310_v15 = vld [vmem:[#allocation17] sm:$0xf]  ;;  %v235_v28 = vsel %vm234_vm1, %v3567_v27, 0.0  ;;  %v267_v32 = vmul.f32 %v3567_v27, %v3567_v27 }
 0x2b6   :  { %2603 = vmatprep.subr.mxu1 %v2257_v16  ;;  %v1907_v56 = vpop.f32.mrf.mxu1  ;;  %v277_v43 = vcombine.high %v269_v31, %v269_v31 }
 0x2b7   :  { %2604 = vmatpush2.msra.mxu1 %v2256_v17  ;;  %v1837_v35 = vadd.f32 %v1836_v25, %v1753_v23  ;;  %v2319_v17 = vrot.slane %v2310_v15, %v3461_v30  ;;  %v3578_v23 = vld [vmem:[#allocation2 + $0x8] sm:$0xff] }
 0x2b8   :  { %2605 = vmatprep.subr.mxu1 %v2253_v18  ;;  %v1909_v33 = vpop.f32.mrf.mxu1  ;;  %v226_v18 = vcombine.high %v3567_v27, %v3567_v27  ;;  %v268_v21 = vmul.f32 %v3578_v23, %v3578_v23 }
 0x2b9   :  { %2606 = vmatpush2.msra.mxu1 %v2252_v19  ;;  %v3523_v36 = vadd.f32 %v1909_v33, %v1839_v34  ;;  %v3525_v37 = vadd.f32 %v1907_v56, %v1837_v35 }
 0x2ba   :  { %2607 = vmatprep.subr.mxu1 %v2249_v20  ;;  %v2315_v20 = vrot.slane %v2310_v15, %v3456_v24  ;;  %v236_v56 = vsel %vm234_vm1, %v226_v18, 0.0 }
 0x2bb   :  { %2608 = vmatpush2.msra.mxu1 %v2248_v22  ;;  %v2630_v44 = vmul.f32 %v3525_v37, %v3525_v37  ;;  %v2620_v52 = vsel %vm2618_vm0, %v3523_v36, 0.0  ;;  %v2619_v58 = vsel %vm2618_vm0, %v3525_v37, 0.0 }
 0x2bc   :  { %2610 = vmatmul.mubr.f32.vlgmr.msra.gmra.mxu1 %v3516_v47  ;;  %v2631_v47 = vmul.f32 %v3523_v36, %v3523_v36  ;;  %v2621_v61 = vadd.f32 %v2620_v52, %v2619_v58  ;;  %v2327_v52 = vrot.slane %v2310_v15, %v3477_v54 }
 0x2bd   :  { %v2634_v63 = vsel %vm2618_vm0, %v2630_v44, 0.0  ;;  %v227_v44 = vcombine.high %v3578_v23, %v3578_v23 }
 0x2be   :  { %v2635_v59 = vsel %vm2618_vm0, %v2631_v47, 0.0  ;;  %v2323_v47 = vrot.slane %v2310_v15, %v3480_v57 }
 0x2bf   :  { %v2636_v3 = vadd.f32 %v2635_v59, %v2634_v63  ;;  %v240_v8 = vsel %vm234_vm1, %v227_v44, 0.0 }
 0x2f2   :  { %v1978_v38 = vpop.f32.mrf.mxu0 }
 0x2f3   :  { %v1979_v46 = vadd.f32 %v1978_v38, %v1761_v39  ;;  %v237_v38 = vadd.f32 %v236_v56, %v235_v28 }
 0x2f4   :  { %v1980_v45 = vpop.f32.mrf.mxu0 }
 0x2f5   :  { %v1981_v53 = vadd.f32 %v1980_v45, %v1765_v42  ;;  %v238_v42 = vsel %vm234_vm1, %v3578_v23, 0.0  ;;  %v275_v45 = vcombine.high %v267_v32, %v267_v32 }
 0x2f6   :  { %v239_v49 = vadd.f32 %v238_v42, %v237_v38 }
 0x2f8   :  { %v2049_v50 = vpop.f32.mrf.mxu1 }
 0x2f9   :  { %v3544_v55 = vadd.f32 %v2049_v50, %v1979_v46  ;;  %v270_v50 = vmul.f32 %v3542_v51, %v3542_v51 }
 0x2fa   :  { %v2051_v60 = vpop.f32.mrf.mxu1 }
 0x2fb   :  { %v3552_v0 = vadd.f32 %v2051_v60, %v1981_v53  ;;  %v2622_v1 = vsel %vm2618_vm0, %v3544_v55, 0.0  ;;  %v2632_v11 = vmul.f32 %v3544_v55, %v3544_v55  ;;  %v292_v53 = vsel %vm234_vm1, %v269_v31, 0.0 }
 0x2fc   :  { %v2623_v62 = vadd.f32 %v2622_v1, %v2621_v61  ;;  %v293_v61 = vsel %vm234_vm1, %v277_v43, 0.0  ;;  %v283_v1 = vsel %vm234_vm1, %v267_v32, 0.0  ;;  %v295_v9 = vsel %vm234_vm1, %v270_v50, 0.0 }
 0x2fd   :  { %v2624_v29 = vsel %vm2618_vm0, %v3552_v0, 0.0  ;;  %v2633_v4 = vmul.f32 %v3552_v0, %v3552_v0  ;;  %v2637_v5 = vsel %vm2618_vm0, %v2632_v11, 0.0  ;;  %v284_v11 = vsel %vm234_vm1, %v275_v45, 0.0 }
 0x2fe   :  { %v2625_v6 = vadd.f32 %v2624_v29, %v2623_v62  ;;  %v2638_v7 = vadd.f32 %v2637_v5, %v2636_v3 }
 0x2ff   :  { %v2639_v26 = vsel %vm2618_vm0, %v2633_v4, 0.0 }
 0x300   :  { %2626 = vadd.xlane.f32.xlu0 %v2625_v6  ;;  %v2640_v12 = vadd.f32 %v2639_v26, %v2638_v7  ;;  %v278_v6 = vcombine.high %v270_v50, %v270_v50  ;;  %v294_v7 = vadd.f32 %v293_v61, %v292_v53 }
 0x302   :  { %2641 = vadd.xlane.f32.xlu1 %v2640_v12  ;;  %v296_v56 = vadd.f32 %v295_v9, %v294_v7  ;;  %v297_v32 = vsel %vm234_vm1, %v278_v6, 0.0 }
 0x304   :  { %v298_v42 = vadd.f32 %v297_v32, %v296_v56 }
 0x306   :  { %251 = vadd.xlane.f32.xlu1 %v250_v13 }
 0x332   :  { %v2398_v14 = vpop.f32.mrf.mxu0 }
 0x333   :  { %v2399_v33 = vadd.f32 %v2398_v14, %v2315_v20 }
 0x334   :  { %v2400_v19 = vpop.f32.mrf.mxu0 }
 0x335   :  { %v2401_v25 = vadd.f32 %v2400_v19, %v2319_v17  ;;  %v285_v17 = vadd.f32 %v284_v11, %v283_v1 }
 0x33c   :  { %v2469_v16 = vpop.f32.mrf.mxu1 }
 0x33d   :  { %v3584_v39 = vadd.f32 %v2469_v16, %v2399_v33  ;;  %v276_v16 = vcombine.high %v268_v21, %v268_v21 }
 0x33e   :  { %v2471_v22 = vpop.f32.mrf.mxu1 }
 0x33f   :  { %v3582_v34 = vadd.f32 %v2471_v22, %v2401_v25  ;;  %v2730_v58 = vmul.f32 %v3584_v39, %v3584_v39  ;;  %v2720_v2 = vsel %vm2618_vm0, %v3584_v39, 0.0  ;;  %v286_v22 = vsel %vm234_vm1, %v268_v21, 0.0  ;;  %v2616_v21 = vld [vmem:[#allocation19] sm:$0xf] }
 0x340   :  { %v287_v38 = vadd.f32 %v286_v22, %v285_v17  ;;  %v2664_v7 = vrot.slane %v2616_v21, %v3461_v30  ;;  %v2668_v9 = vrot.slane %v2616_v21, %v3480_v57 }
 0x341   :  { %v2731_v46 = vmul.f32 %v3582_v34, %v3582_v34  ;;  %v2721_v59 = vsel %vm2618_vm0, %v3582_v34, 0.0  ;;  %v2734_v13 = vsel %vm2618_vm0, %v2730_v58, 0.0 }
 0x342   :  { %v2722_v5 = vadd.f32 %v2721_v59, %v2720_v2 }
 0x343   :  { %v2735_v29 = vsel %vm2618_vm0, %v2731_v46, 0.0 }
 0x344   :  { %v2736_v15 = vadd.f32 %v2735_v29, %v2734_v13 }
 0x375   :  { %v2540_v35 = vpop.f32.mrf.mxu0 }
 0x376   :  { %v2541_v60 = vadd.f32 %v2540_v35, %v2323_v47  ;;  %v241_v35 = vadd.f32 %v240_v8, %v239_v49  ;;  %v288_v47 = vsel %vm234_vm1, %v276_v16, 0.0 }
 0x377   :  { %v2542_v48 = vpop.f32.mrf.mxu0  ;;  %v289_v43 = vadd.f32 %v288_v47, %v287_v38 }
 0x378   :  { %v2543_v62 = vadd.f32 %v2542_v48, %v2327_v52 }
 0x37c   :  { %v2611_v63 = vpop.f32.mrf.mxu1 }
 0x37d   :  { %v3609_v3 = vadd.f32 %v2611_v63, %v2541_v60 }
 0x37e   :  { %v2613_v4 = vpop.f32.mrf.mxu1 }
 0x37f   :  { %v2732_v26 = vmul.f32 %v3609_v3, %v3609_v3  ;;  %v3615_v10 = vadd.f32 %v2613_v4, %v2543_v62  ;;  %v2723_v12 = vsel %vm2618_vm0, %v3609_v3, 0.0  ;;  %v2660_v4 = vrot.slane %v2616_v21, %v3456_v24 }
 0x380   :  { %v2724_v14 = vadd.f32 %v2723_v12, %v2722_v5 }
 0x381   :  { %v2725_v18 = vsel %vm2618_vm0, %v3615_v10, 0.0  ;;  %v2733_v19 = vmul.f32 %v3615_v10, %v3615_v10  ;;  %v2737_v20 = vsel %vm2618_vm0, %v2732_v26, 0.0  ;;  %v2672_v26 = vrot.slane %v2616_v21, %v3477_v54 }
 0x382   :  { %v2726_v25 = vadd.f32 %v2725_v18, %v2724_v14  ;;  %v2738_v28 = vadd.f32 %v2737_v20, %v2736_v15 }
 0x383   :  { %v2739_v31 = vsel %vm2618_vm0, %v2733_v19, 0.0 }
 0x384   :  { %2727 = vadd.xlane.f32.xlu0 %v2726_v25  ;;  %v2740_v33 = vadd.f32 %v2739_v31, %v2738_v28  ;;  %v2617_v31 = vld [vmem:[#allocation20] sm:$0xf] }
 0x386   :  { %2741 = vadd.xlane.f32.xlu1 %v2740_v33 }
 0x388   :  { %242 = vadd.xlane.f32.xlu0 %v241_v35 }
 0x389   :  { %v2627_v44 = vpop.xlane.xlu0 %2626 }
 0x38a   :  { %299 = vadd.xlane.f32.xlu1 %v298_v42  ;;  %v2629_v45 = vmul.f32 0.001953125, %v2627_v44 }
 0x38b   :  { %v2642_v46 = vpop.xlane.xlu1 %2641 }
 0x38c   :  { %290 = vadd.xlane.f32.xlu0 %v289_v43  ;;  %v2643_v52 = vmul.f32 0.001953125, %v2642_v46  ;;  %v2644_v48 = vmul.f32 %v2629_v45, %v2629_v45  ;;  %v2646_v12 = vsub.f32 %v3525_v37, %v2629_v45  ;;  %v2647_v13 = vsub.f32 %v3523_v36, %v2629_v45 }
 0x38d   :  { %v2648_v17 = vsub.f32 %v3544_v55, %v2629_v45  ;;  %v2649_v18 = vsub.f32 %v3552_v0, %v2629_v45  ;;  %v2685_v0 = vrot.slane %v2617_v31, %v3456_v24  ;;  %v2689_v43 = vrot.slane %v2617_v31, %v3461_v30 }
 0x38e   :  { %v2645_v50 = vsub.f32 %v2643_v52, %v2644_v48 }
 0x38f   :  { %v252_v53 = vpop.xlane.xlu1 %251 }
 0x390   :  { %v2650_v58 = vadd.f32 1e-05, %v2645_v50  ;;  %v260_v59 = vsel %vm234_vm1, %v252_v53, 0.0  ;;  %v2693_v53 = vrot.slane %v2617_v31, %v3480_v57 }
 0x391   :  { %v261_v49 = vrot.slane %v260_v59, 4 }
 0x392   :  { %2958 = vrsqrt.f32 %v2650_v58  ;;  %v2697_v58 = vrot.slane %v2617_v31, %v3477_v54 }
 0x393   :  { %v262_v60 = vadd.f32 %v261_v49, %v260_v59 }
 0x395   :  { %v263_v61 = vrot.slane %v262_v60, 2 }
 0x397   :  { %v264_v11 = vadd.f32 %v263_v61, %v262_v60 }
 0x399   :  { %v265_v19 = vrot.slane %v264_v11, 1 }
 0x39b   :  { %v266_v42 = vadd.f32 %v265_v19, %v264_v11 }
 0x39f   :  { %v2959_v5 = vpop.eup %2958 }
 0x3a0   :  { %v2652_v32 = vmul.f32 %v2959_v5, %v2646_v12  ;;  %v2653_v33 = vmul.f32 %v2959_v5, %v2647_v13  ;;  %v2654_v36 = vmul.f32 %v2959_v5, %v2648_v17  ;;  %v2655_v35 = vmul.f32 %v2959_v5, %v2649_v18 }
 0x3a2   :  { %v2677_v52 = vmul.f32 %v2660_v4, %v2652_v32  ;;  %v2678_v48 = vmul.f32 %v2664_v7, %v2653_v33  ;;  %v2679_v50 = vmul.f32 %v2668_v9, %v2654_v36  ;;  %v2680_v61 = vmul.f32 %v2672_v26, %v2655_v35  ;;  %v2719_v9 = vld [vmem:[#allocation23] sm:$0xf] }
 0x3a3   :  { %v2785_v19 = vrot.slane %v2719_v9, %v3456_v24  ;;  %v2793_v36 = vrot.slane %v2719_v9, %v3480_v57 }
 0x3a4   :  { %v3653_v4 = vadd.f32 %v2693_v53, %v2679_v50  ;;  %v3655_v7 = vadd.f32 %v2697_v58, %v2680_v61 }
 0x3a6   :  { %vm2708_vm4 = vcmp.ge.f32.partialorder %v3653_v4, 0.0  ;;  %vm2709_vm5 = vcmp.ge.f32.partialorder %v3655_v7, 0.0 }
 0x40d   :  { %v2728_v63 = vpop.xlane.xlu0 %2727 }
 0x40e   :  { %v3630_v8 = vmul.f32 0.001953125, %v2728_v63  ;;  %v3649_v63 = vmul.f32 0.00048828125, %v266_v42  ;;  %v3306_v42 = vmov 1966171168  }
 0x40f   :  { %v2742_v1 = vpop.xlane.xlu1 %2741 }
 0x410   :  { %v2744_v2 = vmul.f32 %v3630_v8, %v3630_v8  ;;  %v2743_v62 = vmul.f32 0.001953125, %v2742_v1  ;;  %v320_v26 = vmul.f32 %v3649_v63, %v3649_v63  ;;  %v2749_v32 = vsub.f32 %v3615_v10, %v3630_v8 }
 0x411   :  { %v243_v29 = vpop.xlane.xlu0 %242 }
 0x412   :  { %v253_v6 = vsel %vm234_vm1, %v243_v29, 0.0  ;;  %v2745_v14 = vsub.f32 %v2743_v62, %v2744_v2  ;;  %v2702_v2 = vadd.f32 %v2685_v0, %v2677_v52  ;;  %v2718_v62 = vld [vmem:[#allocation22] sm:$0xf]  ;;  %v3651_v29 = vadd.f32 %v2689_v43, %v2678_v48 }
 0x413   :  { %v254_v15 = vrot.slane %v253_v6, 4  ;;  %v300_v16 = vpop.xlane.xlu1 %299  ;;  %v2760_v13 = vrot.slane %v2718_v62, %v3456_v24  ;;  %v2772_v17 = vrot.slane %v2718_v62, %v3477_v54  ;;  %v2829_v0 = vunpack.c.l.s4 %v3306_v42 }
 0x414   :  { %v308_v20 = vsel %vm234_vm1, %v300_v16, 0.0  ;;  %v2750_v22 = vadd.f32 1e-05, %v2745_v14  ;;  %v2764_v14 = vrot.slane %v2718_v62, %v3461_v30  ;;  %vm2706_vm2 = vcmp.ge.f32.partialorder %v2702_v2, 0.0 }
 0x415   :  { %v255_v25 = vadd.f32 %v254_v15, %v253_v6  ;;  %v309_v28 = vrot.slane %v308_v20, 4  ;;  %v291_v56 = vpop.xlane.xlu0 %290  ;;  %v2768_v16 = vrot.slane %v2718_v62, %v3480_v57  ;;  %vm2707_vm3 = vcmp.ge.f32.partialorder %v3651_v29, 0.0 }
 0x416   :  { %v301_v37 = vsel %vm234_vm1, %v291_v56, 0.0  ;;  %2960 = vrsqrt.f32 %v2750_v22  ;;  %v2746_v22 = vsub.f32 %v3584_v39, %v3630_v8  ;;  %v2712_v48 = vmul.f32 0.01, %v3653_v4 }
 0x417   :  { %v256_v38 = vrot.slane %v255_v25, 2  ;;  %v310_v47 = vadd.f32 %v309_v28, %v308_v20  ;;  %v302_v55 = vrot.slane %v301_v37, 4  ;;  %v2789_v20 = vrot.slane %v2719_v9, %v3461_v30 }
 0x418   :  { %v2748_v28 = vsub.f32 %v3609_v3, %v3630_v8  ;;  %v2797_v3 = vrot.slane %v2719_v9, %v3477_v54 }
 0x419   :  { %v257_v44 = vadd.f32 %v256_v38, %v255_v25  ;;  %v311_v45 = vrot.slane %v310_v47, 2  ;;  %v303_v46 = vadd.f32 %v302_v55, %v301_v37  ;;  %v2747_v25 = vsub.f32 %v3582_v34, %v3630_v8 }
 0x41b   :  { %v258_v59 = vrot.slane %v257_v44, 1  ;;  %v312_v49 = vadd.f32 %v311_v45, %v310_v47  ;;  %v304_v60 = vrot.slane %v303_v46, 2  ;;  %v2710_v45 = vmul.f32 0.01, %v2702_v2 }
 0x41d   :  { %v259_v21 = vadd.f32 %v258_v59, %v257_v44  ;;  %v313_v1 = vrot.slane %v312_v49, 1  ;;  %v305_v11 = vadd.f32 %v304_v60, %v303_v46  ;;  %v2711_v46 = vmul.f32 0.01, %v3651_v29 }
 0x41e   :  { %v2713_v59 = vmul.f32 0.01, %v3655_v7  ;;  %v2830_v60 = vunpack.c.0.s8 %v2829_v0 }
 0x41f   :  { %v314_v5 = vadd.f32 %v313_v1, %v312_v49  ;;  %v306_v6 = vrot.slane %v305_v11, 1  ;;  %v3657_v12 = vmul.f32 0.00048828125, %v259_v21  ;;  %v2714_v21 = vsel %vm2706_vm2, %v2702_v2, %v2710_v45 }
 0x420   :  { %v2715_v62 = vsel %vm2707_vm3, %v3651_v29, %v2711_v46 }
 0x421   :  { %v318_v15 = vmul.f32 0.00048828125, %v314_v5  ;;  %v307_v18 = vadd.f32 %v306_v6, %v305_v11  ;;  %v319_v37 = vmul.f32 %v3657_v12, %v3657_v12  ;;  %v2716_v5 = vsel %vm2708_vm4, %v3653_v4, %v2712_v48 }
 0x422   :  { %v325_v4 = vsub.f32 %v3528_v40, %v3649_v63 }
 0x423   :  { %v322_v56 = vsub.f32 %v318_v15, %v320_v26  ;;  %v2961_v31 = vpop.eup %2960  ;;  %v317_v33 = vmul.f32 0.00048828125, %v307_v18  ;;  %v2717_v26 = vsel %vm2709_vm5, %v3655_v7, %v2713_v59  ;;  %v2833_v18 = vsub.s32 %v2830_v60, %v3428_v41  ;;  %v335_v7 = vld [vmem:[#allocation7] sm:$0xff] }
 0x424   :  { %v2752_v35 = vmul.f32 %v2961_v31, %v2746_v22  ;;  %v2753_v38 = vmul.f32 %v2961_v31, %v2747_v25  ;;  %v2754_v34 = vmul.f32 %v2961_v31, %v2748_v28  ;;  %v2755_v55 = vmul.f32 %v2961_v31, %v2749_v32 }
 0x425   :  { %v328_v39 = vadd.f32 1e-05, %v322_v56  ;;  %v321_v47 = vsub.f32 %v317_v33, %v319_v37  ;;  %v326_v22 = vsub.f32 %v3542_v51, %v3649_v63  ;;  %v336_v56 = vld [vmem:[#allocation7 + $0x8] sm:$0xff]  ;;  %v323_v33 = vsub.f32 %v3567_v27, %v3657_v12 }
 0x426   :  { %v2777_v43 = vmul.f32 %v2760_v13, %v2752_v35  ;;  %v2778_v44 = vmul.f32 %v2764_v14, %v2753_v38  ;;  %v2779_v10 = vmul.f32 %v2768_v16, %v2754_v34  ;;  %v2780_v52 = vmul.f32 %v2772_v17, %v2755_v55 }
 0x427   :  { %2962 = vrsqrt.f32 %v328_v39  ;;  %v327_v8 = vadd.f32 1e-05, %v321_v47  ;;  %v324_v41 = vsub.f32 %v3578_v23, %v3657_v12  ;;  %v342_v39 = vld [vmem:[#allocation8 + $0x8] sm:$0xff] }
 0x428   :  { %v2802_v50 = vadd.f32 %v2785_v19, %v2777_v43  ;;  %v2803_v53 = vadd.f32 %v2789_v20, %v2778_v44  ;;  %v2804_v58 = vadd.f32 %v2793_v36, %v2779_v10  ;;  %v2805_v49 = vadd.f32 %v2797_v3, %v2780_v52  ;;  %v341_v36 = vld [vmem:[#allocation8] sm:$0xff] }
 0x429   :  { %2964 = vrsqrt.f32 %v327_v8 }
 0x42a   :  { %vm2806_vm6 = vcmp.ge.f32.partialorder %v2802_v50, 0.0  ;;  %vm2807_vm7 = vcmp.ge.f32.partialorder %v2803_v53, 0.0  ;;  %vm2808_vm8 = vcmp.ge.f32.partialorder %v2804_v58, 0.0  ;;  %v2810_v61 = vmul.f32 0.01, %v2802_v50 }
 0x42b   :  { %vm2809_vm9 = vcmp.ge.f32.partialorder %v2805_v49, 0.0  ;;  %v2811_v1 = vmul.f32 0.01, %v2803_v53  ;;  %v2812_v11 = vmul.f32 0.01, %v2804_v58 }
 0x42c   :  { %v2813_v6 = vmul.f32 0.01, %v2805_v49  ;;  %v2814_v9 = vsel %vm2806_vm6, %v2802_v50, %v2810_v61 }
 0x42d   :  { %v2815_v13 = vsel %vm2807_vm7, %v2803_v53, %v2811_v1  ;;  %v2816_v14 = vsel %vm2808_vm8, %v2804_v58, %v2812_v11  ;;  %v2818_v2 = vadd.f32 %v2814_v9, %v2714_v21 }
 0x42e   :  { %v2817_v15 = vsel %vm2809_vm9, %v2805_v49, %v2813_v6  ;;  %v2819_v16 = vadd.f32 %v2815_v13, %v2715_v62  ;;  %v2820_v17 = vadd.f32 %v2816_v14, %v2716_v5 }
 0x42f   :  { %v2821_v19 = vadd.f32 %v2817_v15, %v2717_v26 }
 0x430   :  { %v2826_v29 = vcombine.low %v2818_v2, %v2819_v16 }
 0x431   :  { %v2827_v20 = vcombine.low %v2820_v17, %v2821_v19 }
 0x432   :  { %v2834_v25 = vrot.slane %v2826_v29, %v2833_v18 }
 0x433   :  { %v2841_v31 = vrot.slane %v2827_v20, %v2833_v18 }
 0x434   :  { %v2963_v28 = vpop.eup %2962 }
 0x435   :  { %v333_v32 = vmul.f32 %v2963_v28, %v325_v4  ;;  %v334_v37 = vmul.f32 %v2963_v28, %v326_v22  ;;  %v2842_v35 = vcombine.low %v2834_v25, %v2841_v31  ;;  %v2843_v40 = vcombine.high %v2834_v25, %v2841_v31 }
 0x436   :  { %v2965_v38 = vpop.eup %2964 }
 0x437   :  { %v339_v34 = vmul.f32 %v335_v7, %v333_v32  ;;  %v340_v51 = vmul.f32 %v336_v56, %v334_v37  ;;  %v331_v63 = vmul.f32 %v2965_v38, %v323_v33  ;;  %v332_v47 = vmul.f32 %v2965_v38, %v324_v41 }
 0x438   :  { %v2850_v55 = vrot.slane %v2842_v35, %v2833_v18  ;;  %v2857_v3 = vrot.slane %v2843_v40, %v2833_v18 }
 0x439   :  { %v345_v42 = vadd.f32 %v341_v36, %v339_v34  ;;  %v346_v0 = vadd.f32 %v342_v39, %v340_v51  ;;  %v337_v43 = vmul.f32 %v335_v7, %v331_v63  ;;  %v338_v44 = vmul.f32 %v336_v56, %v332_v47 }
 0x43a   :  { %v2861_v27 = vrot.slane %v2850_v55, %v3456_v24  ;;  %v2865_v10 = vrot.slane %v2850_v55, %v3461_v30  ;;  %v2869_v23 = vrot.slane %v2850_v55, %v3480_v57  ;;  %v2873_v12 = vrot.slane %v2850_v55, %v3477_v54 }
 0x43b   :  { %v2877_v8 = vrot.slane %v2857_v3, %v3456_v24  ;;  %v2881_v45 = vrot.slane %v2857_v3, %v3461_v30  ;;  %v343_v46 = vadd.f32 %v341_v36, %v337_v43  ;;  %v344_v52 = vadd.f32 %v342_v39, %v338_v44 }
 0x43c   :  { %v2885_v48 = vrot.slane %v2857_v3, %v3480_v57  ;;  %v2889_v50 = vrot.slane %v2857_v3, %v3477_v54  ;;  %v2890_v53 = vcombine.low %v2861_v27, %v2865_v10  ;;  %v2891_v58 = vcombine.low %v2869_v23, %v2873_v12 }
 0x43d   :  { %v2892_v59 = vcombine.low %v2877_v8, %v2881_v45 }
 0x43e   :  { %v2893_v49 = vcombine.low %v2885_v48, %v2889_v50  ;;  %v2898_v60 = vadd.f32 %v2890_v53, %v343_v46  ;;  %v2899_v61 = vadd.f32 %v2891_v58, %v344_v52 }
 0x43f   :  { %v2900_v21 = vadd.f32 %v2892_v59, %v345_v42 }
 0x440   :  { %v2901_v1 = vadd.f32 %v2893_v49, %v346_v0  ;;  %2902 = vst [vmem:[#allocation25] sm:$0xff] %v2898_v60  ;;  %2903 = vst [vmem:[#allocation25 + $0x8] sm:$0xff] %v2899_v61 }
 0x441   :  { %2904 = vst [vmem:[#allocation25 + $0x10] sm:$0xff] %v2900_v21 }
 0x442   :  { %2905 = vst [vmem:[#allocation25 + $0x18] sm:$0xff] %v2901_v1 }
 0x443   :  { %3258 = shalt.err (!%p3255_p4)
}
 0x444   :  { %2917 = dma.vmem_to_hbm [thread:$0]  %s2912_s13, 512, %s3732_s14, [#allocation4], %s3292_s9, %s3292_s9, %s3293_s26  }
 0x445   :  { %3283 = dma.done.wait [#allocation4], 512  }
 0x446   :  { %3284 = vsyncadd [#allocation4], 4294966784 }
 0x447   :  { %2921 = vsyncpa [#allocation3], 1 }
 0x448   :  { %2922 = vsyncpa [#allocation6], 1 }
 0x449   :  { %2923 = vsyncpa [#allocation9], 1 }
 0x44a   :  { %2924 = vsyncpa [#allocation12], 1 }
 0x44b   :  { %2925 = vsyncpa [#allocation15], 1 }
 0x44c   :  { %2926 = vsyncpa [#allocation18], 1 }
 0x44d   :  { %2927 = vsyncpa [#allocation21], 1 }
 0x44e   :  { %2928 = vsyncpa [#allocation24], 1 }
 0x44f   :  { %2929 = vsyncpa [#allocation4], 1 }

</bundles_post_ra>
